<compile_context>
chip_gen: v7x
topology: tpu7x:2x2x1
jax: 0.10.0
libtpu: 0.0.40
codegen_flags: <defaults>
</compile_context>

<pallas_src>
import math

import jax
import jax.numpy as jnp
from jax.experimental import pallas as pl
from jax.experimental.pallas import tpu as pltpu

D_IN, D_H1, D_H2, D_OUT = 768, 512, 256, 28
D_OUT_PAD = 128            # lane-dense classifier output; wrapper slices [:, :28]
BN_EPS = 1e-5


# --------------------------------------------------------------------------- #
# Kernel
# --------------------------------------------------------------------------- #
def fused_forward_kernel(img_ref, txt_ref,
                         w_ref,
                         w1_ref, b1_ref,
                         w2_ref, b2_ref,
                         wc_ref, bc_ref,
                         out_ref):
    # Xvt = image_emb * text_emb   -- multiply in f32, single cast to bf16 for MXU.
    x = (img_ref[...] * txt_ref[...]).astype(jnp.bfloat16)        # (bm, 768)

    # Xvt = relu(Xvt @ W.T)   (W.T pre-transposed into w_ref in the wrapper)
    h = jnp.dot(x, w_ref[...], preferred_element_type=jnp.float32)
    h = jnp.maximum(h, 0.0).astype(jnp.bfloat16)                   # (bm, 768)

    # fc1 + bn1 (eval-mode BN folded into w1/b1 by the wrapper) + relu
    h = jnp.dot(h, w1_ref[...], preferred_element_type=jnp.float32) + b1_ref[...]
    h = jnp.maximum(h, 0.0).astype(jnp.bfloat16)                   # (bm, 512)

    # fc2 + bn2 (folded) + relu
    h = jnp.dot(h, w2_ref[...], preferred_element_type=jnp.float32) + b2_ref[...]
    h = jnp.maximum(h, 0.0).astype(jnp.bfloat16)                   # (bm, 256)

    # dropout(p=0.3) is identity in eval mode.
    # TODO(synk): training-mode stochastic dropout / batch-stat BN not implemented.

    # classifier (weights zero-padded to 128 output lanes -> unmasked stores)
    out = jnp.dot(h, wc_ref[...], preferred_element_type=jnp.float32) + bc_ref[...]
    out_ref[...] = out.astype(out_ref.dtype)                       # (bm, 128) bf16


# --------------------------------------------------------------------------- #
# Wrapper
# --------------------------------------------------------------------------- #
def _round_up(x, m):
    return ((x + m - 1) // m) * m


def _choose_bm(B, block_b):
    """Batch tile: multiple of 8 (sublane); multiple of 256 and >=2 grid steps
    for large batches (full MXU M passes on v6e/v7x, both TCs on v7x)."""
    if B <= block_b:
        bm = _round_up(B, 8)
        if bm > 256:
            bm = _round_up(pl.cdiv(B, 2), 256)   # split so the grid has >= 2 steps
        return max(8, min(bm, block_b))
    return block_b


def new_qa_early_fusion_forward(image_emb, text_emb, kparams, *, block_b=512):
    """Fused eval-mode forward. image_emb, text_emb: [B, 768] float32."""
    B = image_emb.shape[0]
    (wT, w1T, b1, w2T, b2, wcT, bc) = kparams

    bm = _choose_bm(B, block_b)
    grid = (pl.cdiv(B, bm),)

    act_spec = pl.BlockSpec((bm, D_IN), lambda i: (i, 0))
    out_spec = pl.BlockSpec((bm, D_OUT_PAD), lambda i: (i, 0))

    def _const_spec(shape, single_buffered):
        nd = len(shape)
        idx = lambda i: (0,) * nd
        if single_buffered:
            # Weights never change across grid steps -> no second pipeline buffer.
            return pl.BlockSpec(shape, idx, pipeline_mode=pl.Buffered(1))
        return pl.BlockSpec(shape, idx)

    def _run(single_buffered_weights):
        in_specs = [
            act_spec,                                          # image_emb block (f32)
            act_spec,                                          # text_emb block  (f32)
            _const_spec(wT.shape, single_buffered_weights),    # W.T           (768, 768) bf16
            _const_spec(w1T.shape, single_buffered_weights),   # fc1 w.T * bn1 (768, 512) bf16
            _const_spec(b1.shape, single_buffered_weights),    # fc1 b folded  (1, 512)   f32
            _const_spec(w2T.shape, single_buffered_weights),   # fc2 w.T * bn2 (512, 256) bf16
            _const_spec(b2.shape, single_buffered_weights),    # fc2 b folded  (1, 256)   f32
            _const_spec(wcT.shape, single_buffered_weights),   # cls w.T       (256, 128) bf16
            _const_spec(bc.shape, single_buffered_weights),    # cls b         (1, 128)   f32
        ]
        return pl.pallas_call(
            fused_forward_kernel,
            out_shape=jax.ShapeDtypeStruct((B, D_OUT_PAD), jnp.bfloat16),
            grid_spec=pltpu.PrefetchScalarGridSpec(
                num_scalar_prefetch=0,
                grid=grid,
                in_specs=in_specs,
                out_specs=out_spec,
            ),
            compiler_params=pltpu.CompilerParams(
                dimension_semantics=("parallel",),
                vmem_limit_bytes=40 * 1024 * 1024),
        )(image_emb, text_emb, wT, w1T, b1, w2T, b2, wcT, bc)

    try:
        out = _run(single_buffered_weights=True)
    except Exception:
        # Fallback if this jax build rejects pipeline_mode=pl.Buffered(1); the
        # constant index_map still prevents per-step weight re-DMA.
        out = _run(single_buffered_weights=False)

    return out[:, :D_OUT].astype(jnp.float32)


# --------------------------------------------------------------------------- #
# Parameter construction (mirrors the PyTorch module) + folding for the kernel
# --------------------------------------------------------------------------- #
def _kaiming_uniform(key, shape, fan_in, a=math.sqrt(5)):
    # torch.nn.init.kaiming_uniform_ with nonlinearity='leaky_relu'.
    gain = math.sqrt(2.0 / (1.0 + a * a))
    bound = gain * math.sqrt(3.0 / fan_in)
    return jax.random.uniform(key, shape, jnp.float32, -bound, bound)


def init_raw_params(key):
    """Torch-style raw parameters (f32), incl. BN running stats for eval mode."""
    keys = jax.random.split(key, 9)

    W = _kaiming_uniform(keys[0], (D_IN, D_IN), fan_in=D_IN)

    fc1_w = _kaiming_uniform(keys[1], (D_H1, D_IN), fan_in=D_IN)
    fc1_b = jax.random.uniform(keys[2], (D_H1,), jnp.float32,
                               -1.0 / math.sqrt(D_IN), 1.0 / math.sqrt(D_IN))
    fc2_w = _kaiming_uniform(keys[3], (D_H2, D_H1), fan_in=D_H1)
    fc2_b = jax.random.uniform(keys[4], (D_H2,), jnp.float32,
                               -1.0 / math.sqrt(D_H1), 1.0 / math.sqrt(D_H1))
    cls_w = _kaiming_uniform(keys[5], (D_OUT, D_H2), fan_in=D_H2)
    cls_b = jax.random.uniform(keys[6], (D_OUT,), jnp.float32,
                               -1.0 / math.sqrt(D_H2), 1.0 / math.sqrt(D_H2))

    # Torch init defaults are gamma=1, beta=0, mean=0, var=1; use non-trivial
    # values here (as after training) so the eval-mode BN folding is exercised.
    def bn_params(k, n):
        k1, k2, k3, k4 = jax.random.split(k, 4)
        return dict(
            gamma=jax.random.uniform(k1, (n,), jnp.float32, 0.5, 1.5),
            beta=0.3 * jax.random.normal(k2, (n,), jnp.float32),
            mean=0.2 * jax.random.normal(k3, (n,), jnp.float32),
            var=jax.random.uniform(k4, (n,), jnp.float32, 0.5, 1.5),
        )

    return dict(W=W, fc1_w=fc1_w, fc1_b=fc1_b, fc2_w=fc2_w, fc2_b=fc2_b,
                cls_w=cls_w, cls_b=cls_b,
                bn1=bn_params(keys[7], D_H1), bn2=bn_params(keys[8], D_H2))


def prepare_kernel_params(raw):
    """Transpose, fold eval-mode BN into fc weights/biases, pad classifier to
    128 lanes, and cast matmul operands to bf16."""
    def bn_fold(bn):
        scale = bn["gamma"] / jnp.sqrt(bn["var"] + BN_EPS)
        shift = bn["beta"] - bn["mean"] * scale
        return scale, shift

    s1, t1 = bn_fold(raw["bn1"])
    s2, t2 = bn_fold(raw["bn2"])

    wT = raw["W"].T                                          # (768, 768)
    w1T = raw["fc1_w"].T * s1[None, :]                       # (768, 512)
    b1 = (raw["fc1_b"] * s1 + t1).reshape(1, D_H1)           # (1, 512)
    w2T = raw["fc2_w"].T * s2[None, :]                       # (512, 256)
    b2 = (raw["fc2_b"] * s2 + t2).reshape(1, D_H2)           # (1, 256)

    wcT = jnp.zeros((D_H2, D_OUT_PAD), jnp.float32).at[:, :D_OUT].set(raw["cls_w"].T)
    bc = jnp.zeros((1, D_OUT_PAD), jnp.float32).at[:, :D_OUT].set(raw["cls_b"])

    return (wT.astype(jnp.bfloat16),
            w1T.astype(jnp.bfloat16), b1,
            w2T.astype(jnp.bfloat16), b2,
            wcT.astype(jnp.bfloat16), bc)


# --------------------------------------------------------------------------- #
# References
# --------------------------------------------------------------------------- #
def reference_forward_f32(image_emb, text_emb, raw):
    """Pure-f32 JAX reference with exact torch eval-mode semantics."""
    def bn(x, p):
        return (x - p["mean"]) / jnp.sqrt(p["var"] + BN_EPS) * p["gamma"] + p["beta"]

    x = image_emb * text_emb
    h = jnp.maximum(x @ raw["W"].T, 0.0)
    h = jnp.maximum(bn(h @ raw["fc1_w"].T + raw["fc1_b"], raw["bn1"]), 0.0)
    h = jnp.maximum(bn(h @ raw["fc2_w"].T + raw["fc2_b"], raw["bn2"]), 0.0)
    return h @ raw["cls_w"].T + raw["cls_b"]


def reference_forward_mirrored(image_emb, text_emb, kparams):
    """Reference mirroring the kernel's mixed precision (f32 fuse, bf16 MXU, bf16 out)."""
    wT, w1T, b1, w2T, b2, wcT, bc = kparams
    x = (image_emb * text_emb).astype(jnp.bfloat16)
    h = jnp.dot(x, wT, preferred_element_type=jnp.float32)
    h = jnp.maximum(h, 0.0).astype(jnp.bfloat16)
    h = jnp.dot(h, w1T, preferred_element_type=jnp.float32) + b1
    h = jnp.maximum(h, 0.0).astype(jnp.bfloat16)
    h = jnp.dot(h, w2T, preferred_element_type=jnp.float32) + b2
    h = jnp.maximum(h, 0.0).astype(jnp.bfloat16)
    out = jnp.dot(h, wcT, preferred_element_type=jnp.float32) + bc
    return out.astype(jnp.bfloat16).astype(jnp.float32)[:, :D_OUT]


# --------------------------------------------------------------------------- #
# Demo / self-check
# --------------------------------------------------------------------------- #
if __name__ == "__main__":
    key = jax.random.PRNGKey(0)
    k_img, k_txt, k_par = jax.random.split(key, 3)

    raw = init_raw_params(k_par)
    kparams = prepare_kernel_params(raw)

    # Small batch (single tile, block clamped to 8 rows).
    B = 8
    image_emb = jax.random.normal(k_img, (B, D_IN), jnp.float32)
    text_emb = jax.random.normal(k_txt, (B, D_IN), jnp.float32)

    out = new_qa_early_fusion_forward(image_emb, text_emb, kparams)
    out = jax.block_until_ready(out)
    assert out.shape == (B, D_OUT)

    mref = reference_forward_mirrored(image_emb, text_emb, kparams)
    fref = reference_forward_f32(image_emb, text_emb, raw)
    assert jnp.allclose(out, mref, atol=2e-2, rtol=2e-2), "mismatch vs mixed-precision reference"
    assert jnp.allclose(out, fref, atol=5e-2, rtol=5e-2), "mismatch vs f32 reference"

    # Larger batch exercising multi-tile grid + a partial (unpadded) last block.
    B2 = 260
    img2 = jax.random.normal(jax.random.PRNGKey(1), (B2, D_IN), jnp.float32)
    txt2 = jax.random.normal(jax.random.PRNGKey(2), (B2, D_IN), jnp.float32)
    out2 = jax.block_until_ready(
        new_qa_early_fusion_forward(img2, txt2, kparams, block_b=128))
    assert out2.shape == (B2, D_OUT)
    mref2 = reference_forward_mirrored(img2, txt2, kparams)
    assert jnp.allclose(out2, mref2, atol=2e-2, rtol=2e-2), "multi-tile mismatch"

    # Default tile-choice path (>=2 grid steps, 256-row tiles) on a mid-size batch.
    B3 = 300
    img3 = jax.random.normal(jax.random.PRNGKey(3), (B3, D_IN), jnp.float32)
    txt3 = jax.random.normal(jax.random.PRNGKey(4), (B3, D_IN), jnp.float32)
    out3 = jax.block_until_ready(new_qa_early_fusion_forward(img3, txt3, kparams))
    assert out3.shape == (B3, D_OUT)
    mref3 = reference_forward_mirrored(img3, txt3, kparams)
    assert jnp.allclose(out3, mref3, atol=2e-2, rtol=2e-2), "default-tile mismatch"

    print("KERNEL_OK")
</pallas_src>

<mosaic_0001>
module attributes {stable_mosaic.version = 11 : i64} {
  func.func @fused_forward_kernel(%arg0: i32, %arg1: memref<8x768xf32, #tpu.memory_space<vmem>>, %arg2: memref<8x768xf32, #tpu.memory_space<vmem>>, %arg3: memref<768x768xbf16, #tpu.memory_space<vmem>>, %arg4: memref<768x512xbf16, #tpu.memory_space<vmem>>, %arg5: memref<1x512xf32, #tpu.memory_space<vmem>>, %arg6: memref<512x256xbf16, #tpu.memory_space<vmem>>, %arg7: memref<1x256xf32, #tpu.memory_space<vmem>>, %arg8: memref<256x128xbf16, #tpu.memory_space<vmem>>, %arg9: memref<1x128xf32, #tpu.memory_space<vmem>>, %arg10: memref<8x128xbf16, #tpu.memory_space<vmem>>) attributes {dimension_semantics = [#tpu.dimension_semantics<parallel>], iteration_bounds = array<i64: 1>, scalar_prefetch = 0 : i64, scratch_operands = 0 : i64, tpu.core_type = #tpu.core_type<tc>, window_params = [{transform_indices = @transform_0, window_bounds = array<i64: 8, 768>}, {transform_indices = @transform_1, window_bounds = array<i64: 8, 768>}, {pipeline_mode = #tpu.pipeline_mode<synchronous>, transform_indices = @transform_2, window_bounds = array<i64: 768, 768>}, {pipeline_mode = #tpu.pipeline_mode<synchronous>, transform_indices = @transform_3, window_bounds = array<i64: 768, 512>}, {pipeline_mode = #tpu.pipeline_mode<synchronous>, transform_indices = @transform_4, window_bounds = array<i64: 1, 512>}, {pipeline_mode = #tpu.pipeline_mode<synchronous>, transform_indices = @transform_5, window_bounds = array<i64: 512, 256>}, {pipeline_mode = #tpu.pipeline_mode<synchronous>, transform_indices = @transform_6, window_bounds = array<i64: 1, 256>}, {pipeline_mode = #tpu.pipeline_mode<synchronous>, transform_indices = @transform_7, window_bounds = array<i64: 256, 128>}, {pipeline_mode = #tpu.pipeline_mode<synchronous>, transform_indices = @transform_8, window_bounds = array<i64: 1, 128>}, {transform_indices = @transform_9, window_bounds = array<i64: 8, 128>}]} {
    %c0 = arith.constant 0 : index
    %c0_0 = arith.constant 0 : index
    %0 = vector.load %arg1[%c0, %c0_0] : memref<8x768xf32, #tpu.memory_space<vmem>>, vector<8x768xf32>
    %c0_1 = arith.constant 0 : index
    %c0_2 = arith.constant 0 : index
    %1 = vector.load %arg2[%c0_1, %c0_2] : memref<8x768xf32, #tpu.memory_space<vmem>>, vector<8x768xf32>
    %2 = arith.mulf %0, %1 : vector<8x768xf32>
    %3 = arith.truncf %2 : vector<8x768xf32> to vector<8x768xbf16>
    %c0_3 = arith.constant 0 : index
    %c0_4 = arith.constant 0 : index
    %4 = vector.load %arg3[%c0_3, %c0_4] : memref<768x768xbf16, #tpu.memory_space<vmem>>, vector<768x768xbf16>
    %cst = arith.constant dense<0.000000e+00> : vector<8x768xf32>
    %5 = tpu.matmul %3, %4, %cst {dimension_numbers = #tpu.dot_dimension_numbers<[1], [0], [0], [1], [0, 0, 1, 1], [], []>} : vector<8x768xbf16>, vector<768x768xbf16>, vector<8x768xf32> -> vector<8x768xf32>
    %cst_5 = arith.constant 0.000000e+00 : f32
    %6 = vector.broadcast %cst_5 : f32 to vector<8x768xf32>
    %7 = arith.maximumf %5, %6 : vector<8x768xf32>
    %8 = arith.truncf %7 : vector<8x768xf32> to vector<8x768xbf16>
    %c0_6 = arith.constant 0 : index
    %c0_7 = arith.constant 0 : index
    %9 = vector.load %arg4[%c0_6, %c0_7] : memref<768x512xbf16, #tpu.memory_space<vmem>>, vector<768x512xbf16>
    %cst_8 = arith.constant dense<0.000000e+00> : vector<8x512xf32>
    %10 = tpu.matmul %8, %9, %cst_8 {dimension_numbers = #tpu.dot_dimension_numbers<[1], [0], [0], [1], [0, 0, 1, 1], [], []>} : vector<8x768xbf16>, vector<768x512xbf16>, vector<8x512xf32> -> vector<8x512xf32>
    %c0_9 = arith.constant 0 : index
    %c0_10 = arith.constant 0 : index
    %11 = vector.load %arg5[%c0_9, %c0_10] : memref<1x512xf32, #tpu.memory_space<vmem>>, vector<1x512xf32>
    %12 = vector.broadcast %11 : vector<1x512xf32> to vector<8x512xf32>
    %13 = arith.addf %10, %12 : vector<8x512xf32>
    %cst_11 = arith.constant 0.000000e+00 : f32
    %14 = vector.broadcast %cst_11 : f32 to vector<8x512xf32>
    %15 = arith.maximumf %13, %14 : vector<8x512xf32>
    %16 = arith.truncf %15 : vector<8x512xf32> to vector<8x512xbf16>
    %c0_12 = arith.constant 0 : index
    %c0_13 = arith.constant 0 : index
    %17 = vector.load %arg6[%c0_12, %c0_13] : memref<512x256xbf16, #tpu.memory_space<vmem>>, vector<512x256xbf16>
    %cst_14 = arith.constant dense<0.000000e+00> : vector<8x256xf32>
    %18 = tpu.matmul %16, %17, %cst_14 {dimension_numbers = #tpu.dot_dimension_numbers<[1], [0], [0], [1], [0, 0, 1, 1], [], []>} : vector<8x512xbf16>, vector<512x256xbf16>, vector<8x256xf32> -> vector<8x256xf32>
    %c0_15 = arith.constant 0 : index
    %c0_16 = arith.constant 0 : index
    %19 = vector.load %arg7[%c0_15, %c0_16] : memref<1x256xf32, #tpu.memory_space<vmem>>, vector<1x256xf32>
    %20 = vector.broadcast %19 : vector<1x256xf32> to vector<8x256xf32>
    %21 = arith.addf %18, %20 : vector<8x256xf32>
    %cst_17 = arith.constant 0.000000e+00 : f32
    %22 = vector.broadcast %cst_17 : f32 to vector<8x256xf32>
    %23 = arith.maximumf %21, %22 : vector<8x256xf32>
    %24 = arith.truncf %23 : vector<8x256xf32> to vector<8x256xbf16>
    %c0_18 = arith.constant 0 : index
    %c0_19 = arith.constant 0 : index
    %25 = vector.load %arg8[%c0_18, %c0_19] : memref<256x128xbf16, #tpu.memory_space<vmem>>, vector<256x128xbf16>
    %cst_20 = arith.constant dense<0.000000e+00> : vector<8x128xf32>
    %26 = tpu.matmul %24, %25, %cst_20 {dimension_numbers = #tpu.dot_dimension_numbers<[1], [0], [0], [1], [0, 0, 1, 1], [], []>} : vector<8x256xbf16>, vector<256x128xbf16>, vector<8x128xf32> -> vector<8x128xf32>
    %c0_21 = arith.constant 0 : index
    %c0_22 = arith.constant 0 : index
    %27 = vector.load %arg9[%c0_21, %c0_22] : memref<1x128xf32, #tpu.memory_space<vmem>>, vector<1x128xf32>
    %28 = vector.broadcast %27 : vector<1x128xf32> to vector<8x128xf32>
    %29 = arith.addf %26, %28 : vector<8x128xf32>
    %30 = arith.truncf %29 : vector<8x128xf32> to vector<8x128xbf16>
    %c0_23 = arith.constant 0 : index
    %c0_24 = arith.constant 0 : index
    %31 = vector.load %arg10[%c0_23, %c0_24] : memref<8x128xbf16, #tpu.memory_space<vmem>>, vector<8x128xbf16>
    tpu.vector_store %arg10[%c0_23, %c0_24], %30 {strides = array<i32>} : memref<8x128xbf16, #tpu.memory_space<vmem>>, vector<8x128xbf16>,
    return
  }
  func.func @transform_0(%arg0: i32) -> (i32, i32) {
    %c0_i32 = arith.constant 0 : i32
    %c0_i32_0 = arith.constant 0 : i32
    return %arg0, %c0_i32 : i32, i32
  }
  func.func @transform_1(%arg0: i32) -> (i32, i32) {
    %c0_i32 = arith.constant 0 : i32
    %c0_i32_0 = arith.constant 0 : i32
    return %arg0, %c0_i32 : i32, i32
  }
  func.func @transform_2(%arg0: i32) -> (i32, i32) {
    %c0_i32 = arith.constant 0 : i32
    %c0_i32_0 = arith.constant 0 : i32
    %c0_i32_1 = arith.constant 0 : i32
    return %c0_i32, %c0_i32_0 : i32, i32
  }
  func.func @transform_3(%arg0: i32) -> (i32, i32) {
    %c0_i32 = arith.constant 0 : i32
    %c0_i32_0 = arith.constant 0 : i32
    %c0_i32_1 = arith.constant 0 : i32
    return %c0_i32, %c0_i32_0 : i32, i32
  }
  func.func @transform_4(%arg0: i32) -> (i32, i32) {
    %c0_i32 = arith.constant 0 : i32
    %c0_i32_0 = arith.constant 0 : i32
    %c0_i32_1 = arith.constant 0 : i32
    return %c0_i32, %c0_i32_0 : i32, i32
  }
  func.func @transform_5(%arg0: i32) -> (i32, i32) {
    %c0_i32 = arith.constant 0 : i32
    %c0_i32_0 = arith.constant 0 : i32
    %c0_i32_1 = arith.constant 0 : i32
    return %c0_i32, %c0_i32_0 : i32, i32
  }
  func.func @transform_6(%arg0: i32) -> (i32, i32) {
    %c0_i32 = arith.constant 0 : i32
    %c0_i32_0 = arith.constant 0 : i32
    %c0_i32_1 = arith.constant 0 : i32
    return %c0_i32, %c0_i32_0 : i32, i32
  }
  func.func @transform_7(%arg0: i32) -> (i32, i32) {
    %c0_i32 = arith.constant 0 : i32
    %c0_i32_0 = arith.constant 0 : i32
    %c0_i32_1 = arith.constant 0 : i32
    return %c0_i32, %c0_i32_0 : i32, i32
  }
  func.func @transform_8(%arg0: i32) -> (i32, i32) {
    %c0_i32 = arith.constant 0 : i32
    %c0_i32_0 = arith.constant 0 : i32
    %c0_i32_1 = arith.constant 0 : i32
    return %c0_i32, %c0_i32_0 : i32, i32
  }
  func.func @transform_9(%arg0: i32) -> (i32, i32) {
    %c0_i32 = arith.constant 0 : i32
    %c0_i32_0 = arith.constant 0 : i32
    return %arg0, %c0_i32 : i32, i32
  }
}

module attributes {stable_mosaic.version = 11 : i64} {
  func.func @fused_forward_kernel(%arg0: i32, %arg1: memref<8x768xf32, #tpu.memory_space<vmem>>, %arg2: memref<8x768xf32, #tpu.memory_space<vmem>>, %arg3: memref<768x768xbf16, #tpu.memory_space<vmem>>, %arg4: memref<768x512xbf16, #tpu.memory_space<vmem>>, %arg5: memref<1x512xf32, #tpu.memory_space<vmem>>, %arg6: memref<512x256xbf16, #tpu.memory_space<vmem>>, %arg7: memref<1x256xf32, #tpu.memory_space<vmem>>, %arg8: memref<256x128xbf16, #tpu.memory_space<vmem>>, %arg9: memref<1x128xf32, #tpu.memory_space<vmem>>, %arg10: memref<8x128xbf16, #tpu.memory_space<vmem>>) attributes {dimension_semantics = [#tpu.dimension_semantics<parallel>], iteration_bounds = array<i64: 1>, scalar_prefetch = 0 : i64, scratch_operands = 0 : i64, tpu.core_type = #tpu.core_type<tc>, window_params = [{transform_indices = @transform_0, window_bounds = array<i64: 8, 768>}, {transform_indices = @transform_1, window_bounds = array<i64: 8, 768>}, {pipeline_mode = #tpu.pipeline_mode<synchronous>, transform_indices = @transform_2, window_bounds = array<i64: 768, 768>}, {pipeline_mode = #tpu.pipeline_mode<synchronous>, transform_indices = @transform_3, window_bounds = array<i64: 768, 512>}, {pipeline_mode = #tpu.pipeline_mode<synchronous>, transform_indices = @transform_4, window_bounds = array<i64: 1, 512>}, {pipeline_mode = #tpu.pipeline_mode<synchronous>, transform_indices = @transform_5, window_bounds = array<i64: 512, 256>}, {pipeline_mode = #tpu.pipeline_mode<synchronous>, transform_indices = @transform_6, window_bounds = array<i64: 1, 256>}, {pipeline_mode = #tpu.pipeline_mode<synchronous>, transform_indices = @transform_7, window_bounds = array<i64: 256, 128>}, {pipeline_mode = #tpu.pipeline_mode<synchronous>, transform_indices = @transform_8, window_bounds = array<i64: 1, 128>}, {transform_indices = @transform_9, window_bounds = array<i64: 8, 128>}]} {
    %c0 = arith.constant 0 : index
    %c0_0 = arith.constant 0 : index
    %0 = vector.load %arg1[%c0, %c0_0] : memref<8x768xf32, #tpu.memory_space<vmem>>, vector<8x768xf32>
    %c0_1 = arith.constant 0 : index
    %c0_2 = arith.constant 0 : index
    %1 = vector.load %arg2[%c0_1, %c0_2] : memref<8x768xf32, #tpu.memory_space<vmem>>, vector<8x768xf32>
    %2 = arith.mulf %0, %1 : vector<8x768xf32>
    %3 = arith.truncf %2 : vector<8x768xf32> to vector<8x768xbf16>
    %c0_3 = arith.constant 0 : index
    %c0_4 = arith.constant 0 : index
    %4 = vector.load %arg3[%c0_3, %c0_4] : memref<768x768xbf16, #tpu.memory_space<vmem>>, vector<768x768xbf16>
    %cst = arith.constant dense<0.000000e+00> : vector<8x768xf32>
    %5 = tpu.matmul %3, %4, %cst {dimension_numbers = #tpu.dot_dimension_numbers<[1], [0], [0], [1], [0, 0, 1, 1], [], []>} : vector<8x768xbf16>, vector<768x768xbf16>, vector<8x768xf32> -> vector<8x768xf32>
    %cst_5 = arith.constant 0.000000e+00 : f32
    %6 = vector.broadcast %cst_5 : f32 to vector<8x768xf32>
    %7 = arith.maximumf %5, %6 : vector<8x768xf32>
    %8 = arith.truncf %7 : vector<8x768xf32> to vector<8x768xbf16>
    %c0_6 = arith.constant 0 : index
    %c0_7 = arith.constant 0 : index
    %9 = vector.load %arg4[%c0_6, %c0_7] : memref<768x512xbf16, #tpu.memory_space<vmem>>, vector<768x512xbf16>
    %cst_8 = arith.constant dense<0.000000e+00> : vector<8x512xf32>
    %10 = tpu.matmul %8, %9, %cst_8 {dimension_numbers = #tpu.dot_dimension_numbers<[1], [0], [0], [1], [0, 0, 1, 1], [], []>} : vector<8x768xbf16>, vector<768x512xbf16>, vector<8x512xf32> -> vector<8x512xf32>
    %c0_9 = arith.constant 0 : index
    %c0_10 = arith.constant 0 : index
    %11 = vector.load %arg5[%c0_9, %c0_10] : memref<1x512xf32, #tpu.memory_space<vmem>>, vector<1x512xf32>
    %12 = vector.broadcast %11 : vector<1x512xf32> to vector<8x512xf32>
    %13 = arith.addf %10, %12 : vector<8x512xf32>
    %cst_11 = arith.constant 0.000000e+00 : f32
    %14 = vector.broadcast %cst_11 : f32 to vector<8x512xf32>
    %15 = arith.maximumf %13, %14 : vector<8x512xf32>
    %16 = arith.truncf %15 : vector<8x512xf32> to vector<8x512xbf16>
    %c0_12 = arith.constant 0 : index
    %c0_13 = arith.constant 0 : index
    %17 = vector.load %arg6[%c0_12, %c0_13] : memref<512x256xbf16, #tpu.memory_space<vmem>>, vector<512x256xbf16>
    %cst_14 = arith.constant dense<0.000000e+00> : vector<8x256xf32>
    %18 = tpu.matmul %16, %17, %cst_14 {dimension_numbers = #tpu.dot_dimension_numbers<[1], [0], [0], [1], [0, 0, 1, 1], [], []>} : vector<8x512xbf16>, vector<512x256xbf16>, vector<8x256xf32> -> vector<8x256xf32>
    %c0_15 = arith.constant 0 : index
    %c0_16 = arith.constant 0 : index
    %19 = vector.load %arg7[%c0_15, %c0_16] : memref<1x256xf32, #tpu.memory_space<vmem>>, vector<1x256xf32>
    %20 = vector.broadcast %19 : vector<1x256xf32> to vector<8x256xf32>
    %21 = arith.addf %18, %20 : vector<8x256xf32>
    %cst_17 = arith.constant 0.000000e+00 : f32
    %22 = vector.broadcast %cst_17 : f32 to vector<8x256xf32>
    %23 = arith.maximumf %21, %22 : vector<8x256xf32>
    %24 = arith.truncf %23 : vector<8x256xf32> to vector<8x256xbf16>
    %c0_18 = arith.constant 0 : index
    %c0_19 = arith.constant 0 : index
    %25 = vector.load %arg8[%c0_18, %c0_19] : memref<256x128xbf16, #tpu.memory_space<vmem>>, vector<256x128xbf16>
    %cst_20 = arith.constant dense<0.000000e+00> : vector<8x128xf32>
    %26 = tpu.matmul %24, %25, %cst_20 {dimension_numbers = #tpu.dot_dimension_numbers<[1], [0], [0], [1], [0, 0, 1, 1], [], []>} : vector<8x256xbf16>, vector<256x128xbf16>, vector<8x128xf32> -> vector<8x128xf32>
    %c0_21 = arith.constant 0 : index
    %c0_22 = arith.constant 0 : index
    %27 = vector.load %arg9[%c0_21, %c0_22] : memref<1x128xf32, #tpu.memory_space<vmem>>, vector<1x128xf32>
    %28 = vector.broadcast %27 : vector<1x128xf32> to vector<8x128xf32>
    %29 = arith.addf %26, %28 : vector<8x128xf32>
    %30 = arith.truncf %29 : vector<8x128xf32> to vector<8x128xbf16>
    %c0_23 = arith.constant 0 : index
    %c0_24 = arith.constant 0 : index
    %31 = vector.load %arg10[%c0_23, %c0_24] : memref<8x128xbf16, #tpu.memory_space<vmem>>, vector<8x128xbf16>
    tpu.vector_store %arg10[%c0_23, %c0_24], %30 {strides = array<i32>} : memref<8x128xbf16, #tpu.memory_space<vmem>>, vector<8x128xbf16>,
    return
  }
  func.func @transform_0(%arg0: i32) -> (i32, i32) {
    %c0_i32 = arith.constant 0 : i32
    %c0_i32_0 = arith.constant 0 : i32
    return %arg0, %c0_i32 : i32, i32
  }
  func.func @transform_1(%arg0: i32) -> (i32, i32) {
    %c0_i32 = arith.constant 0 : i32
    %c0_i32_0 = arith.constant 0 : i32
    return %arg0, %c0_i32 : i32, i32
  }
  func.func @transform_2(%arg0: i32) -> (i32, i32) {
    %c0_i32 = arith.constant 0 : i32
    %c0_i32_0 = arith.constant 0 : i32
    %c0_i32_1 = arith.constant 0 : i32
    return %c0_i32, %c0_i32_0 : i32, i32
  }
  func.func @transform_3(%arg0: i32) -> (i32, i32) {
    %c0_i32 = arith.constant 0 : i32
    %c0_i32_0 = arith.constant 0 : i32
    %c0_i32_1 = arith.constant 0 : i32
    return %c0_i32, %c0_i32_0 : i32, i32
  }
  func.func @transform_4(%arg0: i32) -> (i32, i32) {
    %c0_i32 = arith.constant 0 : i32
    %c0_i32_0 = arith.constant 0 : i32
    %c0_i32_1 = arith.constant 0 : i32
    return %c0_i32, %c0_i32_0 : i32, i32
  }
  func.func @transform_5(%arg0: i32) -> (i32, i32) {
    %c0_i32 = arith.constant 0 : i32
    %c0_i32_0 = arith.constant 0 : i32
    %c0_i32_1 = arith.constant 0 : i32
    return %c0_i32, %c0_i32_0 : i32, i32
  }
  func.func @transform_6(%arg0: i32) -> (i32, i32) {
    %c0_i32 = arith.constant 0 : i32
    %c0_i32_0 = arith.constant 0 : i32
    %c0_i32_1 = arith.constant 0 : i32
    return %c0_i32, %c0_i32_0 : i32, i32
  }
  func.func @transform_7(%arg0: i32) -> (i32, i32) {
    %c0_i32 = arith.constant 0 : i32
    %c0_i32_0 = arith.constant 0 : i32
    %c0_i32_1 = arith.constant 0 : i32
    return %c0_i32, %c0_i32_0 : i32, i32
  }
  func.func @transform_8(%arg0: i32) -> (i32, i32) {
    %c0_i32 = arith.constant 0 : i32
    %c0_i32_0 = arith.constant 0 : i32
    %c0_i32_1 = arith.constant 0 : i32
    return %c0_i32, %c0_i32_0 : i32, i32
  }
  func.func @transform_9(%arg0: i32) -> (i32, i32) {
    %c0_i32 = arith.constant 0 : i32
    %c0_i32_0 = arith.constant 0 : i32
    return %arg0, %c0_i32 : i32, i32
  }
}

</mosaic_0001>

<bundles_post_ra>
// kernel: tpu_custom_call.1
= control target key start
LH: loop header
LB: loop body
LE: loop exit
PB: predicated region body
PF: predicated region fallthrough
CT: control target
= control target key end

     0   :  { %14 = vsyncpa [#allocation3], 0  ;;  %s6370_s0 = inlined_call_operand.hbm [shape: f32[8,768], index: 0, kind: input, shape index: {}]   ;;  %s6371_s1 = inlined_call_operand.hbm [shape: f32[8,768], index: 1, kind: input, shape index: {}]   ;;  %s6372_s2 = inlined_call_operand.hbm [shape: bf16[768,768], index: 2, kind: input, shape index: {}]   ;;  %s6373_s3 = inlined_call_operand.hbm [shape: bf16[768,512], index: 3, kind: input, shape index: {}]   ;;  %s6374_s4 = inlined_call_operand.hbm [shape: f32[1,512], index: 4, kind: input, shape index: {}]   ;;  %s6375_s5 = inlined_call_operand.hbm [shape: bf16[512,256], index: 5, kind: input, shape index: {}]   ;;  %s6376_s6 = inlined_call_operand.hbm [shape: f32[1,256], index: 6, kind: input, shape index: {}]   ;;  %s6377_s7 = inlined_call_operand.hbm [shape: bf16[256,128], index: 7, kind: input, shape index: {}]   ;;  %s6378_s8 = inlined_call_operand.hbm [shape: f32[1,128], index: 8, kind: input, shape index: {}]   ;;  %s6379_s9 = inlined_call_operand.hbm [shape: bf16[8,128], index: 9, kind: output, shape index: {}]  }
   0x1   :  { %15 = vsyncpa [#allocation6], 0 }
   0x2   :  { %16 = vsyncpa [#allocation9], 0 }
   0x3   :  { %17 = vsyncpa [#allocation12], 0 }
   0x4   :  { %18 = vsyncpa [#allocation15], 0 }
   0x5   :  { %19 = vsyncpa [#allocation4], 0  ;;  %s6100_s30 = smov [#allocation5]   ;;  %s6101_s11 = smov [#allocation8]  }
   0x6   :  { %s36_s10 = sshll.u32 %s6100_s30, 4  ;;  %s57_s12 = sshll.u32 %s6101_s11, 4  ;;  %s37_s10 = int_to_ptr.vmem [resolvable:$true] %s36_s10  ;;  %s6168_s12 = int_to_ptr.vmem [resolvable:$true] %s57_s12 }
   0x7   :  { %s5868_s15 = scalar_lea.hbm %s6371_s1, 768 }
   0x8   :  { %p5869_p0 = scmp.ne.s32.totalorder %s6371_s1, %s5868_s15  ;;  %p5872_p1 = scmp.lt.u32.totalorder %s5868_s15, %s6371_s1 }
   0xa   :  { %p5874_p2 = pnand %p5872_p1, %p5869_p0 }
   0xc   :  { %5877 = shalt.err (!%p5874_p2)
}
   0xd   :  { %s5878_s20 = scalar_lea.vmem %s37_s10, 768  ;;  %p5883_p4 = scmp.lt.s32.totalorder %s37_s10, %s37_s10 }
   0xe   :  { %p5879_p3 = scmp.ne.s32.totalorder %s37_s10, %s5878_s20  ;;  %p5884_p5 = scmp.lt.s32.totalorder %s5878_s20, %s5878_s20 }
  0x10   :  { %p5885_p6 = por %p5884_p5, %p5883_p4 }
  0x12   :  { %p5886_p7 = pnand %p5885_p6, %p5879_p3 }
  0x14   :  { %5889 = shalt.err (!%p5886_p7)
}
  0x15   :  { %39 = dma.hbm_to_vmem [thread:$0]  %s6371_s1, 768, %s37_s10, [#allocation6]  }
  0x16   :  { %s5890_s25 = scalar_lea.hbm %s6373_s3, 24576 }
  0x17   :  { %p5891_p8 = scmp.ne.s32.totalorder %s6373_s3, %s5890_s25  ;;  %p5894_p9 = scmp.lt.u32.totalorder %s5890_s25, %s6373_s3 }
  0x19   :  { %p5896_p10 = pnand %p5894_p9, %p5891_p8 }
  0x1b   :  { %5899 = shalt.err (!%p5896_p10)
}
  0x1c   :  { %s5900_s30 = scalar_lea.vmem %s6168_s12, 24576  ;;  %p5905_p12 = scmp.lt.s32.totalorder %s6168_s12, %s6168_s12 }
  0x1d   :  { %p5901_p11 = scmp.ne.s32.totalorder %s6168_s12, %s5900_s30  ;;  %p5906_p13 = scmp.lt.s32.totalorder %s5900_s30, %s5900_s30 }
  0x1f   :  { %p5907_p0 = por %p5906_p13, %p5905_p12 }
  0x21   :  { %p5908_p1 = pnand %p5907_p0, %p5901_p11 }
  0x23   :  { %5911 = shalt.err (!%p5908_p1)
}
  0x24   :  { %s6102_s1 = smov 256   ;;  %s6103_s10 = smov 16  }
  0x25   :  { %63 = dma.hbm_to_vmem [thread:$0]  %s6373_s3, 24576, %s6168_s12, [#allocation9], %s6102_s1, %s6102_s1, %s6103_s10  }
  0x26   :  { %s6104_s14 = smov [#allocation11]   ;;  %s5912_s18 = scalar_lea.hbm %s6375_s5, 8192 }
  0x27   :  { %s79_s15 = sshll.u32 %s6104_s14, 4  ;;  %p5913_p2 = scmp.ne.s32.totalorder %s6375_s5, %s5912_s18  ;;  %s80_s15 = int_to_ptr.vmem [resolvable:$true] %s79_s15 }
  0x28   :  { %p5916_p3 = scmp.lt.u32.totalorder %s5912_s18, %s6375_s5 }
  0x2a   :  { %p5918_p4 = pnand %p5916_p3, %p5913_p2 }
  0x2c   :  { %5921 = shalt.err (!%p5918_p4)
}
  0x2d   :  { %s5922_s23 = scalar_lea.vmem %s80_s15, 8192  ;;  %p5927_p6 = scmp.lt.s32.totalorder %s80_s15, %s80_s15 }
  0x2e   :  { %p5923_p5 = scmp.ne.s32.totalorder %s80_s15, %s5922_s23  ;;  %p5928_p7 = scmp.lt.s32.totalorder %s5922_s23, %s5922_s23 }
  0x30   :  { %p5929_p8 = por %p5928_p7, %p5927_p6 }
  0x32   :  { %p5930_p9 = pnand %p5929_p8, %p5923_p5 }
  0x34   :  { %5933 = shalt.err (!%p5930_p9)
}
  0x35   :  { %s6105_s3 = smov 128   ;;  %s6106_s12 = smov 8  }
  0x36   :  { %85 = dma.hbm_to_vmem [thread:$0]  %s6375_s5, 8192, %s80_s15, [#allocation12], %s6105_s3, %s6105_s3, %s6106_s12  }
  0x37   :  { %s6107_s26 = smov [#allocation14]   ;;  %s5934_s30 = scalar_lea.hbm %s6377_s7, 2048 }
  0x38   :  { %s101_s27 = sshll.u32 %s6107_s26, 4  ;;  %p5935_p10 = scmp.ne.s32.totalorder %s6377_s7, %s5934_s30  ;;  %s102_s27 = int_to_ptr.vmem [resolvable:$true] %s101_s27 }
  0x39   :  { %p5938_p11 = scmp.lt.u32.totalorder %s5934_s30, %s6377_s7 }
  0x3b   :  { %p5940_p12 = pnand %p5938_p11, %p5935_p10 }
  0x3d   :  { %5943 = shalt.err (!%p5940_p12)
}
  0x3e   :  { %s5944_s14 = scalar_lea.vmem %s102_s27, 2048  ;;  %p5949_p0 = scmp.lt.s32.totalorder %s102_s27, %s102_s27 }
  0x3f   :  { %p5945_p13 = scmp.ne.s32.totalorder %s102_s27, %s5944_s14  ;;  %p5950_p1 = scmp.lt.s32.totalorder %s5944_s14, %s5944_s14 }
  0x41   :  { %p5951_p2 = por %p5950_p1, %p5949_p0 }
  0x43   :  { %p5952_p3 = pnand %p5951_p2, %p5945_p13 }
  0x45   :  { %5955 = shalt.err (!%p5952_p3)
}
  0x46   :  { %s6108_s5 = smov 64   ;;  %s6109_s15 = smov 4  }
  0x47   :  { %107 = dma.hbm_to_vmem [thread:$0]  %s6377_s7, 2048, %s102_s27, [#allocation15], %s6108_s5, %s6108_s5, %s6109_s15  }
  0x48   :  { %s6110_s18 = smov [#allocation2]   ;;  %s6111_s20 = smov [#allocation7]  }
  0x49   :  { %s26_s19 = sshll.u32 %s6110_s18, 4  ;;  %s45_s21 = sshll.u32 %s6111_s20, 4  ;;  %s27_s19 = int_to_ptr.vmem [resolvable:$true] %s26_s19  ;;  %s6223_s21 = int_to_ptr.vmem [resolvable:$true] %s45_s21 }
  0x4a   :  { %s5956_s3 = scalar_lea.hbm %s6370_s0, 768 }
  0x4b   :  { %p5957_p4 = scmp.ne.s32.totalorder %s6370_s0, %s5956_s3  ;;  %p5960_p5 = scmp.lt.u32.totalorder %s5956_s3, %s6370_s0 }
  0x4d   :  { %p5962_p6 = pnand %p5960_p5, %p5957_p4 }
  0x4f   :  { %5965 = shalt.err (!%p5962_p6)
}
  0x50   :  { %s5966_s7 = scalar_lea.vmem %s27_s19, 768  ;;  %p5971_p8 = scmp.lt.s32.totalorder %s27_s19, %s27_s19 }
  0x51   :  { %p5967_p7 = scmp.ne.s32.totalorder %s27_s19, %s5966_s7  ;;  %p5972_p9 = scmp.lt.s32.totalorder %s5966_s7, %s5966_s7 }
  0x53   :  { %p5973_p10 = por %p5972_p9, %p5971_p8 }
  0x55   :  { %p5974_p11 = pnand %p5973_p10, %p5967_p7 }
  0x57   :  { %5977 = shalt.err (!%p5974_p11)
}
  0x58   :  { %29 = dma.hbm_to_vmem [thread:$0]  %s6370_s0, 768, %s27_s19, [#allocation3]  }
  0x59   :  { %s5978_s1 = scalar_lea.hbm %s6372_s2, 36864 }
  0x5a   :  { %p5979_p12 = scmp.ne.s32.totalorder %s6372_s2, %s5978_s1  ;;  %p5982_p13 = scmp.lt.u32.totalorder %s5978_s1, %s6372_s2 }
  0x5c   :  { %p5984_p0 = pnand %p5982_p13, %p5979_p12 }
  0x5e   :  { %5987 = shalt.err (!%p5984_p0)
}
  0x5f   :  { %s5988_s5 = scalar_lea.vmem %s6223_s21, 36864  ;;  %p5993_p2 = scmp.lt.s32.totalorder %s6223_s21, %s6223_s21 }
  0x60   :  { %p5989_p1 = scmp.ne.s32.totalorder %s6223_s21, %s5988_s5  ;;  %p5994_p3 = scmp.lt.s32.totalorder %s5988_s5, %s5988_s5 }
  0x62   :  { %p5995_p4 = por %p5994_p3, %p5993_p2 }
  0x64   :  { %p5996_p5 = pnand %p5995_p4, %p5989_p1 }
  0x66   :  { %5999 = shalt.err (!%p5996_p5)
}
  0x67   :  { %s6112_s0 = smov 384   ;;  %s6113_s15 = smov 24  }
  0x68   :  { %51 = dma.hbm_to_vmem [thread:$0]  %s6372_s2, 36864, %s6223_s21, [#allocation6], %s6112_s0, %s6112_s0, %s6113_s15  }
  0x69   :  { %s6114_s18 = smov [#allocation10]   ;;  %s6115_s20 = smov [#allocation13]  }
  0x6a   :  { %s70_s19 = sshll.u32 %s6114_s18, 4  ;;  %s92_s22 = sshll.u32 %s6115_s20, 4  ;;  %s71_s19 = int_to_ptr.vmem [resolvable:$true] %s70_s19  ;;  %s93_s22 = int_to_ptr.vmem [resolvable:$true] %s92_s22 }
  0x6b   :  { %s6000_s12 = scalar_lea.hbm %s6374_s4, 64 }
  0x6c   :  { %p6001_p6 = scmp.ne.s32.totalorder %s6374_s4, %s6000_s12  ;;  %p6004_p7 = scmp.lt.u32.totalorder %s6000_s12, %s6374_s4 }
  0x6e   :  { %p6006_p8 = pnand %p6004_p7, %p6001_p6 }
  0x70   :  { %6009 = shalt.err (!%p6006_p8)
}
  0x71   :  { %s6010_s2 = scalar_lea.vmem %s71_s19, 64  ;;  %p6015_p10 = scmp.lt.s32.totalorder %s71_s19, %s71_s19 }
  0x72   :  { %p6011_p9 = scmp.ne.s32.totalorder %s71_s19, %s6010_s2  ;;  %p6016_p11 = scmp.lt.s32.totalorder %s6010_s2, %s6010_s2 }
  0x74   :  { %p6017_p12 = por %p6016_p11, %p6015_p10 }
  0x76   :  { %p6018_p13 = pnand %p6017_p12, %p6011_p9 }
  0x78   :  { %6021 = shalt.err (!%p6018_p13)
}
  0x79   :  { %73 = dma.hbm_to_vmem [thread:$0]  %s6374_s4, 64, %s71_s19, [#allocation9]  }
  0x7a   :  { %s6022_s30 = scalar_lea.hbm %s6376_s6, 32 }
  0x7b   :  { %p6023_p0 = scmp.ne.s32.totalorder %s6376_s6, %s6022_s30  ;;  %p6026_p1 = scmp.lt.u32.totalorder %s6022_s30, %s6376_s6 }
  0x7d   :  { %p6028_p2 = pnand %p6026_p1, %p6023_p0 }
  0x7f   :  { %6031 = shalt.err (!%p6028_p2)
}
  0x80   :  { %s6032_s14 = scalar_lea.vmem %s93_s22, 32  ;;  %p6037_p4 = scmp.lt.s32.totalorder %s93_s22, %s93_s22 }
  0x81   :  { %p6033_p3 = scmp.ne.s32.totalorder %s93_s22, %s6032_s14  ;;  %p6038_p5 = scmp.lt.s32.totalorder %s6032_s14, %s6032_s14 }
  0x83   :  { %p6039_p6 = por %p6038_p5, %p6037_p4 }
  0x85   :  { %p6040_p7 = pnand %p6039_p6, %p6033_p3 }
  0x87   :  { %6043 = shalt.err (!%p6040_p7)
}
  0x88   :  { %95 = dma.hbm_to_vmem [thread:$0]  %s6376_s6, 32, %s93_s22, [#allocation12]  }
  0x89   :  { %s6116_s0 = smov [#allocation16]   ;;  %s6044_s18 = scalar_lea.hbm %s6378_s8, 16 }
  0x8a   :  { %s114_s15 = sshll.u32 %s6116_s0, 4  ;;  %p6045_p8 = scmp.ne.s32.totalorder %s6378_s8, %s6044_s18  ;;  %s115_s15 = int_to_ptr.vmem [resolvable:$true] %s114_s15 }
  0x8b   :  { %p6048_p9 = scmp.lt.u32.totalorder %s6044_s18, %s6378_s8 }
  0x8d   :  { %p6050_p10 = pnand %p6048_p9, %p6045_p8 }
  0x8f   :  { %6053 = shalt.err (!%p6050_p10)
}
  0x90   :  { %s6054_s12 = scalar_lea.vmem %s115_s15, 16  ;;  %s6058_s6 = scalar_lea.vmem %s115_s15, 32 }
  0x91   :  { %p6055_p11 = scmp.ne.s32.totalorder %s115_s15, %s6054_s12  ;;  %p6059_p12 = scmp.lt.s32.totalorder %s115_s15, %s115_s15 }
  0x92   :  { %p6060_p13 = scmp.lt.s32.totalorder %s6058_s6, %s6054_s12 }
  0x94   :  { %p6061_p0 = por %p6060_p13, %p6059_p12 }
  0x96   :  { %p6062_p1 = pnand %p6061_p0, %p6055_p11 }
  0x98   :  { %6065 = shalt.err (!%p6062_p1)
}
  0x99   :  { %117 = dma.hbm_to_vmem [thread:$0]  %s6378_s8, 16, %s115_s15, [#allocation15]  }
  0x9a   :  { %6088 = dma.done.wait [#allocation3], 768  }
  0x9b   :  { %6089 = vsyncadd [#allocation3], 4294966528 }
  0x9c   :  { %6090 = dma.done.wait [#allocation6], 37632  }
  0x9d   :  { %6091 = vsyncadd [#allocation6], 4294929664 }
  0x9e   :  { %6092 = dma.done.wait [#allocation9], 24640  }
  0x9f   :  { %6093 = vsyncadd [#allocation9], 4294942656 }
  0xa0   :  { %6094 = dma.done.wait [#allocation12], 8224  }
  0xa1   :  { %6095 = vsyncadd [#allocation12], 4294959072 }
  0xa2   :  { %6096 = dma.done.wait [#allocation15], 2064  }
  0xa3   :  { %6097 = vsyncadd [#allocation15], 4294965232  ;;  %v5036_v0 = vld [vmem:[#allocation7 + $0x4] ss:$24 sps:$4 sm:$0xff]   ;;  %v5040_v2 = vld [vmem:[#allocation7] ss:$24 sps:$4 sm:$0xff]  }
  0xa4   :  { %v5038_v1 = vld [vmem:[#allocation7 + $0xc] ss:$24 sps:$4 sm:$0xff]   ;;  %1898 = vmatprep.subr.bf16.mxu0 %v5036_v0  ;;  %v5041_v3 = vld [vmem:[#allocation7 + $0x8] ss:$24 sps:$4 sm:$0xff]   ;;  %v5044_v5 = vld [vmem:[#allocation7 + $0x3c] ss:$24 sps:$4 sm:$0xff]  }
  0xa5   :  { %2021 = vmatprep.subr.bf16.mxu1 %v5038_v1  ;;  %v5042_v4 = vld [vmem:[#allocation7 + $0x34] ss:$24 sps:$4 sm:$0xff]   ;;  %1899 = vmatpush1.bf16.msra.mxu0 %v5040_v2  ;;  %v5046_v6 = vld [vmem:[#allocation7 + $0x30] ss:$24 sps:$4 sm:$0xff]   ;;  %v5048_v8 = vld [vmem:[#allocation7 + $0x64] ss:$24 sps:$4 sm:$0xff]  }
  0xa6   :  { %2022 = vmatpush1.bf16.msra.mxu1 %v5041_v3  ;;  %1900 = vmatprep.subr.bf16.mxu0 %v5042_v4  ;;  %v5047_v7 = vld [vmem:[#allocation7 + $0x38] ss:$24 sps:$4 sm:$0xff]   ;;  %v5050_v9 = vld [vmem:[#allocation7 + $0x6c] ss:$24 sps:$4 sm:$0xff]   ;;  %v5053_v11 = vld [vmem:[#allocation7 + $0x68] ss:$24 sps:$4 sm:$0xff]  }
  0xa7   :  { %2023 = vmatprep.subr.bf16.mxu1 %v5044_v5  ;;  %v5052_v10 = vld [vmem:[#allocation7 + $0x60] ss:$24 sps:$4 sm:$0xff]   ;;  %v5054_v12 = vld [vmem:[#allocation7 + $0x94] ss:$24 sps:$4 sm:$0xff]   ;;  %v5058_v14 = vld [vmem:[#allocation7 + $0x90] ss:$24 sps:$4 sm:$0xff]  }
  0xa8   :  { %v5056_v13 = vld [vmem:[#allocation7 + $0x9c] ss:$24 sps:$4 sm:$0xff]   ;;  %v5059_v15 = vld [vmem:[#allocation7 + $0x98] ss:$24 sps:$4 sm:$0xff]   ;;  %v5062_v17 = vld [vmem:[#allocation7 + $0xcc] ss:$24 sps:$4 sm:$0xff]  }
  0xa9   :  { %1901 = vmatpush1.bf16.msra.mxu0 %v5046_v6  ;;  %v5060_v16 = vld [vmem:[#allocation7 + $0xc4] ss:$24 sps:$4 sm:$0xff]   ;;  %v5064_v18 = vld [vmem:[#allocation7 + $0xc0] ss:$24 sps:$4 sm:$0xff]   ;;  %v5066_v20 = vld [vmem:[#allocation7 + $0xf4] ss:$24 sps:$4 sm:$0xff]  }
  0xaa   :  { %2024 = vmatpush1.bf16.msra.mxu1 %v5047_v7  ;;  %1902 = vmatprep.subr.bf16.mxu0 %v5048_v8  ;;  %v5065_v19 = vld [vmem:[#allocation7 + $0xc8] ss:$24 sps:$4 sm:$0xff]   ;;  %v5068_v21 = vld [vmem:[#allocation7 + $0xfc] ss:$24 sps:$4 sm:$0xff]   ;;  %v5071_v23 = vld [vmem:[#allocation7 + $0xf8] ss:$24 sps:$4 sm:$0xff]  }
  0xab   :  { %2025 = vmatprep.subr.bf16.mxu1 %v5050_v9  ;;  %v5070_v22 = vld [vmem:[#allocation7 + $0xf0] ss:$24 sps:$4 sm:$0xff]   ;;  %v5072_v24 = vld [vmem:[#allocation7 + $0x124] ss:$24 sps:$4 sm:$0xff]   ;;  %v5076_v26 = vld [vmem:[#allocation7 + $0x120] ss:$24 sps:$4 sm:$0xff]  }
  0xac   :  { %v5074_v25 = vld [vmem:[#allocation7 + $0x12c] ss:$24 sps:$4 sm:$0xff]   ;;  %v5077_v27 = vld [vmem:[#allocation7 + $0x128] ss:$24 sps:$4 sm:$0xff]   ;;  %v5080_v29 = vld [vmem:[#allocation7 + $0x15c] ss:$24 sps:$4 sm:$0xff]  }
  0xad   :  { %1903 = vmatpush1.bf16.msra.mxu0 %v5052_v10  ;;  %v5078_v28 = vld [vmem:[#allocation7 + $0x154] ss:$24 sps:$4 sm:$0xff]   ;;  %v5082_v30 = vld [vmem:[#allocation7 + $0x150] ss:$24 sps:$4 sm:$0xff]   ;;  %v5084_v32 = vld [vmem:[#allocation7 + $0x184] ss:$24 sps:$4 sm:$0xff]  }
  0xae   :  { %2026 = vmatpush1.bf16.msra.mxu1 %v5053_v11  ;;  %1904 = vmatprep.subr.bf16.mxu0 %v5054_v12  ;;  %v5083_v31 = vld [vmem:[#allocation7 + $0x158] ss:$24 sps:$4 sm:$0xff]   ;;  %v5086_v33 = vld [vmem:[#allocation7 + $0x18c] ss:$24 sps:$4 sm:$0xff]   ;;  %v5089_v35 = vld [vmem:[#allocation7 + $0x188] ss:$24 sps:$4 sm:$0xff]  }
  0xaf   :  { %2027 = vmatprep.subr.bf16.mxu1 %v5056_v13  ;;  %v5088_v34 = vld [vmem:[#allocation7 + $0x180] ss:$24 sps:$4 sm:$0xff]   ;;  %v5090_v36 = vld [vmem:[#allocation7 + $0x1b4] ss:$24 sps:$4 sm:$0xff]   ;;  %v5094_v38 = vld [vmem:[#allocation7 + $0x1b0] ss:$24 sps:$4 sm:$0xff]  }
  0xb0   :  { %v5092_v37 = vld [vmem:[#allocation7 + $0x1bc] ss:$24 sps:$4 sm:$0xff]   ;;  %v5095_v39 = vld [vmem:[#allocation7 + $0x1b8] ss:$24 sps:$4 sm:$0xff]   ;;  %v5098_v41 = vld [vmem:[#allocation7 + $0x1ec] ss:$24 sps:$4 sm:$0xff]  }
  0xb1   :  { %1905 = vmatpush1.bf16.msra.mxu0 %v5058_v14  ;;  %v5096_v40 = vld [vmem:[#allocation7 + $0x1e4] ss:$24 sps:$4 sm:$0xff]   ;;  %v5100_v42 = vld [vmem:[#allocation7 + $0x1e0] ss:$24 sps:$4 sm:$0xff]   ;;  %v5102_v44 = vld [vmem:[#allocation7 + $0x214] ss:$24 sps:$4 sm:$0xff]  }
  0xb2   :  { %2028 = vmatpush1.bf16.msra.mxu1 %v5059_v15  ;;  %1906 = vmatprep.subr.bf16.mxu0 %v5060_v16  ;;  %v5101_v43 = vld [vmem:[#allocation7 + $0x1e8] ss:$24 sps:$4 sm:$0xff]   ;;  %v5104_v45 = vld [vmem:[#allocation7 + $0x21c] ss:$24 sps:$4 sm:$0xff]   ;;  %v5107_v49 = vld [vmem:[#allocation7 + $0x218] ss:$24 sps:$4 sm:$0xff]  }
  0xb3   :  { %2029 = vmatprep.subr.bf16.mxu1 %v5062_v17  ;;  %v147_v46 = vld [vmem:[#allocation2 + $0x8] sm:$0xff]  ;;  %v153_v47 = vld [vmem:[#allocation5 + $0x8] sm:$0xff]  ;;  %v146_v1 = vld [vmem:[#allocation2] sm:$0xff]  ;;  %s6117_s8 = smov [#allocation17]  }
  0xb4   :  { %v5106_v48 = vld [vmem:[#allocation7 + $0x210] ss:$24 sps:$4 sm:$0xff]   ;;  %v159_v50 = vmul.f32 %v153_v47, %v147_v46  ;;  %v5108_v51 = vld [vmem:[#allocation7 + $0x244] ss:$24 sps:$4 sm:$0xff]   ;;  %v5112_v54 = vld [vmem:[#allocation7 + $0x240] ss:$24 sps:$4 sm:$0xff]  }
  0xb5   :  { %1907 = vmatpush1.bf16.msra.mxu0 %v5064_v18  ;;  %v5110_v52 = vld [vmem:[#allocation7 + $0x24c] ss:$24 sps:$4 sm:$0xff]   ;;  %v5113_v55 = vld [vmem:[#allocation7 + $0x248] ss:$24 sps:$4 sm:$0xff]   ;;  %v5116_v57 = vld [vmem:[#allocation7 + $0x27c] ss:$24 sps:$4 sm:$0xff]  }
  0xb6   :  { %2030 = vmatpush1.bf16.msra.mxu1 %v5065_v19  ;;  %1908 = vmatprep.subr.bf16.mxu0 %v5066_v20  ;;  %v6290_v53 = vpack.c.bf16 %v159_v50, %v159_v50  ;;  %v5114_v56 = vld [vmem:[#allocation7 + $0x274] ss:$24 sps:$4 sm:$0xff]   ;;  %v5118_v58 = vld [vmem:[#allocation7 + $0x270] ss:$24 sps:$4 sm:$0xff]   ;;  %v5120_v60 = vld [vmem:[#allocation7 + $0x2a4] ss:$24 sps:$4 sm:$0xff]  }
  0xb7   :  { %2031 = vmatprep.subr.bf16.mxu1 %v5068_v21  ;;  %v5119_v59 = vld [vmem:[#allocation7 + $0x278] ss:$24 sps:$4 sm:$0xff]   ;;  %v5122_v61 = vld [vmem:[#allocation7 + $0x2ac] ss:$24 sps:$4 sm:$0xff]   ;;  %v5125_v63 = vld [vmem:[#allocation7 + $0x2a8] ss:$24 sps:$4 sm:$0xff]  }
  0xb8   :  { %1930 = vmatprep.mubr.bf16.mxu0 %v6290_v53  ;;  %2053 = vmatprep.mubr.bf16.mxu1 %v6290_v53  ;;  %v5124_v62 = vld [vmem:[#allocation7 + $0x2a0] ss:$24 sps:$4 sm:$0xff]   ;;  %v5126_v0 = vld [vmem:[#allocation7 + $0x2d4] ss:$24 sps:$4 sm:$0xff]   ;;  %v5130_v4 = vld [vmem:[#allocation7 + $0x2d0] ss:$24 sps:$4 sm:$0xff]  }
  0xb9   :  { %1909 = vmatpush1.bf16.msra.mxu0 %v5070_v22  ;;  %v152_v2 = vld [vmem:[#allocation5] sm:$0xff]  ;;  %v5134_v7 = vld [vmem:[#allocation7 + $0x304] ss:$24 sps:$4 sm:$0xff]   ;;  %v5132_v9 = vld [vmem:[#allocation7 + $0x300] ss:$24 sps:$4 sm:$0xff]   ;;  %s4372_s25 = sshll.u32 %s6117_s8, 4  ;;  %s4373_s25 = int_to_ptr.vmem [resolvable:$true] %s4372_s25 }
  0xba   :  { %2032 = vmatpush1.bf16.msra.mxu1 %v5071_v23  ;;  %1910 = vmatprep.subr.bf16.mxu0 %v5072_v24  ;;  %v5128_v3 = vld [vmem:[#allocation7 + $0x2dc] ss:$24 sps:$4 sm:$0xff]   ;;  %v5131_v5 = vld [vmem:[#allocation7 + $0x2d8] ss:$24 sps:$4 sm:$0xff]   ;;  %v158_v6 = vmul.f32 %v152_v2, %v146_v1  ;;  %v5137_v8 = vld [vmem:[#allocation7 + $0x30c] ss:$24 sps:$4 sm:$0xff]   ;;  %p6071_p3 = scmp.lt.s32.totalorder %s4373_s25, %s4373_s25 }
  0xbb   :  { %2033 = vmatprep.subr.bf16.mxu1 %v5074_v25  ;;  %v5135_v10 = vld [vmem:[#allocation7 + $0x308] ss:$24 sps:$4 sm:$0xff]   ;;  %v5140_v12 = vld [vmem:[#allocation7 + $0x334] ss:$24 sps:$4 sm:$0xff]   ;;  %v5141_v15 = vld [vmem:[#allocation7 + $0x338] ss:$24 sps:$4 sm:$0xff]  }
  0xbc   :  { %v6294_v11 = vpack.c.bf16 %v158_v6, %v158_v6  ;;  %v5143_v13 = vld [vmem:[#allocation7 + $0x33c] ss:$24 sps:$4 sm:$0xff]   ;;  %v5138_v14 = vld [vmem:[#allocation7 + $0x330] ss:$24 sps:$4 sm:$0xff]   ;;  %v5149_v17 = vld [vmem:[#allocation7 + $0x36c] ss:$24 sps:$4 sm:$0xff]  }
  0xbd   :  { %1911 = vmatpush1.bf16.msra.mxu0 %v5076_v26  ;;  %v5146_v16 = vld [vmem:[#allocation7 + $0x364] ss:$24 sps:$4 sm:$0xff]   ;;  %v5144_v18 = vld [vmem:[#allocation7 + $0x360] ss:$24 sps:$4 sm:$0xff]   ;;  %v5152_v20 = vld [vmem:[#allocation7 + $0x394] ss:$24 sps:$4 sm:$0xff]  }
  0xbe   :  { %2034 = vmatpush1.bf16.msra.mxu1 %v5077_v27  ;;  %1912 = vmatprep.subr.bf16.mxu0 %v5078_v28  ;;  %v5147_v19 = vld [vmem:[#allocation7 + $0x368] ss:$24 sps:$4 sm:$0xff]   ;;  %v5155_v21 = vld [vmem:[#allocation7 + $0x39c] ss:$24 sps:$4 sm:$0xff]   ;;  %v5153_v23 = vld [vmem:[#allocation7 + $0x398] ss:$24 sps:$4 sm:$0xff]  }
  0xbf   :  { %2035 = vmatprep.subr.bf16.mxu1 %v5080_v29  ;;  %v5150_v22 = vld [vmem:[#allocation7 + $0x390] ss:$24 sps:$4 sm:$0xff]   ;;  %v5158_v24 = vld [vmem:[#allocation7 + $0x3c4] ss:$24 sps:$4 sm:$0xff]   ;;  %v5156_v26 = vld [vmem:[#allocation7 + $0x3c0] ss:$24 sps:$4 sm:$0xff]  }
  0xc0   :  { %v5161_v25 = vld [vmem:[#allocation7 + $0x3cc] ss:$24 sps:$4 sm:$0xff]   ;;  %v5159_v27 = vld [vmem:[#allocation7 + $0x3c8] ss:$24 sps:$4 sm:$0xff]   ;;  %v5167_v29 = vld [vmem:[#allocation7 + $0x3fc] ss:$24 sps:$4 sm:$0xff]  }
  0xc1   :  { %1913 = vmatpush1.bf16.msra.mxu0 %v5082_v30  ;;  %v5164_v28 = vld [vmem:[#allocation7 + $0x3f4] ss:$24 sps:$4 sm:$0xff]   ;;  %v5162_v30 = vld [vmem:[#allocation7 + $0x3f0] ss:$24 sps:$4 sm:$0xff]   ;;  %v5180_v46 = vld [vmem:[#allocation7 + $0x480] ss:$24 sps:$4 sm:$0xff]  }
  0xc2   :  { %2036 = vmatpush1.bf16.msra.mxu1 %v5083_v31  ;;  %1914 = vmatprep.subr.bf16.mxu0 %v5084_v32  ;;  %v5165_v31 = vld [vmem:[#allocation7 + $0x3f8] ss:$24 sps:$4 sm:$0xff]   ;;  %v5170_v32 = vld [vmem:[#allocation7 + $0x424] ss:$24 sps:$4 sm:$0xff]   ;;  %v5183_v47 = vld [vmem:[#allocation7 + $0x488] ss:$24 sps:$4 sm:$0xff]  }
  0xc3   :  { %2037 = vmatprep.subr.bf16.mxu1 %v5086_v33  ;;  %v5173_v33 = vld [vmem:[#allocation7 + $0x42c] ss:$24 sps:$4 sm:$0xff]   ;;  %v5186_v50 = vld [vmem:[#allocation7 + $0x4b0] ss:$24 sps:$4 sm:$0xff]   ;;  %v5215_v2 = vld [vmem:[#allocation7 + $0x57c] ss:$24 sps:$4 sm:$0xff]  }
  0xc4   :  { %v5212_v1 = vld [vmem:[#allocation7 + $0x574] ss:$24 sps:$4 sm:$0xff]   ;;  %s6066_s26 = scalar_lea.vmem %s4373_s25, 64 }
  0xc5   :  { %1915 = vmatpush1.bf16.msra.mxu0 %v5088_v34  ;;  %v149_v34 = vld [vmem:[#allocation2 + $0x18] sm:$0xff]  ;;  %v5221_v6 = vld [vmem:[#allocation7 + $0x5ac] ss:$24 sps:$4 sm:$0xff]   ;;  %p6067_p2 = scmp.ne.s32.totalorder %s4373_s25, %s6066_s26  ;;  %p6072_p4 = scmp.lt.s32.totalorder %s6066_s26, %s6066_s26 }
  0xc6   :  { %2038 = vmatpush1.bf16.msra.mxu1 %v5089_v35  ;;  %1916 = vmatprep.subr.bf16.mxu0 %v5090_v36  ;;  %v155_v35 = vld [vmem:[#allocation5 + $0x18] sm:$0xff]  ;;  %v5168_v36 = vld [vmem:[#allocation7 + $0x420] ss:$24 sps:$4 sm:$0xff]  }
  0xc7   :  { %2039 = vmatprep.subr.bf16.mxu1 %v5092_v37  ;;  %v5171_v37 = vld [vmem:[#allocation7 + $0x428] ss:$24 sps:$4 sm:$0xff]   ;;  %p6073_p5 = por %p6072_p4, %p6071_p3 }
  0xc9   :  { %1917 = vmatpush1.bf16.msra.mxu0 %v5094_v38  ;;  %v161_v38 = vmul.f32 %v155_v35, %v149_v34  ;;  %v5248_v34 = vld [vmem:[#allocation7 + $0x694] ss:$24 sps:$4 sm:$0xff]   ;;  %p6074_p6 = pnand %p6073_p5, %p6067_p2 }
  0xca   :  { %2040 = vmatpush1.bf16.msra.mxu1 %v5095_v39  ;;  %1918 = vmatprep.subr.bf16.mxu0 %v5096_v40  ;;  %v5176_v39 = vld [vmem:[#allocation7 + $0x454] ss:$24 sps:$4 sm:$0xff]  }
  0xcb   :  { %2041 = vmatprep.subr.bf16.mxu1 %v5098_v41  ;;  %v5179_v40 = vld [vmem:[#allocation7 + $0x45c] ss:$24 sps:$4 sm:$0xff]   ;;  %v6298_v41 = vpack.c.bf16 %v161_v38, %v161_v38 }
  0xcc   :  { %v5251_v35 = vld [vmem:[#allocation7 + $0x69c] ss:$24 sps:$4 sm:$0xff]  }
  0xcd   :  { %1919 = vmatpush1.bf16.msra.mxu0 %v5100_v42  ;;  %v5174_v42 = vld [vmem:[#allocation7 + $0x450] ss:$24 sps:$4 sm:$0xff]   ;;  %v5254_v38 = vld [vmem:[#allocation7 + $0x6c4] ss:$24 sps:$4 sm:$0xff]  }
  0xce   :  { %2042 = vmatpush1.bf16.msra.mxu1 %v5101_v43  ;;  %1920 = vmatprep.subr.bf16.mxu0 %v5102_v44  ;;  %v5177_v43 = vld [vmem:[#allocation7 + $0x458] ss:$24 sps:$4 sm:$0xff]   ;;  %v5182_v44 = vld [vmem:[#allocation7 + $0x484] ss:$24 sps:$4 sm:$0xff]  }
  0xcf   :  { %2043 = vmatprep.subr.bf16.mxu1 %v5104_v45  ;;  %v5185_v45 = vld [vmem:[#allocation7 + $0x48c] ss:$24 sps:$4 sm:$0xff]  }
  0xd1   :  { %1921 = vmatpush1.bf16.msra.mxu0 %v5106_v48  ;;  %v5188_v48 = vld [vmem:[#allocation7 + $0x4b4] ss:$24 sps:$4 sm:$0xff]  }
  0xd2   :  { %2044 = vmatpush1.bf16.msra.mxu1 %v5107_v49  ;;  %1922 = vmatprep.subr.bf16.mxu0 %v5108_v51  ;;  %v5191_v49 = vld [vmem:[#allocation7 + $0x4bc] ss:$24 sps:$4 sm:$0xff]   ;;  %v5189_v51 = vld [vmem:[#allocation7 + $0x4b8] ss:$24 sps:$4 sm:$0xff]  }
  0xd3   :  { %2045 = vmatprep.subr.bf16.mxu1 %v5110_v52  ;;  %v5194_v52 = vld [vmem:[#allocation7 + $0x4e4] ss:$24 sps:$4 sm:$0xff]  }
  0xd5   :  { %1923 = vmatpush1.bf16.msra.mxu0 %v5112_v54  ;;  %v5197_v54 = vld [vmem:[#allocation7 + $0x4ec] ss:$24 sps:$4 sm:$0xff]  }
  0xd6   :  { %2046 = vmatpush1.bf16.msra.mxu1 %v5113_v55  ;;  %1924 = vmatprep.subr.bf16.mxu0 %v5114_v56  ;;  %v5192_v55 = vld [vmem:[#allocation7 + $0x4e0] ss:$24 sps:$4 sm:$0xff]  }
  0xd7   :  { %2047 = vmatprep.subr.bf16.mxu1 %v5116_v57  ;;  %v5195_v56 = vld [vmem:[#allocation7 + $0x4e8] ss:$24 sps:$4 sm:$0xff]   ;;  %v5200_v57 = vld [vmem:[#allocation7 + $0x514] ss:$24 sps:$4 sm:$0xff]  }
  0xd9   :  { %1925 = vmatpush1.bf16.msra.mxu0 %v5118_v58  ;;  %v5203_v58 = vld [vmem:[#allocation7 + $0x51c] ss:$24 sps:$4 sm:$0xff]  }
  0xda   :  { %2048 = vmatpush1.bf16.msra.mxu1 %v5119_v59  ;;  %1926 = vmatprep.subr.bf16.mxu0 %v5120_v60  ;;  %v5198_v59 = vld [vmem:[#allocation7 + $0x510] ss:$24 sps:$4 sm:$0xff]  }
  0xdb   :  { %2049 = vmatprep.subr.bf16.mxu1 %v5122_v61  ;;  %v5201_v60 = vld [vmem:[#allocation7 + $0x518] ss:$24 sps:$4 sm:$0xff]   ;;  %v5206_v61 = vld [vmem:[#allocation7 + $0x544] ss:$24 sps:$4 sm:$0xff]  }
  0xdd   :  { %1927 = vmatpush1.bf16.msra.mxu0 %v5124_v62  ;;  %v5209_v62 = vld [vmem:[#allocation7 + $0x54c] ss:$24 sps:$4 sm:$0xff]  }
  0xde   :  { %2050 = vmatpush1.bf16.msra.mxu1 %v5125_v63  ;;  %1928 = vmatprep.subr.bf16.mxu0 %v5126_v0  ;;  %v5204_v63 = vld [vmem:[#allocation7 + $0x540] ss:$24 sps:$4 sm:$0xff]  }
  0xdf   :  { %2051 = vmatprep.subr.bf16.mxu1 %v5128_v3  ;;  %v5207_v0 = vld [vmem:[#allocation7 + $0x548] ss:$24 sps:$4 sm:$0xff]  }
  0xe0   :  { %v5210_v3 = vld [vmem:[#allocation7 + $0x570] ss:$24 sps:$4 sm:$0xff]  }
  0xe1   :  { %1929 = vmatpush1.bf16.msra.mxu0 %v5130_v4  ;;  %v5213_v4 = vld [vmem:[#allocation7 + $0x578] ss:$24 sps:$4 sm:$0xff]  }
  0xe2   :  { %2052 = vmatpush1.bf16.msra.mxu1 %v5131_v5  ;;  %1939 = vmatprep.subr.bf16.mxu0 %v5134_v7  ;;  %v5218_v5 = vld [vmem:[#allocation7 + $0x5a4] ss:$24 sps:$4 sm:$0xff]   ;;  %v5216_v7 = vld [vmem:[#allocation7 + $0x5a0] ss:$24 sps:$4 sm:$0xff]  }
  0xe3   :  { %2062 = vmatprep.subr.bf16.mxu1 %v5137_v8  ;;  %v5219_v8 = vld [vmem:[#allocation7 + $0x5a8] ss:$24 sps:$4 sm:$0xff]  }
  0xe4   :  { %1931 = vmatmul.mubr.bf16.vlgmr.msra.gmra.mrb[0].mxu0 %v6294_v11 }
  0xe5   :  { %2054 = vmatmul.mubr.bf16.vlgmr.msra.gmra.mrb[0].mxu1 %v6294_v11  ;;  %1940 = vmatpush1.bf16.msra.mxu0 %v5132_v9  ;;  %v5224_v9 = vld [vmem:[#allocation7 + $0x5d4] ss:$24 sps:$4 sm:$0xff]  }
  0xe6   :  { %2063 = vmatpush1.bf16.msra.mxu1 %v5135_v10  ;;  %1941 = vmatprep.subr.bf16.mxu0 %v5140_v12  ;;  %v148_v10 = vld [vmem:[#allocation2 + $0x10] sm:$0xff]  ;;  %v154_v12 = vld [vmem:[#allocation5 + $0x10] sm:$0xff] }
  0xe7   :  { %2064 = vmatprep.subr.bf16.mxu1 %v5143_v13  ;;  %1971 = vmatprep.mubr.bf16.mxu0 %v6298_v41  ;;  %v5227_v13 = vld [vmem:[#allocation7 + $0x5dc] ss:$24 sps:$4 sm:$0xff]  }
  0xe8   :  { %2094 = vmatprep.mubr.bf16.mxu1 %v6298_v41 }
  0xe9   :  { %1942 = vmatpush1.bf16.msra.mxu0 %v5138_v14  ;;  %v5222_v14 = vld [vmem:[#allocation7 + $0x5d0] ss:$24 sps:$4 sm:$0xff]  }
  0xea   :  { %2065 = vmatpush1.bf16.msra.mxu1 %v5141_v15  ;;  %1943 = vmatprep.subr.bf16.mxu0 %v5146_v16  ;;  %v5225_v15 = vld [vmem:[#allocation7 + $0x5d8] ss:$24 sps:$4 sm:$0xff]   ;;  %v160_v16 = vmul.f32 %v154_v12, %v148_v10  ;;  %v5303_v12 = vld [vmem:[#allocation7 + $0x848] ss:$24 sps:$4 sm:$0xff]  }
  0xeb   :  { %2066 = vmatprep.subr.bf16.mxu1 %v5149_v17  ;;  %v5230_v17 = vld [vmem:[#allocation7 + $0x604] ss:$24 sps:$4 sm:$0xff]   ;;  %v5300_v10 = vld [vmem:[#allocation7 + $0x840] ss:$24 sps:$4 sm:$0xff]  }
  0xed   :  { %1944 = vmatpush1.bf16.msra.mxu0 %v5144_v18  ;;  %v5233_v18 = vld [vmem:[#allocation7 + $0x60c] ss:$24 sps:$4 sm:$0xff]  }
  0xee   :  { %2067 = vmatpush1.bf16.msra.mxu1 %v5147_v19  ;;  %1945 = vmatprep.subr.bf16.mxu0 %v5152_v20  ;;  %v5228_v19 = vld [vmem:[#allocation7 + $0x600] ss:$24 sps:$4 sm:$0xff]  }
  0xef   :  { %2068 = vmatprep.subr.bf16.mxu1 %v5155_v21  ;;  %v5231_v20 = vld [vmem:[#allocation7 + $0x608] ss:$24 sps:$4 sm:$0xff]   ;;  %v6302_v21 = vpack.c.bf16 %v160_v16, %v160_v16  ;;  %v5309_v16 = vld [vmem:[#allocation7 + $0x878] ss:$24 sps:$4 sm:$0xff]  }
  0xf1   :  { %1946 = vmatpush1.bf16.msra.mxu0 %v5150_v22  ;;  %v5236_v22 = vld [vmem:[#allocation7 + $0x634] ss:$24 sps:$4 sm:$0xff]  }
  0xf2   :  { %2069 = vmatpush1.bf16.msra.mxu1 %v5153_v23  ;;  %1947 = vmatprep.subr.bf16.mxu0 %v5158_v24  ;;  %v5239_v23 = vld [vmem:[#allocation7 + $0x63c] ss:$24 sps:$4 sm:$0xff]   ;;  %v151_v24 = vld [vmem:[#allocation2 + $0x28] sm:$0xff] }
  0xf3   :  { %2070 = vmatprep.subr.bf16.mxu1 %v5161_v25  ;;  %v5234_v25 = vld [vmem:[#allocation7 + $0x630] ss:$24 sps:$4 sm:$0xff]  }
  0xf5   :  { %1948 = vmatpush1.bf16.msra.mxu0 %v5156_v26  ;;  %v5237_v26 = vld [vmem:[#allocation7 + $0x638] ss:$24 sps:$4 sm:$0xff]  }
  0xf6   :  { %2071 = vmatpush1.bf16.msra.mxu1 %v5159_v27  ;;  %1949 = vmatprep.subr.bf16.mxu0 %v5164_v28  ;;  %v157_v27 = vld [vmem:[#allocation5 + $0x28] sm:$0xff] }
  0xf7   :  { %2072 = vmatprep.subr.bf16.mxu1 %v5167_v29  ;;  %v5242_v28 = vld [vmem:[#allocation7 + $0x664] ss:$24 sps:$4 sm:$0xff]   ;;  %v163_v29 = vmul.f32 %v157_v27, %v151_v24 }
  0xf8   :  { %v150_v24 = vld [vmem:[#allocation2 + $0x20] sm:$0xff] }
  0xf9   :  { %1950 = vmatpush1.bf16.msra.mxu0 %v5162_v30  ;;  %v5245_v30 = vld [vmem:[#allocation7 + $0x66c] ss:$24 sps:$4 sm:$0xff]  }
  0xfa   :  { %2073 = vmatpush1.bf16.msra.mxu1 %v5165_v31  ;;  %1951 = vmatprep.subr.bf16.mxu0 %v5170_v32  ;;  %v6306_v31 = vpack.c.bf16 %v163_v29, %v163_v29  ;;  %v5240_v32 = vld [vmem:[#allocation7 + $0x660] ss:$24 sps:$4 sm:$0xff]   ;;  %v5326_v29 = vld [vmem:[#allocation7 + $0x14] ss:$24 sps:$4 sm:$0xff]  }
  0xfb   :  { %2074 = vmatprep.subr.bf16.mxu1 %v5173_v33  ;;  %v5243_v33 = vld [vmem:[#allocation7 + $0x668] ss:$24 sps:$4 sm:$0xff]  }
  0xfd   :  { %1952 = vmatpush1.bf16.msra.mxu0 %v5168_v36  ;;  %v5246_v36 = vld [vmem:[#allocation7 + $0x690] ss:$24 sps:$4 sm:$0xff]  }
  0xfe   :  { %2075 = vmatpush1.bf16.msra.mxu1 %v5171_v37  ;;  %1953 = vmatprep.subr.bf16.mxu0 %v5176_v39  ;;  %v5249_v37 = vld [vmem:[#allocation7 + $0x698] ss:$24 sps:$4 sm:$0xff]   ;;  %v5257_v39 = vld [vmem:[#allocation7 + $0x6cc] ss:$24 sps:$4 sm:$0xff]  }
  0xff   :  { %2076 = vmatprep.subr.bf16.mxu1 %v5179_v40  ;;  %v5252_v40 = vld [vmem:[#allocation7 + $0x6c0] ss:$24 sps:$4 sm:$0xff]  }
 0x101   :  { %1954 = vmatpush1.bf16.msra.mxu0 %v5174_v42  ;;  %v5255_v42 = vld [vmem:[#allocation7 + $0x6c8] ss:$24 sps:$4 sm:$0xff]  }
 0x102   :  { %2077 = vmatpush1.bf16.msra.mxu1 %v5177_v43  ;;  %1955 = vmatprep.subr.bf16.mxu0 %v5182_v44  ;;  %v5260_v43 = vld [vmem:[#allocation7 + $0x6f4] ss:$24 sps:$4 sm:$0xff]  }
 0x103   :  { %2078 = vmatprep.subr.bf16.mxu1 %v5185_v45  ;;  %v5263_v44 = vld [vmem:[#allocation7 + $0x6fc] ss:$24 sps:$4 sm:$0xff]   ;;  %v5258_v45 = vld [vmem:[#allocation7 + $0x6f0] ss:$24 sps:$4 sm:$0xff]  }
 0x105   :  { %1956 = vmatpush1.bf16.msra.mxu0 %v5180_v46  ;;  %v5261_v46 = vld [vmem:[#allocation7 + $0x6f8] ss:$24 sps:$4 sm:$0xff]  }
 0x106   :  { %2079 = vmatpush1.bf16.msra.mxu1 %v5183_v47  ;;  %1957 = vmatprep.subr.bf16.mxu0 %v5188_v48  ;;  %v5266_v47 = vld [vmem:[#allocation7 + $0x724] ss:$24 sps:$4 sm:$0xff]  }
 0x107   :  { %2080 = vmatprep.subr.bf16.mxu1 %v5191_v49  ;;  %v5269_v48 = vld [vmem:[#allocation7 + $0x72c] ss:$24 sps:$4 sm:$0xff]   ;;  %v5264_v49 = vld [vmem:[#allocation7 + $0x720] ss:$24 sps:$4 sm:$0xff]  }
 0x109   :  { %1958 = vmatpush1.bf16.msra.mxu0 %v5186_v50  ;;  %v5267_v50 = vld [vmem:[#allocation7 + $0x728] ss:$24 sps:$4 sm:$0xff]  }
 0x10a   :  { %2081 = vmatpush1.bf16.msra.mxu1 %v5189_v51  ;;  %1959 = vmatprep.subr.bf16.mxu0 %v5194_v52  ;;  %v5272_v51 = vld [vmem:[#allocation7 + $0x754] ss:$24 sps:$4 sm:$0xff]  }
 0x10b   :  { %2082 = vmatprep.subr.bf16.mxu1 %v5197_v54  ;;  %v5275_v52 = vld [vmem:[#allocation7 + $0x75c] ss:$24 sps:$4 sm:$0xff]   ;;  %v5270_v54 = vld [vmem:[#allocation7 + $0x750] ss:$24 sps:$4 sm:$0xff]  }
 0x10d   :  { %1960 = vmatpush1.bf16.msra.mxu0 %v5192_v55  ;;  %v5273_v55 = vld [vmem:[#allocation7 + $0x758] ss:$24 sps:$4 sm:$0xff]  }
 0x10e   :  { %2083 = vmatpush1.bf16.msra.mxu1 %v5195_v56  ;;  %1961 = vmatprep.subr.bf16.mxu0 %v5200_v57  ;;  %v5278_v56 = vld [vmem:[#allocation7 + $0x784] ss:$24 sps:$4 sm:$0xff]  }
 0x10f   :  { %2084 = vmatprep.subr.bf16.mxu1 %v5203_v58  ;;  %v5281_v57 = vld [vmem:[#allocation7 + $0x78c] ss:$24 sps:$4 sm:$0xff]   ;;  %v5276_v58 = vld [vmem:[#allocation7 + $0x780] ss:$24 sps:$4 sm:$0xff]  }
 0x111   :  { %1962 = vmatpush1.bf16.msra.mxu0 %v5198_v59  ;;  %v5279_v59 = vld [vmem:[#allocation7 + $0x788] ss:$24 sps:$4 sm:$0xff]  }
 0x112   :  { %2085 = vmatpush1.bf16.msra.mxu1 %v5201_v60  ;;  %1963 = vmatprep.subr.bf16.mxu0 %v5206_v61  ;;  %v5284_v60 = vld [vmem:[#allocation7 + $0x7b4] ss:$24 sps:$4 sm:$0xff]  }
 0x113   :  { %2086 = vmatprep.subr.bf16.mxu1 %v5209_v62  ;;  %v5287_v61 = vld [vmem:[#allocation7 + $0x7bc] ss:$24 sps:$4 sm:$0xff]   ;;  %v5282_v62 = vld [vmem:[#allocation7 + $0x7b0] ss:$24 sps:$4 sm:$0xff]  }
 0x115   :  { %1964 = vmatpush1.bf16.msra.mxu0 %v5204_v63  ;;  %v5285_v63 = vld [vmem:[#allocation7 + $0x7b8] ss:$24 sps:$4 sm:$0xff]  }
 0x116   :  { %2087 = vmatpush1.bf16.msra.mxu1 %v5207_v0  ;;  %1965 = vmatprep.subr.bf16.mxu0 %v5212_v1  ;;  %v5290_v0 = vld [vmem:[#allocation7 + $0x7e4] ss:$24 sps:$4 sm:$0xff]  }
 0x117   :  { %2088 = vmatprep.subr.bf16.mxu1 %v5215_v2  ;;  %v5293_v1 = vld [vmem:[#allocation7 + $0x7ec] ss:$24 sps:$4 sm:$0xff]   ;;  %v5288_v2 = vld [vmem:[#allocation7 + $0x7e0] ss:$24 sps:$4 sm:$0xff]  }
 0x119   :  { %1966 = vmatpush1.bf16.msra.mxu0 %v5210_v3  ;;  %v5291_v3 = vld [vmem:[#allocation7 + $0x7e8] ss:$24 sps:$4 sm:$0xff]  }
 0x11a   :  { %2089 = vmatpush1.bf16.msra.mxu1 %v5213_v4  ;;  %1967 = vmatprep.subr.bf16.mxu0 %v5218_v5  ;;  %v5296_v4 = vld [vmem:[#allocation7 + $0x814] ss:$24 sps:$4 sm:$0xff]  }
 0x11b   :  { %2090 = vmatprep.subr.bf16.mxu1 %v5221_v6  ;;  %v5299_v5 = vld [vmem:[#allocation7 + $0x81c] ss:$24 sps:$4 sm:$0xff]   ;;  %v5294_v6 = vld [vmem:[#allocation7 + $0x810] ss:$24 sps:$4 sm:$0xff]  }
 0x11d   :  { %1968 = vmatpush1.bf16.msra.mxu0 %v5216_v7  ;;  %v5297_v7 = vld [vmem:[#allocation7 + $0x818] ss:$24 sps:$4 sm:$0xff]  }
 0x11e   :  { %2091 = vmatpush1.bf16.msra.mxu1 %v5219_v8  ;;  %1969 = vmatprep.subr.bf16.mxu0 %v5224_v9  ;;  %v5302_v8 = vld [vmem:[#allocation7 + $0x844] ss:$24 sps:$4 sm:$0xff]  }
 0x11f   :  { %2092 = vmatprep.subr.bf16.mxu1 %v5227_v13  ;;  %v5305_v9 = vld [vmem:[#allocation7 + $0x84c] ss:$24 sps:$4 sm:$0xff]  }
 0x120   :  { %v5308_v13 = vld [vmem:[#allocation7 + $0x874] ss:$24 sps:$4 sm:$0xff]  }
 0x121   :  { %1970 = vmatpush1.bf16.msra.mxu0 %v5222_v14  ;;  %v5311_v14 = vld [vmem:[#allocation7 + $0x87c] ss:$24 sps:$4 sm:$0xff]  }
 0x122   :  { %2093 = vmatpush1.bf16.msra.mxu1 %v5225_v15  ;;  %1980 = vmatprep.subr.bf16.mxu0 %v5230_v17  ;;  %v5306_v15 = vld [vmem:[#allocation7 + $0x870] ss:$24 sps:$4 sm:$0xff]   ;;  %v5314_v17 = vld [vmem:[#allocation7 + $0x8a4] ss:$24 sps:$4 sm:$0xff]  }
 0x123   :  { %2103 = vmatprep.subr.bf16.mxu1 %v5233_v18  ;;  %v5317_v18 = vld [vmem:[#allocation7 + $0x8ac] ss:$24 sps:$4 sm:$0xff]  }
 0x124   :  { %1972 = vmatmul.mubr.bf16.vlgmr.msra.gmra.mrb[0].mxu0 %v6302_v21 }
 0x125   :  { %2095 = vmatmul.mubr.bf16.vlgmr.msra.gmra.mrb[0].mxu1 %v6302_v21  ;;  %1981 = vmatpush1.bf16.msra.mxu0 %v5228_v19  ;;  %v5312_v19 = vld [vmem:[#allocation7 + $0x8a0] ss:$24 sps:$4 sm:$0xff]  }
 0x126   :  { %2104 = vmatpush1.bf16.msra.mxu1 %v5231_v20  ;;  %1982 = vmatprep.subr.bf16.mxu0 %v5236_v22  ;;  %v5315_v20 = vld [vmem:[#allocation7 + $0x8a8] ss:$24 sps:$4 sm:$0xff]   ;;  %v5320_v22 = vld [vmem:[#allocation7 + $0x8d4] ss:$24 sps:$4 sm:$0xff]  }
 0x127   :  { %2105 = vmatprep.subr.bf16.mxu1 %v5239_v23  ;;  %2012 = vmatprep.mubr.bf16.mxu0 %v6306_v31  ;;  %v5323_v23 = vld [vmem:[#allocation7 + $0x8dc] ss:$24 sps:$4 sm:$0xff]  }
 0x128   :  { %2135 = vmatprep.mubr.bf16.mxu1 %v6306_v31 }
 0x129   :  { %1983 = vmatpush1.bf16.msra.mxu0 %v5234_v25  ;;  %v156_v25 = vld [vmem:[#allocation5 + $0x20] sm:$0xff] }
 0x12a   :  { %2106 = vmatpush1.bf16.msra.mxu1 %v5237_v26  ;;  %1984 = vmatprep.subr.bf16.mxu0 %v5242_v28  ;;  %v5318_v26 = vld [vmem:[#allocation7 + $0x8d0] ss:$24 sps:$4 sm:$0xff]   ;;  %v162_v27 = vmul.f32 %v156_v25, %v150_v24  ;;  %v5377_v24 = vld [vmem:[#allocation7 + $0x344] ss:$24 sps:$4 sm:$0xff]  }
 0x12b   :  { %2107 = vmatprep.subr.bf16.mxu1 %v5245_v30  ;;  %v5321_v28 = vld [vmem:[#allocation7 + $0x8d8] ss:$24 sps:$4 sm:$0xff]   ;;  %v5503_v25 = vld [vmem:[#allocation8 + $0x144] ss:$16 sps:$4 sm:$0xff]  }
 0x12c   :  { %v6310_v30 = vpack.c.bf16 %v162_v27, %v162_v27  ;;  %v5375_v27 = vld [vmem:[#allocation7 + $0x340] ss:$24 sps:$4 sm:$0xff]  }
 0x12d   :  { %1985 = vmatpush1.bf16.msra.mxu0 %v5240_v32  ;;  %v5324_v32 = vld [vmem:[#allocation7 + $0x10] ss:$24 sps:$4 sm:$0xff]  }
 0x12e   :  { %2108 = vmatpush1.bf16.msra.mxu1 %v5243_v33  ;;  %1986 = vmatprep.subr.bf16.mxu0 %v5248_v34  ;;  %v5329_v33 = vld [vmem:[#allocation7 + $0x44] ss:$24 sps:$4 sm:$0xff]   ;;  %v5327_v34 = vld [vmem:[#allocation7 + $0x40] ss:$24 sps:$4 sm:$0xff]  }
 0x12f   :  { %2109 = vmatprep.subr.bf16.mxu1 %v5251_v35  ;;  %v5332_v35 = vld [vmem:[#allocation7 + $0x74] ss:$24 sps:$4 sm:$0xff]  }
 0x131   :  { %1987 = vmatpush1.bf16.msra.mxu0 %v5246_v36  ;;  %v5330_v36 = vld [vmem:[#allocation7 + $0x70] ss:$24 sps:$4 sm:$0xff]  }
 0x132   :  { %2110 = vmatpush1.bf16.msra.mxu1 %v5249_v37  ;;  %1988 = vmatprep.subr.bf16.mxu0 %v5254_v38  ;;  %v5335_v37 = vld [vmem:[#allocation7 + $0xa4] ss:$24 sps:$4 sm:$0xff]   ;;  %v5333_v38 = vld [vmem:[#allocation7 + $0xa0] ss:$24 sps:$4 sm:$0xff]  }
 0x133   :  { %2111 = vmatprep.subr.bf16.mxu1 %v5257_v39  ;;  %v5338_v39 = vld [vmem:[#allocation7 + $0xd4] ss:$24 sps:$4 sm:$0xff]  }
 0x135   :  { %1989 = vmatpush1.bf16.msra.mxu0 %v5252_v40  ;;  %v5336_v40 = vld [vmem:[#allocation7 + $0xd0] ss:$24 sps:$4 sm:$0xff]  }
 0x136   :  { %2112 = vmatpush1.bf16.msra.mxu1 %v5255_v42  ;;  %1990 = vmatprep.subr.bf16.mxu0 %v5260_v43  ;;  %v5341_v42 = vld [vmem:[#allocation7 + $0x104] ss:$24 sps:$4 sm:$0xff]   ;;  %v5339_v43 = vld [vmem:[#allocation7 + $0x100] ss:$24 sps:$4 sm:$0xff]  }
 0x137   :  { %2113 = vmatprep.subr.bf16.mxu1 %v5263_v44  ;;  %v5344_v44 = vld [vmem:[#allocation7 + $0x134] ss:$24 sps:$4 sm:$0xff]  }
 0x139   :  { %1991 = vmatpush1.bf16.msra.mxu0 %v5258_v45  ;;  %v5342_v45 = vld [vmem:[#allocation7 + $0x130] ss:$24 sps:$4 sm:$0xff]  }
 0x13a   :  { %2114 = vmatpush1.bf16.msra.mxu1 %v5261_v46  ;;  %1992 = vmatprep.subr.bf16.mxu0 %v5266_v47  ;;  %v5443_v46 = vld [vmem:[#allocation8 + $0x4] ss:$16 sps:$4 sm:$0xff]   ;;  %v5441_v47 = vld [vmem:[#allocation8] ss:$16 sps:$4 sm:$0xff]  }
 0x13b   :  { %2115 = vmatprep.subr.bf16.mxu1 %v5269_v48  ;;  %v5345_v48 = vld [vmem:[#allocation7 + $0x160] ss:$24 sps:$4 sm:$0xff]  }
 0x13d   :  { %1993 = vmatpush1.bf16.msra.mxu0 %v5264_v49  ;;  %v5350_v49 = vld [vmem:[#allocation7 + $0x194] ss:$24 sps:$4 sm:$0xff]  }
 0x13e   :  { %2116 = vmatpush1.bf16.msra.mxu1 %v5267_v50  ;;  %1994 = vmatprep.subr.bf16.mxu0 %v5272_v51  ;;  %v5449_v50 = vld [vmem:[#allocation8 + $0x24] ss:$16 sps:$4 sm:$0xff]   ;;  %v5447_v51 = vld [vmem:[#allocation8 + $0x20] ss:$16 sps:$4 sm:$0xff]  }
 0x13f   :  { %2117 = vmatprep.subr.bf16.mxu1 %v5275_v52  ;;  %v5348_v52 = vld [vmem:[#allocation7 + $0x190] ss:$24 sps:$4 sm:$0xff]  }
 0x141   :  { %1995 = vmatpush1.bf16.msra.mxu0 %v5270_v54  ;;  %v5353_v54 = vld [vmem:[#allocation7 + $0x1c4] ss:$24 sps:$4 sm:$0xff]  }
 0x142   :  { %2118 = vmatpush1.bf16.msra.mxu1 %v5273_v55  ;;  %1996 = vmatprep.subr.bf16.mxu0 %v5278_v56  ;;  %v5455_v55 = vld [vmem:[#allocation8 + $0x44] ss:$16 sps:$4 sm:$0xff]   ;;  %v5453_v56 = vld [vmem:[#allocation8 + $0x40] ss:$16 sps:$4 sm:$0xff]  }
 0x143   :  { %2119 = vmatprep.subr.bf16.mxu1 %v5281_v57  ;;  %v5351_v57 = vld [vmem:[#allocation7 + $0x1c0] ss:$24 sps:$4 sm:$0xff]  }
 0x145   :  { %1997 = vmatpush1.bf16.msra.mxu0 %v5276_v58  ;;  %v5356_v58 = vld [vmem:[#allocation7 + $0x1f4] ss:$24 sps:$4 sm:$0xff]  }
 0x146   :  { %2120 = vmatpush1.bf16.msra.mxu1 %v5279_v59  ;;  %1998 = vmatprep.subr.bf16.mxu0 %v5284_v60  ;;  %v5461_v59 = vld [vmem:[#allocation8 + $0x64] ss:$16 sps:$4 sm:$0xff]   ;;  %v5459_v60 = vld [vmem:[#allocation8 + $0x60] ss:$16 sps:$4 sm:$0xff]  }
 0x147   :  { %2121 = vmatprep.subr.bf16.mxu1 %v5287_v61  ;;  %v5354_v61 = vld [vmem:[#allocation7 + $0x1f0] ss:$24 sps:$4 sm:$0xff]  }
 0x149   :  { %1999 = vmatpush1.bf16.msra.mxu0 %v5282_v62  ;;  %v5359_v62 = vld [vmem:[#allocation7 + $0x224] ss:$24 sps:$4 sm:$0xff]  }
 0x14a   :  { %2122 = vmatpush1.bf16.msra.mxu1 %v5285_v63  ;;  %2000 = vmatprep.subr.bf16.mxu0 %v5290_v0  ;;  %v5467_v63 = vld [vmem:[#allocation8 + $0x84] ss:$16 sps:$4 sm:$0xff]   ;;  %v5465_v0 = vld [vmem:[#allocation8 + $0x80] ss:$16 sps:$4 sm:$0xff]  }
 0x14b   :  { %2123 = vmatprep.subr.bf16.mxu1 %v5293_v1  ;;  %v5357_v1 = vld [vmem:[#allocation7 + $0x220] ss:$24 sps:$4 sm:$0xff]  }
 0x14d   :  { %2001 = vmatpush1.bf16.msra.mxu0 %v5288_v2  ;;  %v5362_v2 = vld [vmem:[#allocation7 + $0x254] ss:$24 sps:$4 sm:$0xff]  }
 0x14e   :  { %2124 = vmatpush1.bf16.msra.mxu1 %v5291_v3  ;;  %2002 = vmatprep.subr.bf16.mxu0 %v5296_v4  ;;  %v5473_v3 = vld [vmem:[#allocation8 + $0xa4] ss:$16 sps:$4 sm:$0xff]   ;;  %v5471_v4 = vld [vmem:[#allocation8 + $0xa0] ss:$16 sps:$4 sm:$0xff]  }
 0x14f   :  { %2125 = vmatprep.subr.bf16.mxu1 %v5299_v5  ;;  %v5360_v5 = vld [vmem:[#allocation7 + $0x250] ss:$24 sps:$4 sm:$0xff]  }
 0x151   :  { %2003 = vmatpush1.bf16.msra.mxu0 %v5294_v6  ;;  %v5365_v6 = vld [vmem:[#allocation7 + $0x284] ss:$24 sps:$4 sm:$0xff]  }
 0x152   :  { %2126 = vmatpush1.bf16.msra.mxu1 %v5297_v7  ;;  %2004 = vmatprep.subr.bf16.mxu0 %v5302_v8  ;;  %v5479_v7 = vld [vmem:[#allocation8 + $0xc4] ss:$16 sps:$4 sm:$0xff]   ;;  %v5477_v8 = vld [vmem:[#allocation8 + $0xc0] ss:$16 sps:$4 sm:$0xff]  }
 0x153   :  { %2127 = vmatprep.subr.bf16.mxu1 %v5305_v9  ;;  %v5363_v9 = vld [vmem:[#allocation7 + $0x280] ss:$24 sps:$4 sm:$0xff]  }
 0x155   :  { %2005 = vmatpush1.bf16.msra.mxu0 %v5300_v10  ;;  %v5368_v10 = vld [vmem:[#allocation7 + $0x2b4] ss:$24 sps:$4 sm:$0xff]  }
 0x156   :  { %2128 = vmatpush1.bf16.msra.mxu1 %v5303_v12  ;;  %2006 = vmatprep.subr.bf16.mxu0 %v5308_v13  ;;  %v5485_v12 = vld [vmem:[#allocation8 + $0xe4] ss:$16 sps:$4 sm:$0xff]   ;;  %v5483_v13 = vld [vmem:[#allocation8 + $0xe0] ss:$16 sps:$4 sm:$0xff]  }
 0x157   :  { %2129 = vmatprep.subr.bf16.mxu1 %v5311_v14  ;;  %v5366_v14 = vld [vmem:[#allocation7 + $0x2b0] ss:$24 sps:$4 sm:$0xff]  }
 0x159   :  { %2007 = vmatpush1.bf16.msra.mxu0 %v5306_v15  ;;  %v5371_v15 = vld [vmem:[#allocation7 + $0x2e4] ss:$24 sps:$4 sm:$0xff]  }
 0x15a   :  { %2130 = vmatpush1.bf16.msra.mxu1 %v5309_v16  ;;  %2008 = vmatprep.subr.bf16.mxu0 %v5314_v17  ;;  %v5491_v16 = vld [vmem:[#allocation8 + $0x104] ss:$16 sps:$4 sm:$0xff]   ;;  %v5489_v17 = vld [vmem:[#allocation8 + $0x100] ss:$16 sps:$4 sm:$0xff]  }
 0x15b   :  { %2131 = vmatprep.subr.bf16.mxu1 %v5317_v18  ;;  %v5369_v18 = vld [vmem:[#allocation7 + $0x2e0] ss:$24 sps:$4 sm:$0xff]  }
 0x15d   :  { %2009 = vmatpush1.bf16.msra.mxu0 %v5312_v19  ;;  %v5374_v19 = vld [vmem:[#allocation7 + $0x314] ss:$24 sps:$4 sm:$0xff]  }
 0x15e   :  { %2132 = vmatpush1.bf16.msra.mxu1 %v5315_v20  ;;  %2010 = vmatprep.subr.bf16.mxu0 %v5320_v22  ;;  %v5372_v20 = vld [vmem:[#allocation7 + $0x310] ss:$24 sps:$4 sm:$0xff]   ;;  %v5497_v22 = vld [vmem:[#allocation8 + $0x124] ss:$16 sps:$4 sm:$0xff]  }
 0x15f   :  { %2133 = vmatprep.subr.bf16.mxu1 %v5323_v23  ;;  %v5495_v23 = vld [vmem:[#allocation8 + $0x120] ss:$16 sps:$4 sm:$0xff]  }
 0x161   :  { %2011 = vmatpush1.bf16.msra.mxu0 %v5318_v26  ;;  %v5501_v26 = vld [vmem:[#allocation8 + $0x140] ss:$16 sps:$4 sm:$0xff]  }
 0x162   :  { %2134 = vmatpush1.bf16.msra.mxu1 %v5321_v28  ;;  %2144 = vmatprep.subr.bf16.mxu0 %v5326_v29  ;;  %v5380_v28 = vld [vmem:[#allocation7 + $0x374] ss:$24 sps:$4 sm:$0xff]   ;;  %v5507_v29 = vld [vmem:[#allocation8 + $0x160] ss:$16 sps:$4 sm:$0xff]  }
 0x163   :  { %3453 = vmatprep.subr.bf16.mxu1 %v5443_v46  ;;  %v5533_v46 = vld [vmem:[#allocation8 + $0x1e4] ss:$16 sps:$4 sm:$0xff]  }
 0x164   :  { %2013 = vmatmul.mubr.bf16.vlgmr.msra.gmra.mrb[0].mxu0 %v6310_v30 }
 0x165   :  { %2136 = vmatmul.mubr.bf16.vlgmr.msra.gmra.mrb[0].mxu1 %v6310_v30  ;;  %2145 = vmatpush1.bf16.msra.mxu0 %v5324_v32  ;;  %v5509_v32 = vld [vmem:[#allocation8 + $0x164] ss:$16 sps:$4 sm:$0xff]  }
 0x166   :  { %2176 = vmatprep.mubr.bf16.mxu0 %v6290_v53  ;;  %2146 = vmatprep.subr.bf16.mxu0 %v5329_v33  ;;  %v5347_v53 = vld [vmem:[#allocation7 + $0x164] ss:$24 sps:$4 sm:$0xff]   ;;  %v5378_v33 = vld [vmem:[#allocation7 + $0x370] ss:$24 sps:$4 sm:$0xff]  }
 0x167   :  { %3454 = vmatpush1.bf16.msra.mxu1 %v5441_v47  ;;  %v5531_v47 = vld [vmem:[#allocation8 + $0x1e0] ss:$16 sps:$4 sm:$0xff]  }
 0x168   :  { %3455 = vmatprep.subr.bf16.mxu1 %v5449_v50  ;;  %v5539_v50 = vld [vmem:[#allocation8 + $0x204] ss:$16 sps:$4 sm:$0xff]  }
 0x169   :  { %2147 = vmatpush1.bf16.msra.mxu0 %v5327_v34  ;;  %v5383_v34 = vld [vmem:[#allocation7 + $0x3a4] ss:$24 sps:$4 sm:$0xff]  }
 0x16a   :  { %2148 = vmatprep.subr.bf16.mxu0 %v5332_v35  ;;  %v5513_v35 = vld [vmem:[#allocation8 + $0x180] ss:$16 sps:$4 sm:$0xff]  }
 0x16b   :  { %3456 = vmatpush1.bf16.msra.mxu1 %v5447_v51  ;;  %v5398_v51 = vld [vmem:[#allocation7 + $0x494] ss:$24 sps:$4 sm:$0xff]  }
 0x16c   :  { %3457 = vmatprep.subr.bf16.mxu1 %v5455_v55  ;;  %v5399_v55 = vld [vmem:[#allocation7 + $0x4c0] ss:$24 sps:$4 sm:$0xff]  }
 0x16d   :  { %2149 = vmatpush1.bf16.msra.mxu0 %v5330_v36  ;;  %v5515_v36 = vld [vmem:[#allocation8 + $0x184] ss:$16 sps:$4 sm:$0xff]  }
 0x16e   :  { %2150 = vmatprep.subr.bf16.mxu0 %v5335_v37  ;;  %v5386_v37 = vld [vmem:[#allocation7 + $0x3d4] ss:$24 sps:$4 sm:$0xff]  }
 0x16f   :  { %3458 = vmatpush1.bf16.msra.mxu1 %v5453_v56  ;;  %v5404_v56 = vld [vmem:[#allocation7 + $0x4f4] ss:$24 sps:$4 sm:$0xff]  }
 0x170   :  { %3459 = vmatprep.subr.bf16.mxu1 %v5461_v59  ;;  %v5405_v59 = vld [vmem:[#allocation7 + $0x520] ss:$24 sps:$4 sm:$0xff]  }
 0x171   :  { %2151 = vmatpush1.bf16.msra.mxu0 %v5333_v38  ;;  %v5519_v38 = vld [vmem:[#allocation8 + $0x1a0] ss:$16 sps:$4 sm:$0xff]  }
 0x172   :  { %2152 = vmatprep.subr.bf16.mxu0 %v5338_v39  ;;  %v5384_v39 = vld [vmem:[#allocation7 + $0x3d0] ss:$24 sps:$4 sm:$0xff]  }
 0x173   :  { %3460 = vmatpush1.bf16.msra.mxu1 %v5459_v60  ;;  %v5410_v60 = vld [vmem:[#allocation7 + $0x554] ss:$24 sps:$4 sm:$0xff]  }
 0x174   :  { %3461 = vmatprep.subr.bf16.mxu1 %v5467_v63  ;;  %v5411_v63 = vld [vmem:[#allocation7 + $0x580] ss:$24 sps:$4 sm:$0xff]  }
 0x175   :  { %2153 = vmatpush1.bf16.msra.mxu0 %v5336_v40  ;;  %v5389_v40 = vld [vmem:[#allocation7 + $0x404] ss:$24 sps:$4 sm:$0xff]  }
 0x176   :  { %2154 = vmatprep.subr.bf16.mxu0 %v5341_v42  ;;  %v5525_v42 = vld [vmem:[#allocation8 + $0x1c0] ss:$16 sps:$4 sm:$0xff]  }
 0x177   :  { %3462 = vmatpush1.bf16.msra.mxu1 %v5465_v0  ;;  %v5416_v0 = vld [vmem:[#allocation7 + $0x5b4] ss:$24 sps:$4 sm:$0xff]  }
 0x178   :  { %3463 = vmatprep.subr.bf16.mxu1 %v5473_v3  ;;  %v5417_v3 = vld [vmem:[#allocation7 + $0x5e0] ss:$24 sps:$4 sm:$0xff]  }
 0x179   :  { %2155 = vmatpush1.bf16.msra.mxu0 %v5339_v43  ;;  %v5527_v43 = vld [vmem:[#allocation8 + $0x1c4] ss:$16 sps:$4 sm:$0xff]  }
 0x17a   :  { %2156 = vmatprep.subr.bf16.mxu0 %v5344_v44  ;;  %v5387_v44 = vld [vmem:[#allocation7 + $0x400] ss:$24 sps:$4 sm:$0xff]  }
 0x17b   :  { %3464 = vmatpush1.bf16.msra.mxu1 %v5471_v4  ;;  %v5422_v4 = vld [vmem:[#allocation7 + $0x614] ss:$24 sps:$4 sm:$0xff]  }
 0x17c   :  { %3465 = vmatprep.subr.bf16.mxu1 %v5479_v7  ;;  %v5423_v7 = vld [vmem:[#allocation7 + $0x640] ss:$24 sps:$4 sm:$0xff]  }
 0x17d   :  { %2157 = vmatpush1.bf16.msra.mxu0 %v5342_v45  ;;  %v5392_v45 = vld [vmem:[#allocation7 + $0x434] ss:$24 sps:$4 sm:$0xff]  }
 0x17e   :  { %2158 = vmatprep.subr.bf16.mxu0 %v5347_v53  ;;  %v5390_v53 = vld [vmem:[#allocation7 + $0x430] ss:$24 sps:$4 sm:$0xff]  }
 0x17f   :  { %3466 = vmatpush1.bf16.msra.mxu1 %v5477_v8  ;;  %v5428_v8 = vld [vmem:[#allocation7 + $0x674] ss:$24 sps:$4 sm:$0xff]  }
 0x180   :  { %3467 = vmatprep.subr.bf16.mxu1 %v5485_v12  ;;  %v5429_v12 = vld [vmem:[#allocation7 + $0x6a0] ss:$24 sps:$4 sm:$0xff]  }
 0x181   :  { %2159 = vmatpush1.bf16.msra.mxu0 %v5345_v48  ;;  %v5395_v48 = vld [vmem:[#allocation7 + $0x464] ss:$24 sps:$4 sm:$0xff]  }
 0x182   :  { %2160 = vmatprep.subr.bf16.mxu0 %v5350_v49  ;;  %v5393_v49 = vld [vmem:[#allocation7 + $0x460] ss:$24 sps:$4 sm:$0xff]  }
 0x183   :  { %3468 = vmatpush1.bf16.msra.mxu1 %v5483_v13  ;;  %v5434_v13 = vld [vmem:[#allocation7 + $0x6d4] ss:$24 sps:$4 sm:$0xff]  }
 0x184   :  { %3469 = vmatprep.subr.bf16.mxu1 %v5491_v16  ;;  %v5440_v16 = vld [vmem:[#allocation7 + $0x734] ss:$24 sps:$4 sm:$0xff]  }
 0x185   :  { %2161 = vmatpush1.bf16.msra.mxu0 %v5348_v52  ;;  %v5396_v52 = vld [vmem:[#allocation7 + $0x490] ss:$24 sps:$4 sm:$0xff]  }
 0x186   :  { %2162 = vmatprep.subr.bf16.mxu0 %v5353_v54  ;;  %v5401_v54 = vld [vmem:[#allocation7 + $0x4c4] ss:$24 sps:$4 sm:$0xff]  }
 0x187   :  { %3470 = vmatpush1.bf16.msra.mxu1 %v5489_v17  ;;  %v5446_v17 = vld [vmem:[#allocation7 + $0x764] ss:$24 sps:$4 sm:$0xff]  }
 0x188   :  { %3471 = vmatprep.subr.bf16.mxu1 %v5497_v22  ;;  %v5458_v22 = vld [vmem:[#allocation7 + $0x7c4] ss:$24 sps:$4 sm:$0xff]  }
 0x189   :  { %2163 = vmatpush1.bf16.msra.mxu0 %v5351_v57  ;;  %v5402_v57 = vld [vmem:[#allocation7 + $0x4f0] ss:$24 sps:$4 sm:$0xff]  }
 0x18a   :  { %2164 = vmatprep.subr.bf16.mxu0 %v5356_v58  ;;  %v5407_v58 = vld [vmem:[#allocation7 + $0x524] ss:$24 sps:$4 sm:$0xff]  }
 0x18b   :  { %3472 = vmatpush1.bf16.msra.mxu1 %v5495_v23  ;;  %v5456_v23 = vld [vmem:[#allocation7 + $0x7c0] ss:$24 sps:$4 sm:$0xff]  }
 0x18c   :  { %3473 = vmatprep.subr.bf16.mxu1 %v5503_v25  ;;  %v5462_v25 = vld [vmem:[#allocation7 + $0x7f0] ss:$24 sps:$4 sm:$0xff]  }
 0x18d   :  { %2165 = vmatpush1.bf16.msra.mxu0 %v5354_v61  ;;  %v5408_v61 = vld [vmem:[#allocation7 + $0x550] ss:$24 sps:$4 sm:$0xff]  }
 0x18e   :  { %2166 = vmatprep.subr.bf16.mxu0 %v5359_v62  ;;  %v5413_v62 = vld [vmem:[#allocation7 + $0x584] ss:$24 sps:$4 sm:$0xff]  }
 0x18f   :  { %3474 = vmatpush1.bf16.msra.mxu1 %v5501_v26  ;;  %v5470_v26 = vld [vmem:[#allocation7 + $0x824] ss:$24 sps:$4 sm:$0xff]  }
 0x190   :  { %3475 = vmatprep.subr.bf16.mxu1 %v5509_v32  ;;  %v5482_v32 = vld [vmem:[#allocation7 + $0x884] ss:$24 sps:$4 sm:$0xff]  }
 0x191   :  { %2167 = vmatpush1.bf16.msra.mxu0 %v5357_v1  ;;  %v5414_v1 = vld [vmem:[#allocation7 + $0x5b0] ss:$24 sps:$4 sm:$0xff]  }
 0x192   :  { %2168 = vmatprep.subr.bf16.mxu0 %v5362_v2  ;;  %v5419_v2 = vld [vmem:[#allocation7 + $0x5e4] ss:$24 sps:$4 sm:$0xff]  }
 0x193   :  { %3476 = vmatpush1.bf16.msra.mxu1 %v5507_v29  ;;  %v5474_v29 = vld [vmem:[#allocation7 + $0x850] ss:$24 sps:$4 sm:$0xff]  }
 0x194   :  { %3477 = vmatprep.subr.bf16.mxu1 %v5515_v36  ;;  %v5494_v36 = vld [vmem:[#allocation7 + $0x8e4] ss:$24 sps:$4 sm:$0xff]  }
 0x195   :  { %2169 = vmatpush1.bf16.msra.mxu0 %v5360_v5  ;;  %v5420_v5 = vld [vmem:[#allocation7 + $0x610] ss:$24 sps:$4 sm:$0xff]  }
 0x196   :  { %2170 = vmatprep.subr.bf16.mxu0 %v5365_v6  ;;  %v5425_v6 = vld [vmem:[#allocation7 + $0x644] ss:$24 sps:$4 sm:$0xff]  }
 0x197   :  { %3478 = vmatpush1.bf16.msra.mxu1 %v5513_v35  ;;  %v5486_v35 = vld [vmem:[#allocation7 + $0x8b0] ss:$24 sps:$4 sm:$0xff]  }
 0x199   :  { %2171 = vmatpush1.bf16.msra.mxu0 %v5363_v9  ;;  %v5426_v9 = vld [vmem:[#allocation7 + $0x670] ss:$24 sps:$4 sm:$0xff]  }
 0x19a   :  { %2172 = vmatprep.subr.bf16.mxu0 %v5368_v10  ;;  %v5431_v10 = vld [vmem:[#allocation7 + $0x6a4] ss:$24 sps:$4 sm:$0xff]  }
 0x19d   :  { %2173 = vmatpush1.bf16.msra.mxu0 %v5366_v14  ;;  %v5432_v14 = vld [vmem:[#allocation7 + $0x6d0] ss:$24 sps:$4 sm:$0xff]  }
 0x19e   :  { %2174 = vmatprep.subr.bf16.mxu0 %v5371_v15  ;;  %v5437_v15 = vld [vmem:[#allocation7 + $0x704] ss:$24 sps:$4 sm:$0xff]  }
 0x1a1   :  { %2175 = vmatpush1.bf16.msra.mxu0 %v5369_v18  ;;  %v5444_v18 = vld [vmem:[#allocation7 + $0x760] ss:$24 sps:$4 sm:$0xff]  }
 0x1a2   :  { %2185 = vmatprep.subr.bf16.mxu0 %v5374_v19  ;;  %v5452_v19 = vld [vmem:[#allocation7 + $0x794] ss:$24 sps:$4 sm:$0xff]  }
 0x1a4   :  { %2177 = vmatmul.mubr.bf16.vlgmr.msra.gmra.mrb[4].mxu0 %v6294_v11  ;;  %v5381_v11 = vld [vmem:[#allocation7 + $0x3a0] ss:$24 sps:$4 sm:$0xff]  }
 0x1a5   :  { %2186 = vmatpush1.bf16.msra.mxu0 %v5372_v20  ;;  %2217 = vmatprep.mubr.bf16.mxu0 %v6298_v41  ;;  %v5521_v41 = vld [vmem:[#allocation8 + $0x1a4] ss:$16 sps:$4 sm:$0xff]   ;;  %v5450_v20 = vld [vmem:[#allocation7 + $0x790] ss:$24 sps:$4 sm:$0xff]  }
 0x1a6   :  { %2187 = vmatprep.subr.bf16.mxu0 %v5377_v24  ;;  %3479 = vmatprep.subr.bf16.mxu1 %v5521_v41  ;;  %v5464_v24 = vld [vmem:[#allocation7 + $0x7f4] ss:$24 sps:$4 sm:$0xff]  }
 0x1a7   :  { %3480 = vmatpush1.bf16.msra.mxu1 %v5519_v38  ;;  %v5498_v38 = vld [vmem:[#allocation8 + $0x8] ss:$16 sps:$4 sm:$0xff]   ;;  %v5506_v41 = vld [vmem:[#allocation8 + $0x2c] ss:$16 sps:$4 sm:$0xff]  }
 0x1a8   :  { %3481 = vmatprep.subr.bf16.mxu1 %v5527_v43  ;;  %v5518_v43 = vld [vmem:[#allocation8 + $0x6c] ss:$16 sps:$4 sm:$0xff]  }
 0x1a9   :  { %2188 = vmatpush1.bf16.msra.mxu0 %v5375_v27  ;;  %v5468_v27 = vld [vmem:[#allocation7 + $0x820] ss:$24 sps:$4 sm:$0xff]  }
 0x1aa   :  { %2189 = vmatprep.subr.bf16.mxu0 %v5380_v28  ;;  %v5476_v28 = vld [vmem:[#allocation7 + $0x854] ss:$24 sps:$4 sm:$0xff]  }
 0x1ab   :  { %3482 = vmatpush1.bf16.msra.mxu1 %v5525_v42  ;;  %v5510_v42 = vld [vmem:[#allocation8 + $0x48] ss:$16 sps:$4 sm:$0xff]  }
 0x1ac   :  { %3483 = vmatprep.subr.bf16.mxu1 %v5533_v46  ;;  %v5530_v46 = vld [vmem:[#allocation8 + $0xac] ss:$16 sps:$4 sm:$0xff]  }
 0x1ad   :  { %2190 = vmatpush1.bf16.msra.mxu0 %v5378_v33  ;;  %v5480_v33 = vld [vmem:[#allocation7 + $0x880] ss:$24 sps:$4 sm:$0xff]  }
 0x1ae   :  { %2191 = vmatprep.subr.bf16.mxu0 %v5383_v34  ;;  %v5488_v34 = vld [vmem:[#allocation7 + $0x8b4] ss:$24 sps:$4 sm:$0xff]  }
 0x1af   :  { %3484 = vmatpush1.bf16.msra.mxu1 %v5531_v47  ;;  %v5528_v47 = vld [vmem:[#allocation8 + $0xa8] ss:$16 sps:$4 sm:$0xff]  }
 0x1b0   :  { %3494 = vmatprep.subr.bf16.mxu1 %v5539_v50 }
 0x1b1   :  { %2192 = vmatpush1.bf16.msra.mxu0 %v5381_v11  ;;  %v5492_v11 = vld [vmem:[#allocation7 + $0x8e0] ss:$24 sps:$4 sm:$0xff]  }
 0x1b2   :  { %2193 = vmatprep.subr.bf16.mxu0 %v5386_v37  ;;  %v5500_v37 = vld [vmem:[#allocation8 + $0xc] ss:$16 sps:$4 sm:$0xff]  }
 0x1b5   :  { %2194 = vmatpush1.bf16.msra.mxu0 %v5384_v39  ;;  %v5504_v39 = vld [vmem:[#allocation8 + $0x28] ss:$16 sps:$4 sm:$0xff]  }
 0x1b6   :  { %2195 = vmatprep.subr.bf16.mxu0 %v5389_v40  ;;  %v5512_v40 = vld [vmem:[#allocation8 + $0x4c] ss:$16 sps:$4 sm:$0xff]  }
 0x1b9   :  { %2196 = vmatpush1.bf16.msra.mxu0 %v5387_v44  ;;  %v5516_v44 = vld [vmem:[#allocation8 + $0x68] ss:$16 sps:$4 sm:$0xff]  }
 0x1ba   :  { %2197 = vmatprep.subr.bf16.mxu0 %v5392_v45  ;;  %v5524_v45 = vld [vmem:[#allocation8 + $0x8c] ss:$16 sps:$4 sm:$0xff]  }
 0x1bd   :  { %2198 = vmatpush1.bf16.msra.mxu0 %v5390_v53  ;;  %v5522_v53 = vld [vmem:[#allocation8 + $0x88] ss:$16 sps:$4 sm:$0xff]  }
 0x1be   :  { %2199 = vmatprep.subr.bf16.mxu0 %v5395_v48 }
 0x1c1   :  { %2200 = vmatpush1.bf16.msra.mxu0 %v5393_v49 }
 0x1c2   :  { %2201 = vmatprep.subr.bf16.mxu0 %v5398_v51 }
 0x1c5   :  { %2202 = vmatpush1.bf16.msra.mxu0 %v5396_v52 }
 0x1c6   :  { %2203 = vmatprep.subr.bf16.mxu0 %v5401_v54 }
 0x1c9   :  { %2204 = vmatpush1.bf16.msra.mxu0 %v5399_v55 }
 0x1ca   :  { %2205 = vmatprep.subr.bf16.mxu0 %v5404_v56 }
 0x1cd   :  { %2206 = vmatpush1.bf16.msra.mxu0 %v5402_v57 }
 0x1ce   :  { %2207 = vmatprep.subr.bf16.mxu0 %v5407_v58  ;;  %v5534_v58 = vld [vmem:[#allocation8 + $0xc8] ss:$16 sps:$4 sm:$0xff]  }
 0x1d1   :  { %2208 = vmatpush1.bf16.msra.mxu0 %v5405_v59 }
 0x1d2   :  { %2209 = vmatprep.subr.bf16.mxu0 %v5410_v60 }
 0x1d5   :  { %2210 = vmatpush1.bf16.msra.mxu0 %v5408_v61 }
 0x1d6   :  { %2211 = vmatprep.subr.bf16.mxu0 %v5413_v62 }
 0x1d9   :  { %2212 = vmatpush1.bf16.msra.mxu0 %v5411_v63  ;;  %v5537_v63 = vld [vmem:[#allocation8 + $0x200] ss:$16 sps:$4 sm:$0xff]  }
 0x1da   :  { %2213 = vmatprep.subr.bf16.mxu0 %v5416_v0 }
 0x1dd   :  { %2214 = vmatpush1.bf16.msra.mxu0 %v5414_v1  ;;  %v5542_v1 = vld [vmem:[#allocation8 + $0xec] ss:$16 sps:$4 sm:$0xff]  }
 0x1de   :  { %2215 = vmatprep.subr.bf16.mxu0 %v5419_v2  ;;  %v5545_v2 = vld [vmem:[#allocation8 + $0x224] ss:$16 sps:$4 sm:$0xff]  }
 0x1e1   :  { %2216 = vmatpush1.bf16.msra.mxu0 %v5417_v3  ;;  %v5540_v3 = vld [vmem:[#allocation8 + $0xe8] ss:$16 sps:$4 sm:$0xff]  }
 0x1e2   :  { %2226 = vmatprep.subr.bf16.mxu0 %v5422_v4  ;;  %v5548_v4 = vld [vmem:[#allocation8 + $0x10c] ss:$16 sps:$4 sm:$0xff]  }
 0x1e4   :  { %2218 = vmatmul.mubr.bf16.vlgmr.msra.gmra.mrb[4].mxu0 %v6302_v21  ;;  %v5435_v21 = vld [vmem:[#allocation7 + $0x700] ss:$24 sps:$4 sm:$0xff]  }
 0x1e5   :  { %2227 = vmatpush1.bf16.msra.mxu0 %v5420_v5  ;;  %2258 = vmatprep.mubr.bf16.mxu0 %v6306_v31  ;;  %v5438_v31 = vld [vmem:[#allocation7 + $0x730] ss:$24 sps:$4 sm:$0xff]  }
 0x1e6   :  { %2228 = vmatprep.subr.bf16.mxu0 %v5425_v6  ;;  %v5543_v5 = vld [vmem:[#allocation8 + $0x220] ss:$16 sps:$4 sm:$0xff]   ;;  %v5551_v6 = vld [vmem:[#allocation8 + $0x244] ss:$16 sps:$4 sm:$0xff]  }
 0x1e9   :  { %2229 = vmatpush1.bf16.msra.mxu0 %v5423_v7  ;;  %v5546_v7 = vld [vmem:[#allocation8 + $0x108] ss:$16 sps:$4 sm:$0xff]  }
 0x1ea   :  { %2230 = vmatprep.subr.bf16.mxu0 %v5428_v8  ;;  %v5554_v8 = vld [vmem:[#allocation8 + $0x12c] ss:$16 sps:$4 sm:$0xff]  }
 0x1ed   :  { %2231 = vmatpush1.bf16.msra.mxu0 %v5426_v9  ;;  %v5549_v9 = vld [vmem:[#allocation8 + $0x240] ss:$16 sps:$4 sm:$0xff]  }
 0x1ee   :  { %2232 = vmatprep.subr.bf16.mxu0 %v5431_v10  ;;  %v5557_v10 = vld [vmem:[#allocation8 + $0x264] ss:$16 sps:$4 sm:$0xff]  }
 0x1f1   :  { %2233 = vmatpush1.bf16.msra.mxu0 %v5429_v12  ;;  %v5552_v12 = vld [vmem:[#allocation8 + $0x128] ss:$16 sps:$4 sm:$0xff]  }
 0x1f2   :  { %2234 = vmatprep.subr.bf16.mxu0 %v5434_v13  ;;  %v5560_v13 = vld [vmem:[#allocation8 + $0x14c] ss:$16 sps:$4 sm:$0xff]  }
 0x1f5   :  { %2235 = vmatpush1.bf16.msra.mxu0 %v5432_v14  ;;  %v5555_v14 = vld [vmem:[#allocation8 + $0x260] ss:$16 sps:$4 sm:$0xff]  }
 0x1f6   :  { %2236 = vmatprep.subr.bf16.mxu0 %v5437_v15  ;;  %v5563_v15 = vld [vmem:[#allocation8 + $0x284] ss:$16 sps:$4 sm:$0xff]  }
 0x1f9   :  { %2237 = vmatpush1.bf16.msra.mxu0 %v5435_v21  ;;  %v5558_v21 = vld [vmem:[#allocation8 + $0x148] ss:$16 sps:$4 sm:$0xff]  }
 0x1fa   :  { %2238 = vmatprep.subr.bf16.mxu0 %v5440_v16  ;;  %v5566_v16 = vld [vmem:[#allocation8 + $0x16c] ss:$16 sps:$4 sm:$0xff]  }
 0x1fd   :  { %2239 = vmatpush1.bf16.msra.mxu0 %v5438_v31  ;;  %v5561_v31 = vld [vmem:[#allocation8 + $0x280] ss:$16 sps:$4 sm:$0xff]  }
 0x1fe   :  { %2240 = vmatprep.subr.bf16.mxu0 %v5446_v17  ;;  %v5569_v17 = vld [vmem:[#allocation8 + $0x2a4] ss:$16 sps:$4 sm:$0xff]  }
 0x201   :  { %2241 = vmatpush1.bf16.msra.mxu0 %v5444_v18  ;;  %v5564_v18 = vld [vmem:[#allocation8 + $0x168] ss:$16 sps:$4 sm:$0xff]  }
 0x202   :  { %2242 = vmatprep.subr.bf16.mxu0 %v5452_v19  ;;  %v5572_v19 = vld [vmem:[#allocation8 + $0x18c] ss:$16 sps:$4 sm:$0xff]  }
 0x205   :  { %2243 = vmatpush1.bf16.msra.mxu0 %v5450_v20  ;;  %v5567_v20 = vld [vmem:[#allocation8 + $0x2a0] ss:$16 sps:$4 sm:$0xff]  }
 0x206   :  { %2244 = vmatprep.subr.bf16.mxu0 %v5458_v22  ;;  %v5575_v22 = vld [vmem:[#allocation8 + $0x2c4] ss:$16 sps:$4 sm:$0xff]  }
 0x209   :  { %2245 = vmatpush1.bf16.msra.mxu0 %v5456_v23  ;;  %v5570_v23 = vld [vmem:[#allocation8 + $0x188] ss:$16 sps:$4 sm:$0xff]  }
 0x20a   :  { %2246 = vmatprep.subr.bf16.mxu0 %v5464_v24  ;;  %v5578_v24 = vld [vmem:[#allocation8 + $0x1ac] ss:$16 sps:$4 sm:$0xff]  }
 0x20d   :  { %2247 = vmatpush1.bf16.msra.mxu0 %v5462_v25  ;;  %v5573_v25 = vld [vmem:[#allocation8 + $0x2c0] ss:$16 sps:$4 sm:$0xff]  }
 0x20e   :  { %2248 = vmatprep.subr.bf16.mxu0 %v5470_v26  ;;  %v5581_v26 = vld [vmem:[#allocation8 + $0x2e4] ss:$16 sps:$4 sm:$0xff]  }
 0x211   :  { %2249 = vmatpush1.bf16.msra.mxu0 %v5468_v27  ;;  %v5576_v27 = vld [vmem:[#allocation8 + $0x1a8] ss:$16 sps:$4 sm:$0xff]  }
 0x212   :  { %2250 = vmatprep.subr.bf16.mxu0 %v5476_v28  ;;  %v5584_v28 = vld [vmem:[#allocation8 + $0x1cc] ss:$16 sps:$4 sm:$0xff]  }
 0x215   :  { %2251 = vmatpush1.bf16.msra.mxu0 %v5474_v29  ;;  %v5579_v29 = vld [vmem:[#allocation8 + $0x2e0] ss:$16 sps:$4 sm:$0xff]  }
 0x216   :  { %2252 = vmatprep.subr.bf16.mxu0 %v5482_v32  ;;  %v5587_v32 = vld [vmem:[#allocation8 + $0x304] ss:$16 sps:$4 sm:$0xff]  }
 0x219   :  { %2253 = vmatpush1.bf16.msra.mxu0 %v5480_v33  ;;  %v5582_v33 = vld [vmem:[#allocation8 + $0x1c8] ss:$16 sps:$4 sm:$0xff]  }
 0x21a   :  { %2254 = vmatprep.subr.bf16.mxu0 %v5488_v34  ;;  %v5590_v34 = vld [vmem:[#allocation8 + $0x1ec] ss:$16 sps:$4 sm:$0xff]  }
 0x21d   :  { %2255 = vmatpush1.bf16.msra.mxu0 %v5486_v35  ;;  %v5585_v35 = vld [vmem:[#allocation8 + $0x300] ss:$16 sps:$4 sm:$0xff]  }
 0x21e   :  { %2256 = vmatprep.subr.bf16.mxu0 %v5494_v36  ;;  %v5593_v36 = vld [vmem:[#allocation8 + $0x324] ss:$16 sps:$4 sm:$0xff]  }
 0x221   :  { %2257 = vmatpush1.bf16.msra.mxu0 %v5492_v11  ;;  %v5588_v11 = vld [vmem:[#allocation8 + $0x1e8] ss:$16 sps:$4 sm:$0xff]  }
 0x222   :  { %3576 = vmatprep.subr.bf16.mxu0 %v5500_v37  ;;  %v5596_v37 = vld [vmem:[#allocation8 + $0x20c] ss:$16 sps:$4 sm:$0xff]  }
 0x224   :  { %2259 = vmatmul.mubr.bf16.vlgmr.msra.gmra.mrb[4].mxu0 %v6310_v30  ;;  %v5536_v30 = vld [vmem:[#allocation8 + $0xcc] ss:$16 sps:$4 sm:$0xff]  }
 0x225   :  { %3577 = vmatpush1.bf16.msra.mxu0 %v5498_v38  ;;  %v5591_v38 = vld [vmem:[#allocation8 + $0x320] ss:$16 sps:$4 sm:$0xff]  }
 0x226   :  { %3578 = vmatprep.subr.bf16.mxu0 %v5506_v41  ;;  %v5599_v41 = vld [vmem:[#allocation8 + $0x344] ss:$16 sps:$4 sm:$0xff]  }
 0x229   :  { %3579 = vmatpush1.bf16.msra.mxu0 %v5504_v39  ;;  %v5594_v39 = vld [vmem:[#allocation8 + $0x208] ss:$16 sps:$4 sm:$0xff]  }
 0x22a   :  { %3580 = vmatprep.subr.bf16.mxu0 %v5512_v40  ;;  %v5602_v40 = vld [vmem:[#allocation8 + $0x22c] ss:$16 sps:$4 sm:$0xff]  }
 0x22d   :  { %3581 = vmatpush1.bf16.msra.mxu0 %v5510_v42  ;;  %v5597_v42 = vld [vmem:[#allocation8 + $0x340] ss:$16 sps:$4 sm:$0xff]  }
 0x22e   :  { %3582 = vmatprep.subr.bf16.mxu0 %v5518_v43  ;;  %v5605_v43 = vld [vmem:[#allocation8 + $0x364] ss:$16 sps:$4 sm:$0xff]  }
 0x231   :  { %3583 = vmatpush1.bf16.msra.mxu0 %v5516_v44  ;;  %v5600_v44 = vld [vmem:[#allocation8 + $0x228] ss:$16 sps:$4 sm:$0xff]  }
 0x232   :  { %3584 = vmatprep.subr.bf16.mxu0 %v5524_v45  ;;  %v5608_v45 = vld [vmem:[#allocation8 + $0x24c] ss:$16 sps:$4 sm:$0xff]  }
 0x235   :  { %3585 = vmatpush1.bf16.msra.mxu0 %v5522_v53  ;;  %v5603_v53 = vld [vmem:[#allocation8 + $0x360] ss:$16 sps:$4 sm:$0xff]  }
 0x236   :  { %3586 = vmatprep.subr.bf16.mxu0 %v5530_v46  ;;  %v5611_v46 = vld [vmem:[#allocation8 + $0x384] ss:$16 sps:$4 sm:$0xff]  }
 0x237   :  { %v2014_v48 = vpop.f32.mrb[0].mxu0 }
 0x238   :  { %v6320_v49 = vpop.f32.mrb[0].mxu1  ;;  %v2267_v50 = vmax.f32 %v2014_v48, 0.0  ;;  %v2016_v51 = vpop.f32.mrb[1].mxu0  ;;  %v5609_v48 = vld [vmem:[#allocation8 + $0x380] ss:$16 sps:$4 sm:$0xff]  }
 0x239   :  { %v2139_v52 = vpop.f32.mrb[1].mxu1  ;;  %v2268_v54 = vmax.f32 %v2016_v51, 0.0  ;;  %v2018_v56 = vpop.f32.mrb[2].mxu0  ;;  %3587 = vmatpush1.bf16.msra.mxu0 %v5528_v47  ;;  %v5606_v47 = vld [vmem:[#allocation8 + $0x248] ss:$16 sps:$4 sm:$0xff]  }
 0x23a   :  { %v2270_v55 = vmax.f32 %v2139_v52, 0.0  ;;  %v2141_v57 = vpop.f32.mrb[2].mxu1  ;;  %v2019_v59 = vpop.f32.mrb[3].mxu0  ;;  %3588 = vmatprep.subr.bf16.mxu0 %v5536_v30  ;;  %v6324_v0 = vpack.c.bf16 %v2267_v50, %v2267_v50  ;;  %v5614_v30 = vld [vmem:[#allocation8 + $0x26c] ss:$16 sps:$4 sm:$0xff]  }
 0x23b   :  { %v2142_v60 = vpop.f32.mrb[3].mxu1  ;;  %v2274_v61 = vpack.c.bf16 %v2268_v54, %v2268_v54  ;;  %v5617_v50 = vld [vmem:[#allocation8 + $0x3a4] ss:$16 sps:$4 sm:$0xff]   ;;  %v5612_v51 = vld [vmem:[#allocation8 + $0x268] ss:$16 sps:$4 sm:$0xff]  }
 0x23c   :  { %v6322_v62 = vpack.c.bf16 %v2270_v55, %v2270_v55  ;;  %v5620_v52 = vld [vmem:[#allocation8 + $0x28c] ss:$16 sps:$4 sm:$0xff]   ;;  %v5615_v54 = vld [vmem:[#allocation8 + $0x3a0] ss:$16 sps:$4 sm:$0xff]   ;;  %v5623_v55 = vld [vmem:[#allocation8 + $0x3c4] ss:$16 sps:$4 sm:$0xff]  }
 0x23d   :  { %3485 = vmatprep.mubr.bf16.mxu1 %v2274_v61  ;;  %3589 = vmatpush1.bf16.msra.mxu0 %v5534_v58  ;;  %v5618_v56 = vld [vmem:[#allocation8 + $0x288] ss:$16 sps:$4 sm:$0xff]   ;;  %v5626_v57 = vld [vmem:[#allocation8 + $0x2ac] ss:$16 sps:$4 sm:$0xff]   ;;  %v5621_v58 = vld [vmem:[#allocation8 + $0x3c0] ss:$16 sps:$4 sm:$0xff]  }
 0x23e   :  { %3608 = vmatprep.mubr.bf16.mxu0 %v2274_v61  ;;  %3486 = vmatmul.mubr.bf16.vlgmr.msra.gmra.mrb[4].mxu1 %v6324_v0  ;;  %v5629_v59 = vld [vmem:[#allocation8 + $0x3e4] ss:$16 sps:$4 sm:$0xff]   ;;  %v5624_v60 = vld [vmem:[#allocation8 + $0x2a8] ss:$16 sps:$4 sm:$0xff]   ;;  %v5632_v61 = vld [vmem:[#allocation8 + $0x2cc] ss:$16 sps:$4 sm:$0xff]  }
 0x23f   :  { %3495 = vmatpush1.bf16.msra.mxu1 %v5537_v63  ;;  %3526 = vmatprep.mubr.bf16.mxu1 %v6322_v62  ;;  %v2269_v63 = vmax.f32 %v6320_v49, 0.0  ;;  %v5666_v49 = vld [vmem:[#allocation8 + $0x420] ss:$16 sps:$4 sm:$0xff]  }
 0x240   :  { %3590 = vmatprep.subr.bf16.mxu0 %v5542_v1  ;;  %3496 = vmatprep.subr.bf16.mxu1 %v5545_v2  ;;  %v5630_v1 = vld [vmem:[#allocation8 + $0x2c8] ss:$16 sps:$4 sm:$0xff]   ;;  %v5635_v2 = vld [vmem:[#allocation8 + $0x2ec] ss:$16 sps:$4 sm:$0xff]  }
 0x241   :  { %3591 = vmatpush1.bf16.msra.mxu0 %v5540_v3  ;;  %v5660_v3 = vld [vmem:[#allocation8 + $0x400] ss:$16 sps:$4 sm:$0xff]  }
 0x242   :  { %3592 = vmatprep.subr.bf16.mxu0 %v5548_v4  ;;  %v6331_v4 = vpack.c.bf16 %v2269_v63, %v2269_v63  ;;  %v5701_v63 = vld [vmem:[#allocation8 + $0x4cc] ss:$16 sps:$4 sm:$0xff]  }
 0x243   :  { %3497 = vmatpush1.bf16.msra.mxu1 %v5543_v5  ;;  %v5668_v5 = vld [vmem:[#allocation8 + $0x424] ss:$16 sps:$4 sm:$0xff]  }
 0x244   :  { %3498 = vmatprep.subr.bf16.mxu1 %v5551_v6  ;;  %v5633_v6 = vld [vmem:[#allocation8 + $0x2e8] ss:$16 sps:$4 sm:$0xff]  }
 0x245   :  { %3593 = vmatpush1.bf16.msra.mxu0 %v5546_v7  ;;  %v5638_v7 = vld [vmem:[#allocation8 + $0x30c] ss:$16 sps:$4 sm:$0xff]  }
 0x246   :  { %3594 = vmatprep.subr.bf16.mxu0 %v5554_v8  ;;  %v5674_v8 = vld [vmem:[#allocation8 + $0x444] ss:$16 sps:$4 sm:$0xff]  }
 0x247   :  { %3499 = vmatpush1.bf16.msra.mxu1 %v5549_v9  ;;  %v5636_v9 = vld [vmem:[#allocation8 + $0x308] ss:$16 sps:$4 sm:$0xff]  }
 0x248   :  { %3500 = vmatprep.subr.bf16.mxu1 %v5557_v10  ;;  %v5641_v10 = vld [vmem:[#allocation8 + $0x32c] ss:$16 sps:$4 sm:$0xff]  }
 0x249   :  { %3595 = vmatpush1.bf16.msra.mxu0 %v5552_v12  ;;  %v5672_v12 = vld [vmem:[#allocation8 + $0x440] ss:$16 sps:$4 sm:$0xff]  }
 0x24a   :  { %3596 = vmatprep.subr.bf16.mxu0 %v5560_v13  ;;  %v5680_v13 = vld [vmem:[#allocation8 + $0x464] ss:$16 sps:$4 sm:$0xff]  }
 0x24b   :  { %3501 = vmatpush1.bf16.msra.mxu1 %v5555_v14  ;;  %v5639_v14 = vld [vmem:[#allocation8 + $0x328] ss:$16 sps:$4 sm:$0xff]  }
 0x24c   :  { %3502 = vmatprep.subr.bf16.mxu1 %v5563_v15  ;;  %v5644_v15 = vld [vmem:[#allocation8 + $0x34c] ss:$16 sps:$4 sm:$0xff]  }
 0x24d   :  { %3597 = vmatpush1.bf16.msra.mxu0 %v5558_v21  ;;  %v5678_v21 = vld [vmem:[#allocation8 + $0x460] ss:$16 sps:$4 sm:$0xff]  }
 0x24e   :  { %3598 = vmatprep.subr.bf16.mxu0 %v5566_v16  ;;  %v5686_v16 = vld [vmem:[#allocation8 + $0x484] ss:$16 sps:$4 sm:$0xff]  }
 0x24f   :  { %3503 = vmatpush1.bf16.msra.mxu1 %v5561_v31  ;;  %v5642_v31 = vld [vmem:[#allocation8 + $0x348] ss:$16 sps:$4 sm:$0xff]  }
 0x250   :  { %3504 = vmatprep.subr.bf16.mxu1 %v5569_v17  ;;  %v5647_v17 = vld [vmem:[#allocation8 + $0x36c] ss:$16 sps:$4 sm:$0xff]  }
 0x251   :  { %3599 = vmatpush1.bf16.msra.mxu0 %v5564_v18  ;;  %v5684_v18 = vld [vmem:[#allocation8 + $0x480] ss:$16 sps:$4 sm:$0xff]  }
 0x252   :  { %3600 = vmatprep.subr.bf16.mxu0 %v5572_v19  ;;  %v5692_v19 = vld [vmem:[#allocation8 + $0x4a4] ss:$16 sps:$4 sm:$0xff]  }
 0x253   :  { %3505 = vmatpush1.bf16.msra.mxu1 %v5567_v20  ;;  %v5645_v20 = vld [vmem:[#allocation8 + $0x368] ss:$16 sps:$4 sm:$0xff]  }
 0x254   :  { %3506 = vmatprep.subr.bf16.mxu1 %v5575_v22  ;;  %v5650_v22 = vld [vmem:[#allocation8 + $0x38c] ss:$16 sps:$4 sm:$0xff]  }
 0x255   :  { %3601 = vmatpush1.bf16.msra.mxu0 %v5570_v23  ;;  %v5690_v23 = vld [vmem:[#allocation8 + $0x4a0] ss:$16 sps:$4 sm:$0xff]  }
 0x256   :  { %3602 = vmatprep.subr.bf16.mxu0 %v5578_v24  ;;  %v5698_v24 = vld [vmem:[#allocation8 + $0x4c4] ss:$16 sps:$4 sm:$0xff]  }
 0x257   :  { %3507 = vmatpush1.bf16.msra.mxu1 %v5573_v25  ;;  %v5648_v25 = vld [vmem:[#allocation8 + $0x388] ss:$16 sps:$4 sm:$0xff]  }
 0x258   :  { %3508 = vmatprep.subr.bf16.mxu1 %v5581_v26  ;;  %v5653_v26 = vld [vmem:[#allocation8 + $0x3ac] ss:$16 sps:$4 sm:$0xff]  }
 0x259   :  { %3603 = vmatpush1.bf16.msra.mxu0 %v5576_v27  ;;  %v5696_v27 = vld [vmem:[#allocation8 + $0x4c0] ss:$16 sps:$4 sm:$0xff]  }
 0x25a   :  { %3604 = vmatprep.subr.bf16.mxu0 %v5584_v28  ;;  %v5704_v28 = vld [vmem:[#allocation8 + $0x4e4] ss:$16 sps:$4 sm:$0xff]  }
 0x25b   :  { %3509 = vmatpush1.bf16.msra.mxu1 %v5579_v29  ;;  %v5651_v29 = vld [vmem:[#allocation8 + $0x3a8] ss:$16 sps:$4 sm:$0xff]  }
 0x25c   :  { %3510 = vmatprep.subr.bf16.mxu1 %v5587_v32  ;;  %v5656_v32 = vld [vmem:[#allocation8 + $0x3cc] ss:$16 sps:$4 sm:$0xff]  }
 0x25d   :  { %3605 = vmatpush1.bf16.msra.mxu0 %v5582_v33  ;;  %v5702_v33 = vld [vmem:[#allocation8 + $0x4e0] ss:$16 sps:$4 sm:$0xff]  }
 0x25e   :  { %3606 = vmatprep.subr.bf16.mxu0 %v5590_v34  ;;  %v5710_v34 = vld [vmem:[#allocation8 + $0x504] ss:$16 sps:$4 sm:$0xff]  }
 0x25f   :  { %3511 = vmatpush1.bf16.msra.mxu1 %v5585_v35  ;;  %v5654_v35 = vld [vmem:[#allocation8 + $0x3c8] ss:$16 sps:$4 sm:$0xff]  }
 0x260   :  { %3512 = vmatprep.subr.bf16.mxu1 %v5593_v36  ;;  %v5659_v36 = vld [vmem:[#allocation8 + $0x3ec] ss:$16 sps:$4 sm:$0xff]  }
 0x261   :  { %3607 = vmatpush1.bf16.msra.mxu0 %v5588_v11  ;;  %v5708_v11 = vld [vmem:[#allocation8 + $0x500] ss:$16 sps:$4 sm:$0xff]  }
 0x262   :  { %3617 = vmatprep.subr.bf16.mxu0 %v5596_v37  ;;  %v5716_v37 = vld [vmem:[#allocation8 + $0x524] ss:$16 sps:$4 sm:$0xff]  }
 0x263   :  { %3513 = vmatpush1.bf16.msra.mxu1 %v5591_v38  ;;  %v5657_v38 = vld [vmem:[#allocation8 + $0x3e8] ss:$16 sps:$4 sm:$0xff]  }
 0x264   :  { %3609 = vmatmul.mubr.bf16.vlgmr.msra.gmra.mrb[8].mxu0 %v6324_v0  ;;  %3514 = vmatprep.subr.bf16.mxu1 %v5599_v41  ;;  %v5662_v0 = vld [vmem:[#allocation8 + $0x404] ss:$16 sps:$4 sm:$0xff]   ;;  %v5665_v41 = vld [vmem:[#allocation8 + $0x40c] ss:$16 sps:$4 sm:$0xff]  }
 0x265   :  { %3618 = vmatpush1.bf16.msra.mxu0 %v5594_v39  ;;  %3649 = vmatprep.mubr.bf16.mxu0 %v6322_v62  ;;  %v5627_v62 = vld [vmem:[#allocation8 + $0x3e0] ss:$16 sps:$4 sm:$0xff]  }
 0x266   :  { %3619 = vmatprep.subr.bf16.mxu0 %v5602_v40  ;;  %v5714_v39 = vld [vmem:[#allocation8 + $0x520] ss:$16 sps:$4 sm:$0xff]   ;;  %v5722_v40 = vld [vmem:[#allocation8 + $0x544] ss:$16 sps:$4 sm:$0xff]  }
 0x267   :  { %3515 = vmatpush1.bf16.msra.mxu1 %v5597_v42  ;;  %v5663_v42 = vld [vmem:[#allocation8 + $0x408] ss:$16 sps:$4 sm:$0xff]  }
 0x268   :  { %3516 = vmatprep.subr.bf16.mxu1 %v5605_v43  ;;  %v5671_v43 = vld [vmem:[#allocation8 + $0x42c] ss:$16 sps:$4 sm:$0xff]  }
 0x269   :  { %3620 = vmatpush1.bf16.msra.mxu0 %v5600_v44  ;;  %v5720_v44 = vld [vmem:[#allocation8 + $0x540] ss:$16 sps:$4 sm:$0xff]  }
 0x26a   :  { %3621 = vmatprep.subr.bf16.mxu0 %v5608_v45  ;;  %v5728_v45 = vld [vmem:[#allocation8 + $0x564] ss:$16 sps:$4 sm:$0xff]  }
 0x26b   :  { %3517 = vmatpush1.bf16.msra.mxu1 %v5603_v53  ;;  %v5669_v53 = vld [vmem:[#allocation8 + $0x428] ss:$16 sps:$4 sm:$0xff]  }
 0x26c   :  { %3518 = vmatprep.subr.bf16.mxu1 %v5611_v46  ;;  %v5677_v46 = vld [vmem:[#allocation8 + $0x44c] ss:$16 sps:$4 sm:$0xff]  }
 0x26d   :  { %3622 = vmatpush1.bf16.msra.mxu0 %v5606_v47  ;;  %v5726_v47 = vld [vmem:[#allocation8 + $0x560] ss:$16 sps:$4 sm:$0xff]  }
 0x26e   :  { %3623 = vmatprep.subr.bf16.mxu0 %v5614_v30  ;;  %v5734_v30 = vld [vmem:[#allocation8 + $0x584] ss:$16 sps:$4 sm:$0xff]  }
 0x26f   :  { %3519 = vmatpush1.bf16.msra.mxu1 %v5609_v48  ;;  %v5675_v48 = vld [vmem:[#allocation8 + $0x448] ss:$16 sps:$4 sm:$0xff]  }
 0x270   :  { %3520 = vmatprep.subr.bf16.mxu1 %v5617_v50  ;;  %v5683_v50 = vld [vmem:[#allocation8 + $0x46c] ss:$16 sps:$4 sm:$0xff]  }
 0x271   :  { %3624 = vmatpush1.bf16.msra.mxu0 %v5612_v51  ;;  %v5732_v51 = vld [vmem:[#allocation8 + $0x580] ss:$16 sps:$4 sm:$0xff]  }
 0x272   :  { %3625 = vmatprep.subr.bf16.mxu0 %v5620_v52  ;;  %v5740_v52 = vld [vmem:[#allocation8 + $0x5a4] ss:$16 sps:$4 sm:$0xff]  }
 0x273   :  { %3521 = vmatpush1.bf16.msra.mxu1 %v5615_v54  ;;  %v5681_v54 = vld [vmem:[#allocation8 + $0x468] ss:$16 sps:$4 sm:$0xff]  }
 0x274   :  { %3522 = vmatprep.subr.bf16.mxu1 %v5623_v55  ;;  %v5689_v55 = vld [vmem:[#allocation8 + $0x48c] ss:$16 sps:$4 sm:$0xff]  }
 0x275   :  { %3626 = vmatpush1.bf16.msra.mxu0 %v5618_v56  ;;  %v5738_v56 = vld [vmem:[#allocation8 + $0x5a0] ss:$16 sps:$4 sm:$0xff]  }
 0x276   :  { %3627 = vmatprep.subr.bf16.mxu0 %v5626_v57  ;;  %v5746_v57 = vld [vmem:[#allocation8 + $0x5c4] ss:$16 sps:$4 sm:$0xff]  }
 0x277   :  { %3523 = vmatpush1.bf16.msra.mxu1 %v5621_v58  ;;  %v5687_v58 = vld [vmem:[#allocation8 + $0x488] ss:$16 sps:$4 sm:$0xff]  }
 0x278   :  { %3524 = vmatprep.subr.bf16.mxu1 %v5629_v59  ;;  %v5695_v59 = vld [vmem:[#allocation8 + $0x4ac] ss:$16 sps:$4 sm:$0xff]  }
 0x279   :  { %3628 = vmatpush1.bf16.msra.mxu0 %v5624_v60  ;;  %v5744_v60 = vld [vmem:[#allocation8 + $0x5c0] ss:$16 sps:$4 sm:$0xff]  }
 0x27a   :  { %3629 = vmatprep.subr.bf16.mxu0 %v5632_v61  ;;  %v5752_v61 = vld [vmem:[#allocation8 + $0x5e4] ss:$16 sps:$4 sm:$0xff]  }
 0x27b   :  { %3525 = vmatpush1.bf16.msra.mxu1 %v5627_v62  ;;  %v5693_v62 = vld [vmem:[#allocation8 + $0x4a8] ss:$16 sps:$4 sm:$0xff]  }
 0x27c   :  { %3535 = vmatprep.subr.bf16.mxu1 %v5662_v0  ;;  %v5750_v0 = vld [vmem:[#allocation8 + $0x5e0] ss:$16 sps:$4 sm:$0xff]  }
 0x27d   :  { %3630 = vmatpush1.bf16.msra.mxu0 %v5630_v1  ;;  %v5758_v1 = vld [vmem:[#allocation11 + $0x4] ss:$8 sps:$4 sm:$0xff]  }
 0x27e   :  { %3527 = vmatmul.mubr.bf16.vlgmr.msra.gmra.mrb[4].mxu1 %v6331_v4  ;;  %3631 = vmatprep.subr.bf16.mxu0 %v5635_v2  ;;  %v5699_v2 = vld [vmem:[#allocation8 + $0x4c8] ss:$16 sps:$4 sm:$0xff]  }
 0x27f   :  { %3536 = vmatpush1.bf16.msra.mxu1 %v5660_v3  ;;  %v5707_v3 = vld [vmem:[#allocation8 + $0x4ec] ss:$16 sps:$4 sm:$0xff]  }
 0x280   :  { %3537 = vmatprep.subr.bf16.mxu1 %v5668_v5  ;;  %v5713_v5 = vld [vmem:[#allocation8 + $0x50c] ss:$16 sps:$4 sm:$0xff]  }
 0x281   :  { %3632 = vmatpush1.bf16.msra.mxu0 %v5633_v6  ;;  %v5711_v6 = vld [vmem:[#allocation8 + $0x508] ss:$16 sps:$4 sm:$0xff]  }
 0x282   :  { %3633 = vmatprep.subr.bf16.mxu0 %v5638_v7  ;;  %v5719_v7 = vld [vmem:[#allocation8 + $0x52c] ss:$16 sps:$4 sm:$0xff]  }
 0x283   :  { %3538 = vmatpush1.bf16.msra.mxu1 %v5666_v49  ;;  %v5717_v49 = vld [vmem:[#allocation8 + $0x528] ss:$16 sps:$4 sm:$0xff]  }
 0x284   :  { %3539 = vmatprep.subr.bf16.mxu1 %v5674_v8  ;;  %v5725_v8 = vld [vmem:[#allocation8 + $0x54c] ss:$16 sps:$4 sm:$0xff]  }
 0x285   :  { %3634 = vmatpush1.bf16.msra.mxu0 %v5636_v9  ;;  %v5723_v9 = vld [vmem:[#allocation8 + $0x548] ss:$16 sps:$4 sm:$0xff]  }
 0x286   :  { %3635 = vmatprep.subr.bf16.mxu0 %v5641_v10  ;;  %v5731_v10 = vld [vmem:[#allocation8 + $0x56c] ss:$16 sps:$4 sm:$0xff]  }
 0x287   :  { %3540 = vmatpush1.bf16.msra.mxu1 %v5672_v12  ;;  %v5729_v12 = vld [vmem:[#allocation8 + $0x568] ss:$16 sps:$4 sm:$0xff]  }
 0x288   :  { %3541 = vmatprep.subr.bf16.mxu1 %v5680_v13  ;;  %v5737_v13 = vld [vmem:[#allocation8 + $0x58c] ss:$16 sps:$4 sm:$0xff]  }
 0x289   :  { %3636 = vmatpush1.bf16.msra.mxu0 %v5639_v14  ;;  %v5735_v14 = vld [vmem:[#allocation8 + $0x588] ss:$16 sps:$4 sm:$0xff]  }
 0x28a   :  { %3637 = vmatprep.subr.bf16.mxu0 %v5644_v15  ;;  %v5743_v15 = vld [vmem:[#allocation8 + $0x5ac] ss:$16 sps:$4 sm:$0xff]  }
 0x28b   :  { %3542 = vmatpush1.bf16.msra.mxu1 %v5678_v21  ;;  %v5741_v21 = vld [vmem:[#allocation8 + $0x5a8] ss:$16 sps:$4 sm:$0xff]  }
 0x28c   :  { %3543 = vmatprep.subr.bf16.mxu1 %v5686_v16  ;;  %v5749_v16 = vld [vmem:[#allocation8 + $0x5cc] ss:$16 sps:$4 sm:$0xff]  }
 0x28d   :  { %3638 = vmatpush1.bf16.msra.mxu0 %v5642_v31  ;;  %v5747_v31 = vld [vmem:[#allocation8 + $0x5c8] ss:$16 sps:$4 sm:$0xff]  }
 0x28e   :  { %3639 = vmatprep.subr.bf16.mxu0 %v5647_v17  ;;  %v5755_v17 = vld [vmem:[#allocation8 + $0x5ec] ss:$16 sps:$4 sm:$0xff]  }
 0x28f   :  { %3544 = vmatpush1.bf16.msra.mxu1 %v5684_v18  ;;  %v5753_v18 = vld [vmem:[#allocation8 + $0x5e8] ss:$16 sps:$4 sm:$0xff]  }
 0x290   :  { %3545 = vmatprep.subr.bf16.mxu1 %v5692_v19 }
 0x291   :  { %3640 = vmatpush1.bf16.msra.mxu0 %v5645_v20 }
 0x292   :  { %3641 = vmatprep.subr.bf16.mxu0 %v5650_v22 }
 0x293   :  { %3546 = vmatpush1.bf16.msra.mxu1 %v5690_v23 }
 0x294   :  { %3547 = vmatprep.subr.bf16.mxu1 %v5698_v24 }
 0x295   :  { %3642 = vmatpush1.bf16.msra.mxu0 %v5648_v25 }
 0x296   :  { %3643 = vmatprep.subr.bf16.mxu0 %v5653_v26 }
 0x297   :  { %3548 = vmatpush1.bf16.msra.mxu1 %v5696_v27  ;;  %v5756_v27 = vld [vmem:[#allocation11] ss:$8 sps:$4 sm:$0xff]  }
 0x298   :  { %3549 = vmatprep.subr.bf16.mxu1 %v5704_v28 }
 0x299   :  { %3644 = vmatpush1.bf16.msra.mxu0 %v5651_v29  ;;  %v5761_v29 = vld [vmem:[#allocation11 + $0x14] ss:$8 sps:$4 sm:$0xff]  }
 0x29a   :  { %3645 = vmatprep.subr.bf16.mxu0 %v5656_v32  ;;  %v5759_v32 = vld [vmem:[#allocation11 + $0x10] ss:$8 sps:$4 sm:$0xff]  }
 0x29b   :  { %3550 = vmatpush1.bf16.msra.mxu1 %v5702_v33  ;;  %v5764_v33 = vld [vmem:[#allocation11 + $0x24] ss:$8 sps:$4 sm:$0xff]  }
 0x29c   :  { %3551 = vmatprep.subr.bf16.mxu1 %v5710_v34  ;;  %v5762_v34 = vld [vmem:[#allocation11 + $0x20] ss:$8 sps:$4 sm:$0xff]  }
 0x29d   :  { %3646 = vmatpush1.bf16.msra.mxu0 %v5654_v35  ;;  %v5767_v35 = vld [vmem:[#allocation11 + $0x34] ss:$8 sps:$4 sm:$0xff]  }
 0x29e   :  { %3647 = vmatprep.subr.bf16.mxu0 %v5659_v36  ;;  %v5765_v36 = vld [vmem:[#allocation11 + $0x30] ss:$8 sps:$4 sm:$0xff]  }
 0x29f   :  { %3552 = vmatpush1.bf16.msra.mxu1 %v5708_v11  ;;  %v5770_v11 = vld [vmem:[#allocation11 + $0x44] ss:$8 sps:$4 sm:$0xff]  }
 0x2a0   :  { %3553 = vmatprep.subr.bf16.mxu1 %v5716_v37  ;;  %v5768_v37 = vld [vmem:[#allocation11 + $0x40] ss:$8 sps:$4 sm:$0xff]  }
 0x2a1   :  { %3648 = vmatpush1.bf16.msra.mxu0 %v5657_v38  ;;  %v5773_v38 = vld [vmem:[#allocation11 + $0x54] ss:$8 sps:$4 sm:$0xff]  }
 0x2a2   :  { %3658 = vmatprep.subr.bf16.mxu0 %v5665_v41  ;;  %v5771_v41 = vld [vmem:[#allocation11 + $0x50] ss:$8 sps:$4 sm:$0xff]  }
 0x2a3   :  { %3554 = vmatpush1.bf16.msra.mxu1 %v5714_v39  ;;  %v5776_v39 = vld [vmem:[#allocation11 + $0x64] ss:$8 sps:$4 sm:$0xff]  }
 0x2a4   :  { %3650 = vmatmul.mubr.bf16.vlgmr.msra.gmra.mrb[8].mxu0 %v6331_v4  ;;  %3555 = vmatprep.subr.bf16.mxu1 %v5722_v40  ;;  %v5705_v4 = vld [vmem:[#allocation8 + $0x4e8] ss:$16 sps:$4 sm:$0xff]   ;;  %v5774_v40 = vld [vmem:[#allocation11 + $0x60] ss:$8 sps:$4 sm:$0xff]  }
 0x2a5   :  { %3659 = vmatpush1.bf16.msra.mxu0 %v5663_v42  ;;  %v5779_v42 = vld [vmem:[#allocation11 + $0x74] ss:$8 sps:$4 sm:$0xff]  }
 0x2a6   :  { %3660 = vmatprep.subr.bf16.mxu0 %v5671_v43  ;;  %v5777_v43 = vld [vmem:[#allocation11 + $0x70] ss:$8 sps:$4 sm:$0xff]  }
 0x2a7   :  { %3556 = vmatpush1.bf16.msra.mxu1 %v5720_v44  ;;  %v5782_v44 = vld [vmem:[#allocation11 + $0x84] ss:$8 sps:$4 sm:$0xff]  }
 0x2a8   :  { %3557 = vmatprep.subr.bf16.mxu1 %v5728_v45  ;;  %v5780_v45 = vld [vmem:[#allocation11 + $0x80] ss:$8 sps:$4 sm:$0xff]  }
 0x2a9   :  { %3661 = vmatpush1.bf16.msra.mxu0 %v5669_v53  ;;  %v5785_v53 = vld [vmem:[#allocation11 + $0x94] ss:$8 sps:$4 sm:$0xff]  }
 0x2aa   :  { %3662 = vmatprep.subr.bf16.mxu0 %v5677_v46  ;;  %v5783_v46 = vld [vmem:[#allocation11 + $0x90] ss:$8 sps:$4 sm:$0xff]  }
 0x2ab   :  { %3558 = vmatpush1.bf16.msra.mxu1 %v5726_v47  ;;  %v5788_v47 = vld [vmem:[#allocation11 + $0xa4] ss:$8 sps:$4 sm:$0xff]  }
 0x2ac   :  { %3559 = vmatprep.subr.bf16.mxu1 %v5734_v30  ;;  %v5786_v30 = vld [vmem:[#allocation11 + $0xa0] ss:$8 sps:$4 sm:$0xff]  }
 0x2ad   :  { %3663 = vmatpush1.bf16.msra.mxu0 %v5675_v48  ;;  %v5791_v48 = vld [vmem:[#allocation11 + $0xb4] ss:$8 sps:$4 sm:$0xff]  }
 0x2ae   :  { %3664 = vmatprep.subr.bf16.mxu0 %v5683_v50  ;;  %v5789_v50 = vld [vmem:[#allocation11 + $0xb0] ss:$8 sps:$4 sm:$0xff]  }
 0x2af   :  { %3560 = vmatpush1.bf16.msra.mxu1 %v5732_v51  ;;  %v5794_v51 = vld [vmem:[#allocation11 + $0xc4] ss:$8 sps:$4 sm:$0xff]  }
 0x2b0   :  { %3561 = vmatprep.subr.bf16.mxu1 %v5740_v52  ;;  %v5792_v52 = vld [vmem:[#allocation11 + $0xc0] ss:$8 sps:$4 sm:$0xff]  }
 0x2b1   :  { %3665 = vmatpush1.bf16.msra.mxu0 %v5681_v54  ;;  %v5797_v54 = vld [vmem:[#allocation11 + $0xd4] ss:$8 sps:$4 sm:$0xff]  }
 0x2b2   :  { %3666 = vmatprep.subr.bf16.mxu0 %v5689_v55  ;;  %v5795_v55 = vld [vmem:[#allocation11 + $0xd0] ss:$8 sps:$4 sm:$0xff]  }
 0x2b3   :  { %3562 = vmatpush1.bf16.msra.mxu1 %v5738_v56  ;;  %v5800_v56 = vld [vmem:[#allocation11 + $0xe4] ss:$8 sps:$4 sm:$0xff]  }
 0x2b4   :  { %3563 = vmatprep.subr.bf16.mxu1 %v5746_v57  ;;  %v5798_v57 = vld [vmem:[#allocation11 + $0xe0] ss:$8 sps:$4 sm:$0xff]  }
 0x2b5   :  { %3667 = vmatpush1.bf16.msra.mxu0 %v5687_v58  ;;  %v5803_v58 = vld [vmem:[#allocation11 + $0xf4] ss:$8 sps:$4 sm:$0xff]  }
 0x2b6   :  { %3668 = vmatprep.subr.bf16.mxu0 %v5695_v59  ;;  %v5801_v59 = vld [vmem:[#allocation11 + $0xf0] ss:$8 sps:$4 sm:$0xff]  }
 0x2b7   :  { %3564 = vmatpush1.bf16.msra.mxu1 %v5744_v60  ;;  %v5806_v60 = vld [vmem:[#allocation11 + $0x104] ss:$8 sps:$4 sm:$0xff]  }
 0x2b8   :  { %3565 = vmatprep.subr.bf16.mxu1 %v5752_v61  ;;  %v2473_v61 = vlaneseq }
 0x2b9   :  { %3669 = vmatpush1.bf16.msra.mxu0 %v5693_v62 }
 0x2ba   :  { %3670 = vmatprep.subr.bf16.mxu0 %v5701_v63  ;;  %v6335_v62 = vshrl.u32 %v2473_v61, 7  ;;  %v5854_v61 = vld [vmem:[#allocation14 + $0x48] sm:$0xff]  }
 0x2bb   :  { %3566 = vmatpush1.bf16.msra.mxu1 %v5750_v0  ;;  %v6338_v0 = vld [vmem:[#allocation10] sm:$0xf] }
 0x2bc   :  { %4103 = vmatprep.subr.bf16.mxu1 %v5758_v1  ;;  %v2475_v63 = vsub.s32 0, %v6335_v62  ;;  %v2479_v1 = vsub.s32 1, %v6335_v62 }
 0x2bd   :  { %3671 = vmatpush1.bf16.msra.mxu0 %v5699_v2  ;;  %v2487_v2 = vsub.s32 3, %v6335_v62 }
 0x2be   :  { %3672 = vmatprep.subr.bf16.mxu0 %v5707_v3  ;;  %v2476_v3 = vrot.slane %v6338_v0, %v2475_v63 }
 0x2c1   :  { %3673 = vmatpush1.bf16.msra.mxu0 %v5705_v4  ;;  %v2480_v4 = vrot.slane %v6338_v0, %v2479_v1 }
 0x2c2   :  { %3674 = vmatprep.subr.bf16.mxu0 %v5713_v5  ;;  %v2488_v5 = vrot.slane %v6338_v0, %v2487_v2  ;;  %v5856_v2 = vld [vmem:[#allocation14 + $0x50] sm:$0xff]  }
 0x2c5   :  { %3675 = vmatpush1.bf16.msra.mxu0 %v5711_v6 }
 0x2c6   :  { %3676 = vmatprep.subr.bf16.mxu0 %v5719_v7 }
 0x2c9   :  { %3677 = vmatpush1.bf16.msra.mxu0 %v5717_v49 }
 0x2ca   :  { %3678 = vmatprep.subr.bf16.mxu0 %v5725_v8 }
 0x2cd   :  { %3679 = vmatpush1.bf16.msra.mxu0 %v5723_v9 }
 0x2ce   :  { %3680 = vmatprep.subr.bf16.mxu0 %v5731_v10 }
 0x2d1   :  { %3681 = vmatpush1.bf16.msra.mxu0 %v5729_v12 }
 0x2d2   :  { %3682 = vmatprep.subr.bf16.mxu0 %v5737_v13 }
 0x2d5   :  { %3683 = vmatpush1.bf16.msra.mxu0 %v5735_v14 }
 0x2d6   :  { %3684 = vmatprep.subr.bf16.mxu0 %v5743_v15 }
 0x2d9   :  { %3685 = vmatpush1.bf16.msra.mxu0 %v5741_v21 }
 0x2da   :  { %3686 = vmatprep.subr.bf16.mxu0 %v5749_v16 }
 0x2dd   :  { %3687 = vmatpush1.bf16.msra.mxu0 %v5747_v31 }
 0x2de   :  { %3688 = vmatprep.subr.bf16.mxu0 %v5755_v17 }
 0x2e1   :  { %3689 = vmatpush1.bf16.msra.mxu0 %v5753_v18 }
 0x2f7   :  { %v2260_v19 = vpop.f32.mrb[4].mxu0 }
 0x2f8   :  { %v2271_v20 = vmax.f32 %v2260_v19, 0.0  ;;  %v2262_v22 = vpop.f32.mrb[5].mxu0  ;;  %v5804_v19 = vld [vmem:[#allocation11 + $0x100] ss:$8 sps:$4 sm:$0xff]  }
 0x2f9   :  { %v2272_v23 = vmax.f32 %v2262_v22, 0.0  ;;  %v2264_v24 = vpop.f32.mrb[6].mxu0  ;;  %v5809_v22 = vld [vmem:[#allocation11 + $0x114] ss:$8 sps:$4 sm:$0xff]  }
 0x2fa   :  { %v2265_v25 = vpop.f32.mrb[7].mxu0  ;;  %v2277_v28 = vpack.c.bf16 %v2271_v20, %v2271_v20  ;;  %v5807_v24 = vld [vmem:[#allocation11 + $0x110] ss:$8 sps:$4 sm:$0xff]  }
 0x2fb   :  { %v2278_v26 = vpack.c.bf16 %v2272_v23, %v2272_v23  ;;  %v5812_v25 = vld [vmem:[#allocation11 + $0x124] ss:$8 sps:$4 sm:$0xff]  }
 0x2fd   :  { %3567 = vmatprep.mubr.bf16.mxu1 %v2278_v26  ;;  %3690 = vmatprep.mubr.bf16.mxu0 %v2278_v26  ;;  %v5810_v26 = vld [vmem:[#allocation11 + $0x120] ss:$8 sps:$4 sm:$0xff]  }
 0x2fe   :  { %3568 = vmatmul.mubr.bf16.vlgmr.msra.gmra.mrb[4].mxu1 %v2277_v28  ;;  %3691 = vmatmul.mubr.bf16.vlgmr.msra.gmra.mrb[8].mxu0 %v2277_v28  ;;  %v5813_v28 = vld [vmem:[#allocation11 + $0x130] ss:$8 sps:$4 sm:$0xff]  }
 0x2ff   :  { %4104 = vmatpush1.bf16.msra.mxu1 %v5756_v27  ;;  %v5815_v27 = vld [vmem:[#allocation11 + $0x134] ss:$8 sps:$4 sm:$0xff]  }
 0x300   :  { %4105 = vmatprep.subr.bf16.mxu1 %v5761_v29  ;;  %v5818_v29 = vld [vmem:[#allocation11 + $0x144] ss:$8 sps:$4 sm:$0xff]  }
 0x303   :  { %4106 = vmatpush1.bf16.msra.mxu1 %v5759_v32  ;;  %v5816_v32 = vld [vmem:[#allocation11 + $0x140] ss:$8 sps:$4 sm:$0xff]  }
 0x304   :  { %4107 = vmatprep.subr.bf16.mxu1 %v5764_v33  ;;  %v5821_v33 = vld [vmem:[#allocation11 + $0x154] ss:$8 sps:$4 sm:$0xff]  }
 0x307   :  { %4108 = vmatpush1.bf16.msra.mxu1 %v5762_v34  ;;  %v5819_v34 = vld [vmem:[#allocation11 + $0x150] ss:$8 sps:$4 sm:$0xff]  }
 0x308   :  { %4109 = vmatprep.subr.bf16.mxu1 %v5767_v35  ;;  %v5824_v35 = vld [vmem:[#allocation11 + $0x164] ss:$8 sps:$4 sm:$0xff]  }
 0x30b   :  { %4110 = vmatpush1.bf16.msra.mxu1 %v5765_v36  ;;  %v5822_v36 = vld [vmem:[#allocation11 + $0x160] ss:$8 sps:$4 sm:$0xff]  }
 0x30c   :  { %4111 = vmatprep.subr.bf16.mxu1 %v5770_v11  ;;  %v5827_v11 = vld [vmem:[#allocation11 + $0x174] ss:$8 sps:$4 sm:$0xff]  }
 0x30f   :  { %4112 = vmatpush1.bf16.msra.mxu1 %v5768_v37  ;;  %v5825_v37 = vld [vmem:[#allocation11 + $0x170] ss:$8 sps:$4 sm:$0xff]  }
 0x310   :  { %4113 = vmatprep.subr.bf16.mxu1 %v5773_v38  ;;  %v5830_v38 = vld [vmem:[#allocation11 + $0x184] ss:$8 sps:$4 sm:$0xff]  }
 0x313   :  { %4114 = vmatpush1.bf16.msra.mxu1 %v5771_v41  ;;  %v5828_v41 = vld [vmem:[#allocation11 + $0x180] ss:$8 sps:$4 sm:$0xff]  }
 0x314   :  { %4115 = vmatprep.subr.bf16.mxu1 %v5776_v39  ;;  %v5833_v39 = vld [vmem:[#allocation11 + $0x194] ss:$8 sps:$4 sm:$0xff]  }
 0x317   :  { %4116 = vmatpush1.bf16.msra.mxu1 %v5774_v40  ;;  %v5831_v40 = vld [vmem:[#allocation11 + $0x190] ss:$8 sps:$4 sm:$0xff]  }
 0x318   :  { %4117 = vmatprep.subr.bf16.mxu1 %v5779_v42  ;;  %v5836_v42 = vld [vmem:[#allocation11 + $0x1a4] ss:$8 sps:$4 sm:$0xff]  }
 0x31b   :  { %4118 = vmatpush1.bf16.msra.mxu1 %v5777_v43  ;;  %v5834_v43 = vld [vmem:[#allocation11 + $0x1a0] ss:$8 sps:$4 sm:$0xff]  }
 0x31c   :  { %4119 = vmatprep.subr.bf16.mxu1 %v5782_v44  ;;  %v5839_v44 = vld [vmem:[#allocation11 + $0x1b4] ss:$8 sps:$4 sm:$0xff]  }
 0x31f   :  { %4120 = vmatpush1.bf16.msra.mxu1 %v5780_v45  ;;  %v5837_v45 = vld [vmem:[#allocation11 + $0x1b0] ss:$8 sps:$4 sm:$0xff]  }
 0x320   :  { %4121 = vmatprep.subr.bf16.mxu1 %v5785_v53  ;;  %v5842_v53 = vld [vmem:[#allocation11 + $0x1c4] ss:$8 sps:$4 sm:$0xff]  }
 0x323   :  { %4122 = vmatpush1.bf16.msra.mxu1 %v5783_v46  ;;  %v5840_v46 = vld [vmem:[#allocation11 + $0x1c0] ss:$8 sps:$4 sm:$0xff]  }
 0x324   :  { %4123 = vmatprep.subr.bf16.mxu1 %v5788_v47  ;;  %v2483_v47 = vsub.s32 2, %v6335_v62 }
 0x327   :  { %4124 = vmatpush1.bf16.msra.mxu1 %v5786_v30  ;;  %v5845_v30 = vld [vmem:[#allocation11 + $0x1d4] ss:$8 sps:$4 sm:$0xff]  }
 0x328   :  { %4125 = vmatprep.subr.bf16.mxu1 %v5791_v48  ;;  %v5843_v48 = vld [vmem:[#allocation11 + $0x1d0] ss:$8 sps:$4 sm:$0xff]  }
 0x32b   :  { %4126 = vmatpush1.bf16.msra.mxu1 %v5789_v50  ;;  %v2484_v50 = vrot.slane %v6338_v0, %v2483_v47  ;;  %v5855_v0 = vld [vmem:[#allocation14 + $0x8] sm:$0xff]  }
 0x32c   :  { %4127 = vmatprep.subr.bf16.mxu1 %v5794_v51  ;;  %v5848_v51 = vld [vmem:[#allocation11 + $0x1e4] ss:$8 sps:$4 sm:$0xff]  }
 0x32f   :  { %4128 = vmatpush1.bf16.msra.mxu1 %v5792_v52  ;;  %v5846_v52 = vld [vmem:[#allocation11 + $0x1e0] ss:$8 sps:$4 sm:$0xff]  }
 0x330   :  { %4129 = vmatprep.subr.bf16.mxu1 %v5797_v54 }
 0x333   :  { %4130 = vmatpush1.bf16.msra.mxu1 %v5795_v55  ;;  %v5851_v55 = vld [vmem:[#allocation11 + $0x1f4] ss:$8 sps:$4 sm:$0xff]  }
 0x334   :  { %4131 = vmatprep.subr.bf16.mxu1 %v5800_v56  ;;  %v5849_v56 = vld [vmem:[#allocation11 + $0x1f0] ss:$8 sps:$4 sm:$0xff]  }
 0x337   :  { %4132 = vmatpush1.bf16.msra.mxu1 %v5798_v57 }
 0x338   :  { %4133 = vmatprep.subr.bf16.mxu1 %v5803_v58  ;;  %v5852_v58 = vld [vmem:[#allocation14 + $0x40] sm:$0xff]  }
 0x33b   :  { %4134 = vmatpush1.bf16.msra.mxu1 %v5801_v59  ;;  %v5853_v59 = vld [vmem:[#allocation14] sm:$0xff]  }
 0x33c   :  { %4144 = vmatprep.subr.bf16.mxu1 %v5806_v60 }
 0x3d1   :  { %v3569_v6 = vpop.f32.mrb[4].mxu1  ;;  %v6349_v7 = vpop.f32.mrb[8].mxu0 }
 0x3d2   :  { %v4968_v49 = vadd.f32 %v3569_v6, %v2476_v3  ;;  %v3571_v8 = vpop.f32.mrb[5].mxu1  ;;  %v3694_v9 = vpop.f32.mrb[9].mxu0  ;;  %v4970_v54 = vadd.f32 %v6349_v7, %v2484_v50  ;;  %v5857_v3 = vld [vmem:[#allocation14 + $0x10] sm:$0xff]   ;;  %v5860_v6 = vld [vmem:[#allocation14 + $0x60] sm:$0xff]  }
 0x3d3   :  { %v4969_v10 = vadd.f32 %v3571_v8, %v2480_v4  ;;  %v4971_v12 = vadd.f32 %v3694_v9, %v2488_v5  ;;  %v3573_v13 = vpop.f32.mrb[6].mxu1  ;;  %v3696_v14 = vpop.f32.mrb[10].mxu0  ;;  %v5858_v4 = vld [vmem:[#allocation14 + $0x58] sm:$0xff]   ;;  %v5861_v7 = vld [vmem:[#allocation14 + $0x20] sm:$0xff]   ;;  %v5863_v8 = vld [vmem:[#allocation14 + $0x28] sm:$0xff]  }
 0x3d4   :  { %v3699_v15 = vmax.f32 %v4968_v49, 0.0  ;;  %v3574_v21 = vpop.f32.mrb[7].mxu1  ;;  %v3697_v16 = vpop.f32.mrb[11].mxu0  ;;  %v3701_v57 = vmax.f32 %v4970_v54, 0.0  ;;  %v5859_v5 = vld [vmem:[#allocation14 + $0x18] sm:$0xff]   ;;  %v5862_v49 = vld [vmem:[#allocation14 + $0x68] sm:$0xff]  }
 0x3d5   :  { %v3700_v31 = vmax.f32 %v4969_v10, 0.0  ;;  %v3702_v17 = vmax.f32 %v4971_v12, 0.0  ;;  %v5864_v9 = vld [vmem:[#allocation14 + $0x70] sm:$0xff]   ;;  %v5866_v12 = vld [vmem:[#allocation14 + $0x78] sm:$0xff]  }
 0x3d6   :  { %v3703_v20 = vpack.c.bf16 %v3699_v15, %v3699_v15  ;;  %v3705_v60 = vpack.c.bf16 %v3701_v57, %v3701_v57  ;;  %v5865_v10 = vld [vmem:[#allocation14 + $0x30] sm:$0xff]   ;;  %v5867_v13 = vld [vmem:[#allocation14 + $0x38] sm:$0xff]  }
 0x3d7   :  { %v3704_v18 = vpack.c.bf16 %v3700_v31, %v3700_v31  ;;  %v3706_v23 = vpack.c.bf16 %v3702_v17, %v3702_v17  ;;  %v3771_v14 = vld [vmem:[#allocation13] sm:$0x3] }
 0x3d8   :  { %v3776_v15 = vrot.slane %v3771_v14, %v2475_v63  ;;  %v3780_v21 = vrot.slane %v3771_v14, %v2479_v1 }
 0x3d9   :  { %4135 = vmatprep.mubr.bf16.mxu1 %v3704_v18 }
 0x3da   :  { %4136 = vmatmul.mubr.bf16.vlgmr.msra.gmra.mrb[8].mxu1 %v3703_v20 }
 0x3db   :  { %4145 = vmatpush1.bf16.msra.mxu1 %v5804_v19  ;;  %4176 = vmatprep.mubr.bf16.mxu1 %v3706_v23 }
 0x3dc   :  { %4146 = vmatprep.subr.bf16.mxu1 %v5809_v22 }
 0x3df   :  { %4147 = vmatpush1.bf16.msra.mxu1 %v5807_v24 }
 0x3e0   :  { %4148 = vmatprep.subr.bf16.mxu1 %v5812_v25 }
 0x3e3   :  { %4149 = vmatpush1.bf16.msra.mxu1 %v5810_v26 }
 0x3e4   :  { %4150 = vmatprep.subr.bf16.mxu1 %v5815_v27  ;;  %v4929_v27 = vld [vmem:[#allocation16] ss:$0 sm:$0xff] }
 0x3e7   :  { %4151 = vmatpush1.bf16.msra.mxu1 %v5813_v28 }
 0x3e8   :  { %4152 = vmatprep.subr.bf16.mxu1 %v5818_v29 }
 0x3eb   :  { %4153 = vmatpush1.bf16.msra.mxu1 %v5816_v32 }
 0x3ec   :  { %4154 = vmatprep.subr.bf16.mxu1 %v5821_v33 }
 0x3ef   :  { %4155 = vmatpush1.bf16.msra.mxu1 %v5819_v34 }
 0x3f0   :  { %4156 = vmatprep.subr.bf16.mxu1 %v5824_v35 }
 0x3f3   :  { %4157 = vmatpush1.bf16.msra.mxu1 %v5822_v36 }
 0x3f4   :  { %4158 = vmatprep.subr.bf16.mxu1 %v5827_v11 }
 0x3f7   :  { %4159 = vmatpush1.bf16.msra.mxu1 %v5825_v37 }
 0x3f8   :  { %4160 = vmatprep.subr.bf16.mxu1 %v5830_v38 }
 0x3fb   :  { %4161 = vmatpush1.bf16.msra.mxu1 %v5828_v41 }
 0x3fc   :  { %4162 = vmatprep.subr.bf16.mxu1 %v5833_v39 }
 0x3ff   :  { %4163 = vmatpush1.bf16.msra.mxu1 %v5831_v40 }
 0x400   :  { %4164 = vmatprep.subr.bf16.mxu1 %v5836_v42 }
 0x403   :  { %4165 = vmatpush1.bf16.msra.mxu1 %v5834_v43 }
 0x404   :  { %4166 = vmatprep.subr.bf16.mxu1 %v5839_v44 }
 0x407   :  { %4167 = vmatpush1.bf16.msra.mxu1 %v5837_v45 }
 0x408   :  { %4168 = vmatprep.subr.bf16.mxu1 %v5842_v53 }
 0x40b   :  { %4169 = vmatpush1.bf16.msra.mxu1 %v5840_v46 }
 0x40c   :  { %4170 = vmatprep.subr.bf16.mxu1 %v5845_v30 }
 0x40f   :  { %4171 = vmatpush1.bf16.msra.mxu1 %v5843_v48 }
 0x410   :  { %4172 = vmatprep.subr.bf16.mxu1 %v5848_v51 }
 0x413   :  { %4173 = vmatpush1.bf16.msra.mxu1 %v5846_v52 }
 0x414   :  { %4174 = vmatprep.subr.bf16.mxu1 %v5851_v55 }
 0x417   :  { %4175 = vmatpush1.bf16.msra.mxu1 %v5849_v56 }
 0x418   :  { %4946 = vmatprep.subr.bf16.mxu1 %v5852_v58 }
 0x41a   :  { %4177 = vmatmul.mubr.bf16.vlgmr.msra.gmra.mrb[8].mxu1 %v3705_v60 }
 0x41b   :  { %4947 = vmatpush3.bf16.msra.mxu1 %v5853_v59 }
 0x41c   :  { %4948 = vmatprep.subr.bf16.mxu1 %v5854_v61 }
 0x41f   :  { %4949 = vmatpush3.bf16.msra.mxu1 %v5855_v0 }
 0x420   :  { %4950 = vmatprep.subr.bf16.mxu1 %v5856_v2 }
 0x423   :  { %4951 = vmatpush3.bf16.msra.mxu1 %v5857_v3 }
 0x424   :  { %4952 = vmatprep.subr.bf16.mxu1 %v5858_v4 }
 0x427   :  { %4953 = vmatpush3.bf16.msra.mxu1 %v5859_v5 }
 0x428   :  { %4954 = vmatprep.subr.bf16.mxu1 %v5860_v6 }
 0x42b   :  { %4955 = vmatpush3.bf16.msra.mxu1 %v5861_v7 }
 0x42c   :  { %4956 = vmatprep.subr.bf16.mxu1 %v5862_v49 }
 0x42f   :  { %4957 = vmatpush3.bf16.msra.mxu1 %v5863_v8 }
 0x430   :  { %4958 = vmatprep.subr.bf16.mxu1 %v5864_v9 }
 0x433   :  { %4959 = vmatpush3.bf16.msra.mxu1 %v5865_v10 }
 0x434   :  { %4960 = vmatprep.subr.bf16.mxu1 %v5866_v12 }
 0x437   :  { %4961 = vmatpush3.bf16.msra.mxu1 %v5867_v13 }
 0x4ed   :  { %v4178_v16 = vpop.f32.mrb[8].mxu1 }
 0x4ee   :  { %v4972_v31 = vadd.f32 %v4178_v16, %v3776_v15  ;;  %v4180_v17 = vpop.f32.mrb[9].mxu1 }
 0x4ef   :  { %v4973_v18 = vadd.f32 %v4180_v17, %v3780_v21  ;;  %v4182_v19 = vpop.f32.mrb[10].mxu1 }
 0x4f0   :  { %v4185_v20 = vmax.f32 %v4972_v31, 0.0  ;;  %v4183_v22 = vpop.f32.mrb[11].mxu1 }
 0x4f1   :  { %v4186_v23 = vmax.f32 %v4973_v18, 0.0 }
 0x4f2   :  { %v4187_v25 = vpack.c.bf16 %v4185_v20, %v4185_v20 }
 0x4f3   :  { %v4188_v24 = vpack.c.bf16 %v4186_v23, %v4186_v23 }
 0x4f5   :  { %4356 = vmatprep.mubr.bf16.mxu1 %v4188_v24 }
 0x4f6   :  { %4357 = vmatmul.mubr.bf16.vlgmr.msra.gmra.mrb[12].mxu1 %v4187_v25 }
 0x5c9   :  { %v4962_v26 = vpop.f32.mrb[12].mxu1 }
 0x5ca   :  { %v4963_v28 = vpop.f32.mrb[13].mxu1 }
 0x5cb   :  { %v4964_v29 = vadd.f32 %v4963_v28, %v4962_v26  ;;  %v4965_v63 = vpop.f32.mrb[14].mxu1 }
 0x5cc   :  { %v4966_v32 = vpop.f32.mrb[15].mxu1 }
 0x5cd   :  { %v4359_v62 = vadd.f32 %v4964_v29, %v4929_v27 }
 0x5cf   :  { %v4364_v1 = vpack.c.bf16 %v4359_v62, %v4359_v62 }
 0x5d1   :  { %4365 = vst [vmem:[#allocation17] sm:$0xf] %v4364_v1 }
 0x5d2   :  { %6077 = shalt.err (!%p6074_p6)
}
 0x5d3   :  { %s6078_s21 = scalar_lea.hbm %s6379_s9, 64 }
 0x5d4   :  { %p6079_p7 = scmp.ne.s32.totalorder %s6379_s9, %s6078_s21  ;;  %p6082_p8 = scmp.lt.u32.totalorder %s6078_s21, %s6379_s9 }
 0x5d6   :  { %p6084_p9 = pnand %p6082_p8, %p6079_p7 }
 0x5d8   :  { %6087 = shalt.err (!%p6084_p9)
}
 0x5d9   :  { %4375 = dma.vmem_to_hbm [thread:$0]  %s4373_s25, 64, %s6379_s9, [#allocation4]  }
 0x5da   :  { %6098 = dma.done.wait [#allocation4], 64  }
 0x5db   :  { %6099 = vsyncadd [#allocation4], 4294967232 }
 0x5dc   :  { %4379 = vsyncpa [#allocation3], 1 }
 0x5dd   :  { %4380 = vsyncpa [#allocation6], 1 }
 0x5de   :  { %4381 = vsyncpa [#allocation9], 1 }
 0x5df   :  { %4382 = vsyncpa [#allocation12], 1 }
 0x5e0   :  { %4383 = vsyncpa [#allocation15], 1 }
 0x5e1   :  { %4384 = vsyncpa [#allocation4], 1 }

// kernel: tpu_custom_call.1
= control target key start
LH: loop header
LB: loop body
LE: loop exit
PB: predicated region body
PF: predicated region fallthrough
CT: control target
= control target key end

     0   :  { %14 = vsyncpa [#allocation3], 0  ;;  %s6370_s0 = inlined_call_operand.hbm [shape: f32[8,768], index: 0, kind: input, shape index: {}]   ;;  %s6371_s1 = inlined_call_operand.hbm [shape: f32[8,768], index: 1, kind: input, shape index: {}]   ;;  %s6372_s2 = inlined_call_operand.hbm [shape: bf16[768,768], index: 2, kind: input, shape index: {}]   ;;  %s6373_s3 = inlined_call_operand.hbm [shape: bf16[768,512], index: 3, kind: input, shape index: {}]   ;;  %s6374_s4 = inlined_call_operand.hbm [shape: f32[1,512], index: 4, kind: input, shape index: {}]   ;;  %s6375_s5 = inlined_call_operand.hbm [shape: bf16[512,256], index: 5, kind: input, shape index: {}]   ;;  %s6376_s6 = inlined_call_operand.hbm [shape: f32[1,256], index: 6, kind: input, shape index: {}]   ;;  %s6377_s7 = inlined_call_operand.hbm [shape: bf16[256,128], index: 7, kind: input, shape index: {}]   ;;  %s6378_s8 = inlined_call_operand.hbm [shape: f32[1,128], index: 8, kind: input, shape index: {}]   ;;  %s6379_s9 = inlined_call_operand.hbm [shape: bf16[8,128], index: 9, kind: output, shape index: {}]  }
   0x1   :  { %15 = vsyncpa [#allocation6], 0 }
   0x2   :  { %16 = vsyncpa [#allocation9], 0 }
   0x3   :  { %17 = vsyncpa [#allocation12], 0 }
   0x4   :  { %18 = vsyncpa [#allocation15], 0 }
   0x5   :  { %19 = vsyncpa [#allocation4], 0  ;;  %s6100_s30 = smov [#allocation5]   ;;  %s6101_s11 = smov [#allocation8]  }
   0x6   :  { %s36_s10 = sshll.u32 %s6100_s30, 4  ;;  %s57_s12 = sshll.u32 %s6101_s11, 4  ;;  %s37_s10 = int_to_ptr.vmem [resolvable:$true] %s36_s10  ;;  %s6168_s12 = int_to_ptr.vmem [resolvable:$true] %s57_s12 }
   0x7   :  { %s5868_s15 = scalar_lea.hbm %s6371_s1, 768 }
   0x8   :  { %p5869_p0 = scmp.ne.s32.totalorder %s6371_s1, %s5868_s15  ;;  %p5872_p1 = scmp.lt.u32.totalorder %s5868_s15, %s6371_s1 }
   0xa   :  { %p5874_p2 = pnand %p5872_p1, %p5869_p0 }
   0xc   :  { %5877 = shalt.err (!%p5874_p2)
}
   0xd   :  { %s5878_s20 = scalar_lea.vmem %s37_s10, 768  ;;  %p5883_p4 = scmp.lt.s32.totalorder %s37_s10, %s37_s10 }
   0xe   :  { %p5879_p3 = scmp.ne.s32.totalorder %s37_s10, %s5878_s20  ;;  %p5884_p5 = scmp.lt.s32.totalorder %s5878_s20, %s5878_s20 }
  0x10   :  { %p5885_p6 = por %p5884_p5, %p5883_p4 }
  0x12   :  { %p5886_p7 = pnand %p5885_p6, %p5879_p3 }
  0x14   :  { %5889 = shalt.err (!%p5886_p7)
}
  0x15   :  { %39 = dma.hbm_to_vmem [thread:$0]  %s6371_s1, 768, %s37_s10, [#allocation6]  }
  0x16   :  { %s5890_s25 = scalar_lea.hbm %s6373_s3, 24576 }
  0x17   :  { %p5891_p8 = scmp.ne.s32.totalorder %s6373_s3, %s5890_s25  ;;  %p5894_p9 = scmp.lt.u32.totalorder %s5890_s25, %s6373_s3 }
  0x19   :  { %p5896_p10 = pnand %p5894_p9, %p5891_p8 }
  0x1b   :  { %5899 = shalt.err (!%p5896_p10)
}
  0x1c   :  { %s5900_s30 = scalar_lea.vmem %s6168_s12, 24576  ;;  %p5905_p12 = scmp.lt.s32.totalorder %s6168_s12, %s6168_s12 }
  0x1d   :  { %p5901_p11 = scmp.ne.s32.totalorder %s6168_s12, %s5900_s30  ;;  %p5906_p13 = scmp.lt.s32.totalorder %s5900_s30, %s5900_s30 }
  0x1f   :  { %p5907_p0 = por %p5906_p13, %p5905_p12 }
  0x21   :  { %p5908_p1 = pnand %p5907_p0, %p5901_p11 }
  0x23   :  { %5911 = shalt.err (!%p5908_p1)
}
  0x24   :  { %s6102_s1 = smov 256   ;;  %s6103_s10 = smov 16  }
  0x25   :  { %63 = dma.hbm_to_vmem [thread:$0]  %s6373_s3, 24576, %s6168_s12, [#allocation9], %s6102_s1, %s6102_s1, %s6103_s10  }
  0x26   :  { %s6104_s14 = smov [#allocation11]   ;;  %s5912_s18 = scalar_lea.hbm %s6375_s5, 8192 }
  0x27   :  { %s79_s15 = sshll.u32 %s6104_s14, 4  ;;  %p5913_p2 = scmp.ne.s32.totalorder %s6375_s5, %s5912_s18  ;;  %s80_s15 = int_to_ptr.vmem [resolvable:$true] %s79_s15 }
  0x28   :  { %p5916_p3 = scmp.lt.u32.totalorder %s5912_s18, %s6375_s5 }
  0x2a   :  { %p5918_p4 = pnand %p5916_p3, %p5913_p2 }
  0x2c   :  { %5921 = shalt.err (!%p5918_p4)
}
  0x2d   :  { %s5922_s23 = scalar_lea.vmem %s80_s15, 8192  ;;  %p5927_p6 = scmp.lt.s32.totalorder %s80_s15, %s80_s15 }
  0x2e   :  { %p5923_p5 = scmp.ne.s32.totalorder %s80_s15, %s5922_s23  ;;  %p5928_p7 = scmp.lt.s32.totalorder %s5922_s23, %s5922_s23 }
  0x30   :  { %p5929_p8 = por %p5928_p7, %p5927_p6 }
  0x32   :  { %p5930_p9 = pnand %p5929_p8, %p5923_p5 }
  0x34   :  { %5933 = shalt.err (!%p5930_p9)
}
  0x35   :  { %s6105_s3 = smov 128   ;;  %s6106_s12 = smov 8  }
  0x36   :  { %85 = dma.hbm_to_vmem [thread:$0]  %s6375_s5, 8192, %s80_s15, [#allocation12], %s6105_s3, %s6105_s3, %s6106_s12  }
  0x37   :  { %s6107_s26 = smov [#allocation14]   ;;  %s5934_s30 = scalar_lea.hbm %s6377_s7, 2048 }
  0x38   :  { %s101_s27 = sshll.u32 %s6107_s26, 4  ;;  %p5935_p10 = scmp.ne.s32.totalorder %s6377_s7, %s5934_s30  ;;  %s102_s27 = int_to_ptr.vmem [resolvable:$true] %s101_s27 }
  0x39   :  { %p5938_p11 = scmp.lt.u32.totalorder %s5934_s30, %s6377_s7 }
  0x3b   :  { %p5940_p12 = pnand %p5938_p11, %p5935_p10 }
  0x3d   :  { %5943 = shalt.err (!%p5940_p12)
}
  0x3e   :  { %s5944_s14 = scalar_lea.vmem %s102_s27, 2048  ;;  %p5949_p0 = scmp.lt.s32.totalorder %s102_s27, %s102_s27 }
  0x3f   :  { %p5945_p13 = scmp.ne.s32.totalorder %s102_s27, %s5944_s14  ;;  %p5950_p1 = scmp.lt.s32.totalorder %s5944_s14, %s5944_s14 }
  0x41   :  { %p5951_p2 = por %p5950_p1, %p5949_p0 }
  0x43   :  { %p5952_p3 = pnand %p5951_p2, %p5945_p13 }
  0x45   :  { %5955 = shalt.err (!%p5952_p3)
}
  0x46   :  { %s6108_s5 = smov 64   ;;  %s6109_s15 = smov 4  }
  0x47   :  { %107 = dma.hbm_to_vmem [thread:$0]  %s6377_s7, 2048, %s102_s27, [#allocation15], %s6108_s5, %s6108_s5, %s6109_s15  }
  0x48   :  { %s6110_s18 = smov [#allocation2]   ;;  %s6111_s20 = smov [#allocation7]  }
  0x49   :  { %s26_s19 = sshll.u32 %s6110_s18, 4  ;;  %s45_s21 = sshll.u32 %s6111_s20, 4  ;;  %s27_s19 = int_to_ptr.vmem [resolvable:$true] %s26_s19  ;;  %s6223_s21 = int_to_ptr.vmem [resolvable:$true] %s45_s21 }
  0x4a   :  { %s5956_s3 = scalar_lea.hbm %s6370_s0, 768 }
  0x4b   :  { %p5957_p4 = scmp.ne.s32.totalorder %s6370_s0, %s5956_s3  ;;  %p5960_p5 = scmp.lt.u32.totalorder %s5956_s3, %s6370_s0 }
  0x4d   :  { %p5962_p6 = pnand %p5960_p5, %p5957_p4 }
  0x4f   :  { %5965 = shalt.err (!%p5962_p6)
}
  0x50   :  { %s5966_s7 = scalar_lea.vmem %s27_s19, 768  ;;  %p5971_p8 = scmp.lt.s32.totalorder %s27_s19, %s27_s19 }
  0x51   :  { %p5967_p7 = scmp.ne.s32.totalorder %s27_s19, %s5966_s7  ;;  %p5972_p9 = scmp.lt.s32.totalorder %s5966_s7, %s5966_s7 }
  0x53   :  { %p5973_p10 = por %p5972_p9, %p5971_p8 }
  0x55   :  { %p5974_p11 = pnand %p5973_p10, %p5967_p7 }
  0x57   :  { %5977 = shalt.err (!%p5974_p11)
}
  0x58   :  { %29 = dma.hbm_to_vmem [thread:$0]  %s6370_s0, 768, %s27_s19, [#allocation3]  }
  0x59   :  { %s5978_s1 = scalar_lea.hbm %s6372_s2, 36864 }
  0x5a   :  { %p5979_p12 = scmp.ne.s32.totalorder %s6372_s2, %s5978_s1  ;;  %p5982_p13 = scmp.lt.u32.totalorder %s5978_s1, %s6372_s2 }
  0x5c   :  { %p5984_p0 = pnand %p5982_p13, %p5979_p12 }
  0x5e   :  { %5987 = shalt.err (!%p5984_p0)
}
  0x5f   :  { %s5988_s5 = scalar_lea.vmem %s6223_s21, 36864  ;;  %p5993_p2 = scmp.lt.s32.totalorder %s6223_s21, %s6223_s21 }
  0x60   :  { %p5989_p1 = scmp.ne.s32.totalorder %s6223_s21, %s5988_s5  ;;  %p5994_p3 = scmp.lt.s32.totalorder %s5988_s5, %s5988_s5 }
  0x62   :  { %p5995_p4 = por %p5994_p3, %p5993_p2 }
  0x64   :  { %p5996_p5 = pnand %p5995_p4, %p5989_p1 }
  0x66   :  { %5999 = shalt.err (!%p5996_p5)
}
  0x67   :  { %s6112_s0 = smov 384   ;;  %s6113_s15 = smov 24  }
  0x68   :  { %51 = dma.hbm_to_vmem [thread:$0]  %s6372_s2, 36864, %s6223_s21, [#allocation6], %s6112_s0, %s6112_s0, %s6113_s15  }
  0x69   :  { %s6114_s18 = smov [#allocation10]   ;;  %s6115_s20 = smov [#allocation13]  }
  0x6a   :  { %s70_s19 = sshll.u32 %s6114_s18, 4  ;;  %s92_s22 = sshll.u32 %s6115_s20, 4  ;;  %s71_s19 = int_to_ptr.vmem [resolvable:$true] %s70_s19  ;;  %s93_s22 = int_to_ptr.vmem [resolvable:$true] %s92_s22 }
  0x6b   :  { %s6000_s12 = scalar_lea.hbm %s6374_s4, 64 }
  0x6c   :  { %p6001_p6 = scmp.ne.s32.totalorder %s6374_s4, %s6000_s12  ;;  %p6004_p7 = scmp.lt.u32.totalorder %s6000_s12, %s6374_s4 }
  0x6e   :  { %p6006_p8 = pnand %p6004_p7, %p6001_p6 }
  0x70   :  { %6009 = shalt.err (!%p6006_p8)
}
  0x71   :  { %s6010_s2 = scalar_lea.vmem %s71_s19, 64  ;;  %p6015_p10 = scmp.lt.s32.totalorder %s71_s19, %s71_s19 }
  0x72   :  { %p6011_p9 = scmp.ne.s32.totalorder %s71_s19, %s6010_s2  ;;  %p6016_p11 = scmp.lt.s32.totalorder %s6010_s2, %s6010_s2 }
  0x74   :  { %p6017_p12 = por %p6016_p11, %p6015_p10 }
  0x76   :  { %p6018_p13 = pnand %p6017_p12, %p6011_p9 }
  0x78   :  { %6021 = shalt.err (!%p6018_p13)
}
  0x79   :  { %73 = dma.hbm_to_vmem [thread:$0]  %s6374_s4, 64, %s71_s19, [#allocation9]  }
  0x7a   :  { %s6022_s30 = scalar_lea.hbm %s6376_s6, 32 }
  0x7b   :  { %p6023_p0 = scmp.ne.s32.totalorder %s6376_s6, %s6022_s30  ;;  %p6026_p1 = scmp.lt.u32.totalorder %s6022_s30, %s6376_s6 }
  0x7d   :  { %p6028_p2 = pnand %p6026_p1, %p6023_p0 }
  0x7f   :  { %6031 = shalt.err (!%p6028_p2)
}
  0x80   :  { %s6032_s14 = scalar_lea.vmem %s93_s22, 32  ;;  %p6037_p4 = scmp.lt.s32.totalorder %s93_s22, %s93_s22 }
  0x81   :  { %p6033_p3 = scmp.ne.s32.totalorder %s93_s22, %s6032_s14  ;;  %p6038_p5 = scmp.lt.s32.totalorder %s6032_s14, %s6032_s14 }
  0x83   :  { %p6039_p6 = por %p6038_p5, %p6037_p4 }
  0x85   :  { %p6040_p7 = pnand %p6039_p6, %p6033_p3 }
  0x87   :  { %6043 = shalt.err (!%p6040_p7)
}
  0x88   :  { %95 = dma.hbm_to_vmem [thread:$0]  %s6376_s6, 32, %s93_s22, [#allocation12]  }
  0x89   :  { %s6116_s0 = smov [#allocation16]   ;;  %s6044_s18 = scalar_lea.hbm %s6378_s8, 16 }
  0x8a   :  { %s114_s15 = sshll.u32 %s6116_s0, 4  ;;  %p6045_p8 = scmp.ne.s32.totalorder %s6378_s8, %s6044_s18  ;;  %s115_s15 = int_to_ptr.vmem [resolvable:$true] %s114_s15 }
  0x8b   :  { %p6048_p9 = scmp.lt.u32.totalorder %s6044_s18, %s6378_s8 }
  0x8d   :  { %p6050_p10 = pnand %p6048_p9, %p6045_p8 }
  0x8f   :  { %6053 = shalt.err (!%p6050_p10)
}
  0x90   :  { %s6054_s12 = scalar_lea.vmem %s115_s15, 16  ;;  %s6058_s6 = scalar_lea.vmem %s115_s15, 32 }
  0x91   :  { %p6055_p11 = scmp.ne.s32.totalorder %s115_s15, %s6054_s12  ;;  %p6059_p12 = scmp.lt.s32.totalorder %s115_s15, %s115_s15 }
  0x92   :  { %p6060_p13 = scmp.lt.s32.totalorder %s6058_s6, %s6054_s12 }
  0x94   :  { %p6061_p0 = por %p6060_p13, %p6059_p12 }
  0x96   :  { %p6062_p1 = pnand %p6061_p0, %p6055_p11 }
  0x98   :  { %6065 = shalt.err (!%p6062_p1)
}
  0x99   :  { %117 = dma.hbm_to_vmem [thread:$0]  %s6378_s8, 16, %s115_s15, [#allocation15]  }
  0x9a   :  { %6088 = dma.done.wait [#allocation3], 768  }
  0x9b   :  { %6089 = vsyncadd [#allocation3], 4294966528 }
  0x9c   :  { %6090 = dma.done.wait [#allocation6], 37632  }
  0x9d   :  { %6091 = vsyncadd [#allocation6], 4294929664 }
  0x9e   :  { %6092 = dma.done.wait [#allocation9], 24640  }
  0x9f   :  { %6093 = vsyncadd [#allocation9], 4294942656 }
  0xa0   :  { %6094 = dma.done.wait [#allocation12], 8224  }
  0xa1   :  { %6095 = vsyncadd [#allocation12], 4294959072 }
  0xa2   :  { %6096 = dma.done.wait [#allocation15], 2064  }
  0xa3   :  { %6097 = vsyncadd [#allocation15], 4294965232  ;;  %v5036_v0 = vld [vmem:[#allocation7 + $0x4] ss:$24 sps:$4 sm:$0xff]   ;;  %v5040_v2 = vld [vmem:[#allocation7] ss:$24 sps:$4 sm:$0xff]  }
  0xa4   :  { %v5038_v1 = vld [vmem:[#allocation7 + $0xc] ss:$24 sps:$4 sm:$0xff]   ;;  %1898 = vmatprep.subr.bf16.mxu0 %v5036_v0  ;;  %v5041_v3 = vld [vmem:[#allocation7 + $0x8] ss:$24 sps:$4 sm:$0xff]   ;;  %v5044_v5 = vld [vmem:[#allocation7 + $0x3c] ss:$24 sps:$4 sm:$0xff]  }
  0xa5   :  { %2021 = vmatprep.subr.bf16.mxu1 %v5038_v1  ;;  %v5042_v4 = vld [vmem:[#allocation7 + $0x34] ss:$24 sps:$4 sm:$0xff]   ;;  %1899 = vmatpush1.bf16.msra.mxu0 %v5040_v2  ;;  %v5046_v6 = vld [vmem:[#allocation7 + $0x30] ss:$24 sps:$4 sm:$0xff]   ;;  %v5048_v8 = vld [vmem:[#allocation7 + $0x64] ss:$24 sps:$4 sm:$0xff]  }
  0xa6   :  { %2022 = vmatpush1.bf16.msra.mxu1 %v5041_v3  ;;  %1900 = vmatprep.subr.bf16.mxu0 %v5042_v4  ;;  %v5047_v7 = vld [vmem:[#allocation7 + $0x38] ss:$24 sps:$4 sm:$0xff]   ;;  %v5050_v9 = vld [vmem:[#allocation7 + $0x6c] ss:$24 sps:$4 sm:$0xff]   ;;  %v5053_v11 = vld [vmem:[#allocation7 + $0x68] ss:$24 sps:$4 sm:$0xff]  }
  0xa7   :  { %2023 = vmatprep.subr.bf16.mxu1 %v5044_v5  ;;  %v5052_v10 = vld [vmem:[#allocation7 + $0x60] ss:$24 sps:$4 sm:$0xff]   ;;  %v5054_v12 = vld [vmem:[#allocation7 + $0x94] ss:$24 sps:$4 sm:$0xff]   ;;  %v5058_v14 = vld [vmem:[#allocation7 + $0x90] ss:$24 sps:$4 sm:$0xff]  }
  0xa8   :  { %v5056_v13 = vld [vmem:[#allocation7 + $0x9c] ss:$24 sps:$4 sm:$0xff]   ;;  %v5059_v15 = vld [vmem:[#allocation7 + $0x98] ss:$24 sps:$4 sm:$0xff]   ;;  %v5062_v17 = vld [vmem:[#allocation7 + $0xcc] ss:$24 sps:$4 sm:$0xff]  }
  0xa9   :  { %1901 = vmatpush1.bf16.msra.mxu0 %v5046_v6  ;;  %v5060_v16 = vld [vmem:[#allocation7 + $0xc4] ss:$24 sps:$4 sm:$0xff]   ;;  %v5064_v18 = vld [vmem:[#allocation7 + $0xc0] ss:$24 sps:$4 sm:$0xff]   ;;  %v5066_v20 = vld [vmem:[#allocation7 + $0xf4] ss:$24 sps:$4 sm:$0xff]  }
  0xaa   :  { %2024 = vmatpush1.bf16.msra.mxu1 %v5047_v7  ;;  %1902 = vmatprep.subr.bf16.mxu0 %v5048_v8  ;;  %v5065_v19 = vld [vmem:[#allocation7 + $0xc8] ss:$24 sps:$4 sm:$0xff]   ;;  %v5068_v21 = vld [vmem:[#allocation7 + $0xfc] ss:$24 sps:$4 sm:$0xff]   ;;  %v5071_v23 = vld [vmem:[#allocation7 + $0xf8] ss:$24 sps:$4 sm:$0xff]  }
  0xab   :  { %2025 = vmatprep.subr.bf16.mxu1 %v5050_v9  ;;  %v5070_v22 = vld [vmem:[#allocation7 + $0xf0] ss:$24 sps:$4 sm:$0xff]   ;;  %v5072_v24 = vld [vmem:[#allocation7 + $0x124] ss:$24 sps:$4 sm:$0xff]   ;;  %v5076_v26 = vld [vmem:[#allocation7 + $0x120] ss:$24 sps:$4 sm:$0xff]  }
  0xac   :  { %v5074_v25 = vld [vmem:[#allocation7 + $0x12c] ss:$24 sps:$4 sm:$0xff]   ;;  %v5077_v27 = vld [vmem:[#allocation7 + $0x128] ss:$24 sps:$4 sm:$0xff]   ;;  %v5080_v29 = vld [vmem:[#allocation7 + $0x15c] ss:$24 sps:$4 sm:$0xff]  }
  0xad   :  { %1903 = vmatpush1.bf16.msra.mxu0 %v5052_v10  ;;  %v5078_v28 = vld [vmem:[#allocation7 + $0x154] ss:$24 sps:$4 sm:$0xff]   ;;  %v5082_v30 = vld [vmem:[#allocation7 + $0x150] ss:$24 sps:$4 sm:$0xff]   ;;  %v5084_v32 = vld [vmem:[#allocation7 + $0x184] ss:$24 sps:$4 sm:$0xff]  }
  0xae   :  { %2026 = vmatpush1.bf16.msra.mxu1 %v5053_v11  ;;  %1904 = vmatprep.subr.bf16.mxu0 %v5054_v12  ;;  %v5083_v31 = vld [vmem:[#allocation7 + $0x158] ss:$24 sps:$4 sm:$0xff]   ;;  %v5086_v33 = vld [vmem:[#allocation7 + $0x18c] ss:$24 sps:$4 sm:$0xff]   ;;  %v5089_v35 = vld [vmem:[#allocation7 + $0x188] ss:$24 sps:$4 sm:$0xff]  }
  0xaf   :  { %2027 = vmatprep.subr.bf16.mxu1 %v5056_v13  ;;  %v5088_v34 = vld [vmem:[#allocation7 + $0x180] ss:$24 sps:$4 sm:$0xff]   ;;  %v5090_v36 = vld [vmem:[#allocation7 + $0x1b4] ss:$24 sps:$4 sm:$0xff]   ;;  %v5094_v38 = vld [vmem:[#allocation7 + $0x1b0] ss:$24 sps:$4 sm:$0xff]  }
  0xb0   :  { %v5092_v37 = vld [vmem:[#allocation7 + $0x1bc] ss:$24 sps:$4 sm:$0xff]   ;;  %v5095_v39 = vld [vmem:[#allocation7 + $0x1b8] ss:$24 sps:$4 sm:$0xff]   ;;  %v5098_v41 = vld [vmem:[#allocation7 + $0x1ec] ss:$24 sps:$4 sm:$0xff]  }
  0xb1   :  { %1905 = vmatpush1.bf16.msra.mxu0 %v5058_v14  ;;  %v5096_v40 = vld [vmem:[#allocation7 + $0x1e4] ss:$24 sps:$4 sm:$0xff]   ;;  %v5100_v42 = vld [vmem:[#allocation7 + $0x1e0] ss:$24 sps:$4 sm:$0xff]   ;;  %v5102_v44 = vld [vmem:[#allocation7 + $0x214] ss:$24 sps:$4 sm:$0xff]  }
  0xb2   :  { %2028 = vmatpush1.bf16.msra.mxu1 %v5059_v15  ;;  %1906 = vmatprep.subr.bf16.mxu0 %v5060_v16  ;;  %v5101_v43 = vld [vmem:[#allocation7 + $0x1e8] ss:$24 sps:$4 sm:$0xff]   ;;  %v5104_v45 = vld [vmem:[#allocation7 + $0x21c] ss:$24 sps:$4 sm:$0xff]   ;;  %v5107_v49 = vld [vmem:[#allocation7 + $0x218] ss:$24 sps:$4 sm:$0xff]  }
  0xb3   :  { %2029 = vmatprep.subr.bf16.mxu1 %v5062_v17  ;;  %v147_v46 = vld [vmem:[#allocation2 + $0x8] sm:$0xff]  ;;  %v153_v47 = vld [vmem:[#allocation5 + $0x8] sm:$0xff]  ;;  %v146_v1 = vld [vmem:[#allocation2] sm:$0xff]  ;;  %s6117_s8 = smov [#allocation17]  }
  0xb4   :  { %v5106_v48 = vld [vmem:[#allocation7 + $0x210] ss:$24 sps:$4 sm:$0xff]   ;;  %v159_v50 = vmul.f32 %v153_v47, %v147_v46  ;;  %v5108_v51 = vld [vmem:[#allocation7 + $0x244] ss:$24 sps:$4 sm:$0xff]   ;;  %v5112_v54 = vld [vmem:[#allocation7 + $0x240] ss:$24 sps:$4 sm:$0xff]  }
  0xb5   :  { %1907 = vmatpush1.bf16.msra.mxu0 %v5064_v18  ;;  %v5110_v52 = vld [vmem:[#allocation7 + $0x24c] ss:$24 sps:$4 sm:$0xff]   ;;  %v5113_v55 = vld [vmem:[#allocation7 + $0x248] ss:$24 sps:$4 sm:$0xff]   ;;  %v5116_v57 = vld [vmem:[#allocation7 + $0x27c] ss:$24 sps:$4 sm:$0xff]  }
  0xb6   :  { %2030 = vmatpush1.bf16.msra.mxu1 %v5065_v19  ;;  %1908 = vmatprep.subr.bf16.mxu0 %v5066_v20  ;;  %v6290_v53 = vpack.c.bf16 %v159_v50, %v159_v50  ;;  %v5114_v56 = vld [vmem:[#allocation7 + $0x274] ss:$24 sps:$4 sm:$0xff]   ;;  %v5118_v58 = vld [vmem:[#allocation7 + $0x270] ss:$24 sps:$4 sm:$0xff]   ;;  %v5120_v60 = vld [vmem:[#allocation7 + $0x2a4] ss:$24 sps:$4 sm:$0xff]  }
  0xb7   :  { %2031 = vmatprep.subr.bf16.mxu1 %v5068_v21  ;;  %v5119_v59 = vld [vmem:[#allocation7 + $0x278] ss:$24 sps:$4 sm:$0xff]   ;;  %v5122_v61 = vld [vmem:[#allocation7 + $0x2ac] ss:$24 sps:$4 sm:$0xff]   ;;  %v5125_v63 = vld [vmem:[#allocation7 + $0x2a8] ss:$24 sps:$4 sm:$0xff]  }
  0xb8   :  { %1930 = vmatprep.mubr.bf16.mxu0 %v6290_v53  ;;  %2053 = vmatprep.mubr.bf16.mxu1 %v6290_v53  ;;  %v5124_v62 = vld [vmem:[#allocation7 + $0x2a0] ss:$24 sps:$4 sm:$0xff]   ;;  %v5126_v0 = vld [vmem:[#allocation7 + $0x2d4] ss:$24 sps:$4 sm:$0xff]   ;;  %v5130_v4 = vld [vmem:[#allocation7 + $0x2d0] ss:$24 sps:$4 sm:$0xff]  }
  0xb9   :  { %1909 = vmatpush1.bf16.msra.mxu0 %v5070_v22  ;;  %v152_v2 = vld [vmem:[#allocation5] sm:$0xff]  ;;  %v5134_v7 = vld [vmem:[#allocation7 + $0x304] ss:$24 sps:$4 sm:$0xff]   ;;  %v5132_v9 = vld [vmem:[#allocation7 + $0x300] ss:$24 sps:$4 sm:$0xff]   ;;  %s4372_s25 = sshll.u32 %s6117_s8, 4  ;;  %s4373_s25 = int_to_ptr.vmem [resolvable:$true] %s4372_s25 }
  0xba   :  { %2032 = vmatpush1.bf16.msra.mxu1 %v5071_v23  ;;  %1910 = vmatprep.subr.bf16.mxu0 %v5072_v24  ;;  %v5128_v3 = vld [vmem:[#allocation7 + $0x2dc] ss:$24 sps:$4 sm:$0xff]   ;;  %v5131_v5 = vld [vmem:[#allocation7 + $0x2d8] ss:$24 sps:$4 sm:$0xff]   ;;  %v158_v6 = vmul.f32 %v152_v2, %v146_v1  ;;  %v5137_v8 = vld [vmem:[#allocation7 + $0x30c] ss:$24 sps:$4 sm:$0xff]   ;;  %p6071_p3 = scmp.lt.s32.totalorder %s4373_s25, %s4373_s25 }
  0xbb   :  { %2033 = vmatprep.subr.bf16.mxu1 %v5074_v25  ;;  %v5135_v10 = vld [vmem:[#allocation7 + $0x308] ss:$24 sps:$4 sm:$0xff]   ;;  %v5140_v12 = vld [vmem:[#allocation7 + $0x334] ss:$24 sps:$4 sm:$0xff]   ;;  %v5141_v15 = vld [vmem:[#allocation7 + $0x338] ss:$24 sps:$4 sm:$0xff]  }
  0xbc   :  { %v6294_v11 = vpack.c.bf16 %v158_v6, %v158_v6  ;;  %v5143_v13 = vld [vmem:[#allocation7 + $0x33c] ss:$24 sps:$4 sm:$0xff]   ;;  %v5138_v14 = vld [vmem:[#allocation7 + $0x330] ss:$24 sps:$4 sm:$0xff]   ;;  %v5149_v17 = vld [vmem:[#allocation7 + $0x36c] ss:$24 sps:$4 sm:$0xff]  }
  0xbd   :  { %1911 = vmatpush1.bf16.msra.mxu0 %v5076_v26  ;;  %v5146_v16 = vld [vmem:[#allocation7 + $0x364] ss:$24 sps:$4 sm:$0xff]   ;;  %v5144_v18 = vld [vmem:[#allocation7 + $0x360] ss:$24 sps:$4 sm:$0xff]   ;;  %v5152_v20 = vld [vmem:[#allocation7 + $0x394] ss:$24 sps:$4 sm:$0xff]  }
  0xbe   :  { %2034 = vmatpush1.bf16.msra.mxu1 %v5077_v27  ;;  %1912 = vmatprep.subr.bf16.mxu0 %v5078_v28  ;;  %v5147_v19 = vld [vmem:[#allocation7 + $0x368] ss:$24 sps:$4 sm:$0xff]   ;;  %v5155_v21 = vld [vmem:[#allocation7 + $0x39c] ss:$24 sps:$4 sm:$0xff]   ;;  %v5153_v23 = vld [vmem:[#allocation7 + $0x398] ss:$24 sps:$4 sm:$0xff]  }
  0xbf   :  { %2035 = vmatprep.subr.bf16.mxu1 %v5080_v29  ;;  %v5150_v22 = vld [vmem:[#allocation7 + $0x390] ss:$24 sps:$4 sm:$0xff]   ;;  %v5158_v24 = vld [vmem:[#allocation7 + $0x3c4] ss:$24 sps:$4 sm:$0xff]   ;;  %v5156_v26 = vld [vmem:[#allocation7 + $0x3c0] ss:$24 sps:$4 sm:$0xff]  }
  0xc0   :  { %v5161_v25 = vld [vmem:[#allocation7 + $0x3cc] ss:$24 sps:$4 sm:$0xff]   ;;  %v5159_v27 = vld [vmem:[#allocation7 + $0x3c8] ss:$24 sps:$4 sm:$0xff]   ;;  %v5167_v29 = vld [vmem:[#allocation7 + $0x3fc] ss:$24 sps:$4 sm:$0xff]  }
  0xc1   :  { %1913 = vmatpush1.bf16.msra.mxu0 %v5082_v30  ;;  %v5164_v28 = vld [vmem:[#allocation7 + $0x3f4] ss:$24 sps:$4 sm:$0xff]   ;;  %v5162_v30 = vld [vmem:[#allocation7 + $0x3f0] ss:$24 sps:$4 sm:$0xff]   ;;  %v5180_v46 = vld [vmem:[#allocation7 + $0x480] ss:$24 sps:$4 sm:$0xff]  }
  0xc2   :  { %2036 = vmatpush1.bf16.msra.mxu1 %v5083_v31  ;;  %1914 = vmatprep.subr.bf16.mxu0 %v5084_v32  ;;  %v5165_v31 = vld [vmem:[#allocation7 + $0x3f8] ss:$24 sps:$4 sm:$0xff]   ;;  %v5170_v32 = vld [vmem:[#allocation7 + $0x424] ss:$24 sps:$4 sm:$0xff]   ;;  %v5183_v47 = vld [vmem:[#allocation7 + $0x488] ss:$24 sps:$4 sm:$0xff]  }
  0xc3   :  { %2037 = vmatprep.subr.bf16.mxu1 %v5086_v33  ;;  %v5173_v33 = vld [vmem:[#allocation7 + $0x42c] ss:$24 sps:$4 sm:$0xff]   ;;  %v5186_v50 = vld [vmem:[#allocation7 + $0x4b0] ss:$24 sps:$4 sm:$0xff]   ;;  %v5215_v2 = vld [vmem:[#allocation7 + $0x57c] ss:$24 sps:$4 sm:$0xff]  }
  0xc4   :  { %v5212_v1 = vld [vmem:[#allocation7 + $0x574] ss:$24 sps:$4 sm:$0xff]   ;;  %s6066_s26 = scalar_lea.vmem %s4373_s25, 64 }
  0xc5   :  { %1915 = vmatpush1.bf16.msra.mxu0 %v5088_v34  ;;  %v149_v34 = vld [vmem:[#allocation2 + $0x18] sm:$0xff]  ;;  %v5221_v6 = vld [vmem:[#allocation7 + $0x5ac] ss:$24 sps:$4 sm:$0xff]   ;;  %p6067_p2 = scmp.ne.s32.totalorder %s4373_s25, %s6066_s26  ;;  %p6072_p4 = scmp.lt.s32.totalorder %s6066_s26, %s6066_s26 }
  0xc6   :  { %2038 = vmatpush1.bf16.msra.mxu1 %v5089_v35  ;;  %1916 = vmatprep.subr.bf16.mxu0 %v5090_v36  ;;  %v155_v35 = vld [vmem:[#allocation5 + $0x18] sm:$0xff]  ;;  %v5168_v36 = vld [vmem:[#allocation7 + $0x420] ss:$24 sps:$4 sm:$0xff]  }
  0xc7   :  { %2039 = vmatprep.subr.bf16.mxu1 %v5092_v37  ;;  %v5171_v37 = vld [vmem:[#allocation7 + $0x428] ss:$24 sps:$4 sm:$0xff]   ;;  %p6073_p5 = por %p6072_p4, %p6071_p3 }
  0xc9   :  { %1917 = vmatpush1.bf16.msra.mxu0 %v5094_v38  ;;  %v161_v38 = vmul.f32 %v155_v35, %v149_v34  ;;  %v5248_v34 = vld [vmem:[#allocation7 + $0x694] ss:$24 sps:$4 sm:$0xff]   ;;  %p6074_p6 = pnand %p6073_p5, %p6067_p2 }
  0xca   :  { %2040 = vmatpush1.bf16.msra.mxu1 %v5095_v39  ;;  %1918 = vmatprep.subr.bf16.mxu0 %v5096_v40  ;;  %v5176_v39 = vld [vmem:[#allocation7 + $0x454] ss:$24 sps:$4 sm:$0xff]  }
  0xcb   :  { %2041 = vmatprep.subr.bf16.mxu1 %v5098_v41  ;;  %v5179_v40 = vld [vmem:[#allocation7 + $0x45c] ss:$24 sps:$4 sm:$0xff]   ;;  %v6298_v41 = vpack.c.bf16 %v161_v38, %v161_v38 }
  0xcc   :  { %v5251_v35 = vld [vmem:[#allocation7 + $0x69c] ss:$24 sps:$4 sm:$0xff]  }
  0xcd   :  { %1919 = vmatpush1.bf16.msra.mxu0 %v5100_v42  ;;  %v5174_v42 = vld [vmem:[#allocation7 + $0x450] ss:$24 sps:$4 sm:$0xff]   ;;  %v5254_v38 = vld [vmem:[#allocation7 + $0x6c4] ss:$24 sps:$4 sm:$0xff]  }
  0xce   :  { %2042 = vmatpush1.bf16.msra.mxu1 %v5101_v43  ;;  %1920 = vmatprep.subr.bf16.mxu0 %v5102_v44  ;;  %v5177_v43 = vld [vmem:[#allocation7 + $0x458] ss:$24 sps:$4 sm:$0xff]   ;;  %v5182_v44 = vld [vmem:[#allocation7 + $0x484] ss:$24 sps:$4 sm:$0xff]  }
  0xcf   :  { %2043 = vmatprep.subr.bf16.mxu1 %v5104_v45  ;;  %v5185_v45 = vld [vmem:[#allocation7 + $0x48c] ss:$24 sps:$4 sm:$0xff]  }
  0xd1   :  { %1921 = vmatpush1.bf16.msra.mxu0 %v5106_v48  ;;  %v5188_v48 = vld [vmem:[#allocation7 + $0x4b4] ss:$24 sps:$4 sm:$0xff]  }
  0xd2   :  { %2044 = vmatpush1.bf16.msra.mxu1 %v5107_v49  ;;  %1922 = vmatprep.subr.bf16.mxu0 %v5108_v51  ;;  %v5191_v49 = vld [vmem:[#allocation7 + $0x4bc] ss:$24 sps:$4 sm:$0xff]   ;;  %v5189_v51 = vld [vmem:[#allocation7 + $0x4b8] ss:$24 sps:$4 sm:$0xff]  }
  0xd3   :  { %2045 = vmatprep.subr.bf16.mxu1 %v5110_v52  ;;  %v5194_v52 = vld [vmem:[#allocation7 + $0x4e4] ss:$24 sps:$4 sm:$0xff]  }
  0xd5   :  { %1923 = vmatpush1.bf16.msra.mxu0 %v5112_v54  ;;  %v5197_v54 = vld [vmem:[#allocation7 + $0x4ec] ss:$24 sps:$4 sm:$0xff]  }
  0xd6   :  { %2046 = vmatpush1.bf16.msra.mxu1 %v5113_v55  ;;  %1924 = vmatprep.subr.bf16.mxu0 %v5114_v56  ;;  %v5192_v55 = vld [vmem:[#allocation7 + $0x4e0] ss:$24 sps:$4 sm:$0xff]  }
  0xd7   :  { %2047 = vmatprep.subr.bf16.mxu1 %v5116_v57  ;;  %v5195_v56 = vld [vmem:[#allocation7 + $0x4e8] ss:$24 sps:$4 sm:$0xff]   ;;  %v5200_v57 = vld [vmem:[#allocation7 + $0x514] ss:$24 sps:$4 sm:$0xff]  }
  0xd9   :  { %1925 = vmatpush1.bf16.msra.mxu0 %v5118_v58  ;;  %v5203_v58 = vld [vmem:[#allocation7 + $0x51c] ss:$24 sps:$4 sm:$0xff]  }
  0xda   :  { %2048 = vmatpush1.bf16.msra.mxu1 %v5119_v59  ;;  %1926 = vmatprep.subr.bf16.mxu0 %v5120_v60  ;;  %v5198_v59 = vld [vmem:[#allocation7 + $0x510] ss:$24 sps:$4 sm:$0xff]  }
  0xdb   :  { %2049 = vmatprep.subr.bf16.mxu1 %v5122_v61  ;;  %v5201_v60 = vld [vmem:[#allocation7 + $0x518] ss:$24 sps:$4 sm:$0xff]   ;;  %v5206_v61 = vld [vmem:[#allocation7 + $0x544] ss:$24 sps:$4 sm:$0xff]  }
  0xdd   :  { %1927 = vmatpush1.bf16.msra.mxu0 %v5124_v62  ;;  %v5209_v62 = vld [vmem:[#allocation7 + $0x54c] ss:$24 sps:$4 sm:$0xff]  }
  0xde   :  { %2050 = vmatpush1.bf16.msra.mxu1 %v5125_v63  ;;  %1928 = vmatprep.subr.bf16.mxu0 %v5126_v0  ;;  %v5204_v63 = vld [vmem:[#allocation7 + $0x540] ss:$24 sps:$4 sm:$0xff]  }
  0xdf   :  { %2051 = vmatprep.subr.bf16.mxu1 %v5128_v3  ;;  %v5207_v0 = vld [vmem:[#allocation7 + $0x548] ss:$24 sps:$4 sm:$0xff]  }
  0xe0   :  { %v5210_v3 = vld [vmem:[#allocation7 + $0x570] ss:$24 sps:$4 sm:$0xff]  }
  0xe1   :  { %1929 = vmatpush1.bf16.msra.mxu0 %v5130_v4  ;;  %v5213_v4 = vld [vmem:[#allocation7 + $0x578] ss:$24 sps:$4 sm:$0xff]  }
  0xe2   :  { %2052 = vmatpush1.bf16.msra.mxu1 %v5131_v5  ;;  %1939 = vmatprep.subr.bf16.mxu0 %v5134_v7  ;;  %v5218_v5 = vld [vmem:[#allocation7 + $0x5a4] ss:$24 sps:$4 sm:$0xff]   ;;  %v5216_v7 = vld [vmem:[#allocation7 + $0x5a0] ss:$24 sps:$4 sm:$0xff]  }
  0xe3   :  { %2062 = vmatprep.subr.bf16.mxu1 %v5137_v8  ;;  %v5219_v8 = vld [vmem:[#allocation7 + $0x5a8] ss:$24 sps:$4 sm:$0xff]  }
  0xe4   :  { %1931 = vmatmul.mubr.bf16.vlgmr.msra.gmra.mrb[0].mxu0 %v6294_v11 }
  0xe5   :  { %2054 = vmatmul.mubr.bf16.vlgmr.msra.gmra.mrb[0].mxu1 %v6294_v11  ;;  %1940 = vmatpush1.bf16.msra.mxu0 %v5132_v9  ;;  %v5224_v9 = vld [vmem:[#allocation7 + $0x5d4] ss:$24 sps:$4 sm:$0xff]  }
  0xe6   :  { %2063 = vmatpush1.bf16.msra.mxu1 %v5135_v10  ;;  %1941 = vmatprep.subr.bf16.mxu0 %v5140_v12  ;;  %v148_v10 = vld [vmem:[#allocation2 + $0x10] sm:$0xff]  ;;  %v154_v12 = vld [vmem:[#allocation5 + $0x10] sm:$0xff] }
  0xe7   :  { %2064 = vmatprep.subr.bf16.mxu1 %v5143_v13  ;;  %1971 = vmatprep.mubr.bf16.mxu0 %v6298_v41  ;;  %v5227_v13 = vld [vmem:[#allocation7 + $0x5dc] ss:$24 sps:$4 sm:$0xff]  }
  0xe8   :  { %2094 = vmatprep.mubr.bf16.mxu1 %v6298_v41 }
  0xe9   :  { %1942 = vmatpush1.bf16.msra.mxu0 %v5138_v14  ;;  %v5222_v14 = vld [vmem:[#allocation7 + $0x5d0] ss:$24 sps:$4 sm:$0xff]  }
  0xea   :  { %2065 = vmatpush1.bf16.msra.mxu1 %v5141_v15  ;;  %1943 = vmatprep.subr.bf16.mxu0 %v5146_v16  ;;  %v5225_v15 = vld [vmem:[#allocation7 + $0x5d8] ss:$24 sps:$4 sm:$0xff]   ;;  %v160_v16 = vmul.f32 %v154_v12, %v148_v10  ;;  %v5303_v12 = vld [vmem:[#allocation7 + $0x848] ss:$24 sps:$4 sm:$0xff]  }
  0xeb   :  { %2066 = vmatprep.subr.bf16.mxu1 %v5149_v17  ;;  %v5230_v17 = vld [vmem:[#allocation7 + $0x604] ss:$24 sps:$4 sm:$0xff]   ;;  %v5300_v10 = vld [vmem:[#allocation7 + $0x840] ss:$24 sps:$4 sm:$0xff]  }
  0xed   :  { %1944 = vmatpush1.bf16.msra.mxu0 %v5144_v18  ;;  %v5233_v18 = vld [vmem:[#allocation7 + $0x60c] ss:$24 sps:$4 sm:$0xff]  }
  0xee   :  { %2067 = vmatpush1.bf16.msra.mxu1 %v5147_v19  ;;  %1945 = vmatprep.subr.bf16.mxu0 %v5152_v20  ;;  %v5228_v19 = vld [vmem:[#allocation7 + $0x600] ss:$24 sps:$4 sm:$0xff]  }
  0xef   :  { %2068 = vmatprep.subr.bf16.mxu1 %v5155_v21  ;;  %v5231_v20 = vld [vmem:[#allocation7 + $0x608] ss:$24 sps:$4 sm:$0xff]   ;;  %v6302_v21 = vpack.c.bf16 %v160_v16, %v160_v16  ;;  %v5309_v16 = vld [vmem:[#allocation7 + $0x878] ss:$24 sps:$4 sm:$0xff]  }
  0xf1   :  { %1946 = vmatpush1.bf16.msra.mxu0 %v5150_v22  ;;  %v5236_v22 = vld [vmem:[#allocation7 + $0x634] ss:$24 sps:$4 sm:$0xff]  }
  0xf2   :  { %2069 = vmatpush1.bf16.msra.mxu1 %v5153_v23  ;;  %1947 = vmatprep.subr.bf16.mxu0 %v5158_v24  ;;  %v5239_v23 = vld [vmem:[#allocation7 + $0x63c] ss:$24 sps:$4 sm:$0xff]   ;;  %v151_v24 = vld [vmem:[#allocation2 + $0x28] sm:$0xff] }
  0xf3   :  { %2070 = vmatprep.subr.bf16.mxu1 %v5161_v25  ;;  %v5234_v25 = vld [vmem:[#allocation7 + $0x630] ss:$24 sps:$4 sm:$0xff]  }
  0xf5   :  { %1948 = vmatpush1.bf16.msra.mxu0 %v5156_v26  ;;  %v5237_v26 = vld [vmem:[#allocation7 + $0x638] ss:$24 sps:$4 sm:$0xff]  }
  0xf6   :  { %2071 = vmatpush1.bf16.msra.mxu1 %v5159_v27  ;;  %1949 = vmatprep.subr.bf16.mxu0 %v5164_v28  ;;  %v157_v27 = vld [vmem:[#allocation5 + $0x28] sm:$0xff] }
  0xf7   :  { %2072 = vmatprep.subr.bf16.mxu1 %v5167_v29  ;;  %v5242_v28 = vld [vmem:[#allocation7 + $0x664] ss:$24 sps:$4 sm:$0xff]   ;;  %v163_v29 = vmul.f32 %v157_v27, %v151_v24 }
  0xf8   :  { %v150_v24 = vld [vmem:[#allocation2 + $0x20] sm:$0xff] }
  0xf9   :  { %1950 = vmatpush1.bf16.msra.mxu0 %v5162_v30  ;;  %v5245_v30 = vld [vmem:[#allocation7 + $0x66c] ss:$24 sps:$4 sm:$0xff]  }
  0xfa   :  { %2073 = vmatpush1.bf16.msra.mxu1 %v5165_v31  ;;  %1951 = vmatprep.subr.bf16.mxu0 %v5170_v32  ;;  %v6306_v31 = vpack.c.bf16 %v163_v29, %v163_v29  ;;  %v5240_v32 = vld [vmem:[#allocation7 + $0x660] ss:$24 sps:$4 sm:$0xff]   ;;  %v5326_v29 = vld [vmem:[#allocation7 + $0x14] ss:$24 sps:$4 sm:$0xff]  }
  0xfb   :  { %2074 = vmatprep.subr.bf16.mxu1 %v5173_v33  ;;  %v5243_v33 = vld [vmem:[#allocation7 + $0x668] ss:$24 sps:$4 sm:$0xff]  }
  0xfd   :  { %1952 = vmatpush1.bf16.msra.mxu0 %v5168_v36  ;;  %v5246_v36 = vld [vmem:[#allocation7 + $0x690] ss:$24 sps:$4 sm:$0xff]  }
  0xfe   :  { %2075 = vmatpush1.bf16.msra.mxu1 %v5171_v37  ;;  %1953 = vmatprep.subr.bf16.mxu0 %v5176_v39  ;;  %v5249_v37 = vld [vmem:[#allocation7 + $0x698] ss:$24 sps:$4 sm:$0xff]   ;;  %v5257_v39 = vld [vmem:[#allocation7 + $0x6cc] ss:$24 sps:$4 sm:$0xff]  }
  0xff   :  { %2076 = vmatprep.subr.bf16.mxu1 %v5179_v40  ;;  %v5252_v40 = vld [vmem:[#allocation7 + $0x6c0] ss:$24 sps:$4 sm:$0xff]  }
 0x101   :  { %1954 = vmatpush1.bf16.msra.mxu0 %v5174_v42  ;;  %v5255_v42 = vld [vmem:[#allocation7 + $0x6c8] ss:$24 sps:$4 sm:$0xff]  }
 0x102   :  { %2077 = vmatpush1.bf16.msra.mxu1 %v5177_v43  ;;  %1955 = vmatprep.subr.bf16.mxu0 %v5182_v44  ;;  %v5260_v43 = vld [vmem:[#allocation7 + $0x6f4] ss:$24 sps:$4 sm:$0xff]  }
 0x103   :  { %2078 = vmatprep.subr.bf16.mxu1 %v5185_v45  ;;  %v5263_v44 = vld [vmem:[#allocation7 + $0x6fc] ss:$24 sps:$4 sm:$0xff]   ;;  %v5258_v45 = vld [vmem:[#allocation7 + $0x6f0] ss:$24 sps:$4 sm:$0xff]  }
 0x105   :  { %1956 = vmatpush1.bf16.msra.mxu0 %v5180_v46  ;;  %v5261_v46 = vld [vmem:[#allocation7 + $0x6f8] ss:$24 sps:$4 sm:$0xff]  }
 0x106   :  { %2079 = vmatpush1.bf16.msra.mxu1 %v5183_v47  ;;  %1957 = vmatprep.subr.bf16.mxu0 %v5188_v48  ;;  %v5266_v47 = vld [vmem:[#allocation7 + $0x724] ss:$24 sps:$4 sm:$0xff]  }
 0x107   :  { %2080 = vmatprep.subr.bf16.mxu1 %v5191_v49  ;;  %v5269_v48 = vld [vmem:[#allocation7 + $0x72c] ss:$24 sps:$4 sm:$0xff]   ;;  %v5264_v49 = vld [vmem:[#allocation7 + $0x720] ss:$24 sps:$4 sm:$0xff]  }
 0x109   :  { %1958 = vmatpush1.bf16.msra.mxu0 %v5186_v50  ;;  %v5267_v50 = vld [vmem:[#allocation7 + $0x728] ss:$24 sps:$4 sm:$0xff]  }
 0x10a   :  { %2081 = vmatpush1.bf16.msra.mxu1 %v5189_v51  ;;  %1959 = vmatprep.subr.bf16.mxu0 %v5194_v52  ;;  %v5272_v51 = vld [vmem:[#allocation7 + $0x754] ss:$24 sps:$4 sm:$0xff]  }
 0x10b   :  { %2082 = vmatprep.subr.bf16.mxu1 %v5197_v54  ;;  %v5275_v52 = vld [vmem:[#allocation7 + $0x75c] ss:$24 sps:$4 sm:$0xff]   ;;  %v5270_v54 = vld [vmem:[#allocation7 + $0x750] ss:$24 sps:$4 sm:$0xff]  }
 0x10d   :  { %1960 = vmatpush1.bf16.msra.mxu0 %v5192_v55  ;;  %v5273_v55 = vld [vmem:[#allocation7 + $0x758] ss:$24 sps:$4 sm:$0xff]  }
 0x10e   :  { %2083 = vmatpush1.bf16.msra.mxu1 %v5195_v56  ;;  %1961 = vmatprep.subr.bf16.mxu0 %v5200_v57  ;;  %v5278_v56 = vld [vmem:[#allocation7 + $0x784] ss:$24 sps:$4 sm:$0xff]  }
 0x10f   :  { %2084 = vmatprep.subr.bf16.mxu1 %v5203_v58  ;;  %v5281_v57 = vld [vmem:[#allocation7 + $0x78c] ss:$24 sps:$4 sm:$0xff]   ;;  %v5276_v58 = vld [vmem:[#allocation7 + $0x780] ss:$24 sps:$4 sm:$0xff]  }
 0x111   :  { %1962 = vmatpush1.bf16.msra.mxu0 %v5198_v59  ;;  %v5279_v59 = vld [vmem:[#allocation7 + $0x788] ss:$24 sps:$4 sm:$0xff]  }
 0x112   :  { %2085 = vmatpush1.bf16.msra.mxu1 %v5201_v60  ;;  %1963 = vmatprep.subr.bf16.mxu0 %v5206_v61  ;;  %v5284_v60 = vld [vmem:[#allocation7 + $0x7b4] ss:$24 sps:$4 sm:$0xff]  }
 0x113   :  { %2086 = vmatprep.subr.bf16.mxu1 %v5209_v62  ;;  %v5287_v61 = vld [vmem:[#allocation7 + $0x7bc] ss:$24 sps:$4 sm:$0xff]   ;;  %v5282_v62 = vld [vmem:[#allocation7 + $0x7b0] ss:$24 sps:$4 sm:$0xff]  }
 0x115   :  { %1964 = vmatpush1.bf16.msra.mxu0 %v5204_v63  ;;  %v5285_v63 = vld [vmem:[#allocation7 + $0x7b8] ss:$24 sps:$4 sm:$0xff]  }
 0x116   :  { %2087 = vmatpush1.bf16.msra.mxu1 %v5207_v0  ;;  %1965 = vmatprep.subr.bf16.mxu0 %v5212_v1  ;;  %v5290_v0 = vld [vmem:[#allocation7 + $0x7e4] ss:$24 sps:$4 sm:$0xff]  }
 0x117   :  { %2088 = vmatprep.subr.bf16.mxu1 %v5215_v2  ;;  %v5293_v1 = vld [vmem:[#allocation7 + $0x7ec] ss:$24 sps:$4 sm:$0xff]   ;;  %v5288_v2 = vld [vmem:[#allocation7 + $0x7e0] ss:$24 sps:$4 sm:$0xff]  }
 0x119   :  { %1966 = vmatpush1.bf16.msra.mxu0 %v5210_v3  ;;  %v5291_v3 = vld [vmem:[#allocation7 + $0x7e8] ss:$24 sps:$4 sm:$0xff]  }
 0x11a   :  { %2089 = vmatpush1.bf16.msra.mxu1 %v5213_v4  ;;  %1967 = vmatprep.subr.bf16.mxu0 %v5218_v5  ;;  %v5296_v4 = vld [vmem:[#allocation7 + $0x814] ss:$24 sps:$4 sm:$0xff]  }
 0x11b   :  { %2090 = vmatprep.subr.bf16.mxu1 %v5221_v6  ;;  %v5299_v5 = vld [vmem:[#allocation7 + $0x81c] ss:$24 sps:$4 sm:$0xff]   ;;  %v5294_v6 = vld [vmem:[#allocation7 + $0x810] ss:$24 sps:$4 sm:$0xff]  }
 0x11d   :  { %1968 = vmatpush1.bf16.msra.mxu0 %v5216_v7  ;;  %v5297_v7 = vld [vmem:[#allocation7 + $0x818] ss:$24 sps:$4 sm:$0xff]  }
 0x11e   :  { %2091 = vmatpush1.bf16.msra.mxu1 %v5219_v8  ;;  %1969 = vmatprep.subr.bf16.mxu0 %v5224_v9  ;;  %v5302_v8 = vld [vmem:[#allocation7 + $0x844] ss:$24 sps:$4 sm:$0xff]  }
 0x11f   :  { %2092 = vmatprep.subr.bf16.mxu1 %v5227_v13  ;;  %v5305_v9 = vld [vmem:[#allocation7 + $0x84c] ss:$24 sps:$4 sm:$0xff]  }
 0x120   :  { %v5308_v13 = vld [vmem:[#allocation7 + $0x874] ss:$24 sps:$4 sm:$0xff]  }
 0x121   :  { %1970 = vmatpush1.bf16.msra.mxu0 %v5222_v14  ;;  %v5311_v14 = vld [vmem:[#allocation7 + $0x87c] ss:$24 sps:$4 sm:$0xff]  }
 0x122   :  { %2093 = vmatpush1.bf16.msra.mxu1 %v5225_v15  ;;  %1980 = vmatprep.subr.bf16.mxu0 %v5230_v17  ;;  %v5306_v15 = vld [vmem:[#allocation7 + $0x870] ss:$24 sps:$4 sm:$0xff]   ;;  %v5314_v17 = vld [vmem:[#allocation7 + $0x8a4] ss:$24 sps:$4 sm:$0xff]  }
 0x123   :  { %2103 = vmatprep.subr.bf16.mxu1 %v5233_v18  ;;  %v5317_v18 = vld [vmem:[#allocation7 + $0x8ac] ss:$24 sps:$4 sm:$0xff]  }
 0x124   :  { %1972 = vmatmul.mubr.bf16.vlgmr.msra.gmra.mrb[0].mxu0 %v6302_v21 }
 0x125   :  { %2095 = vmatmul.mubr.bf16.vlgmr.msra.gmra.mrb[0].mxu1 %v6302_v21  ;;  %1981 = vmatpush1.bf16.msra.mxu0 %v5228_v19  ;;  %v5312_v19 = vld [vmem:[#allocation7 + $0x8a0] ss:$24 sps:$4 sm:$0xff]  }
 0x126   :  { %2104 = vmatpush1.bf16.msra.mxu1 %v5231_v20  ;;  %1982 = vmatprep.subr.bf16.mxu0 %v5236_v22  ;;  %v5315_v20 = vld [vmem:[#allocation7 + $0x8a8] ss:$24 sps:$4 sm:$0xff]   ;;  %v5320_v22 = vld [vmem:[#allocation7 + $0x8d4] ss:$24 sps:$4 sm:$0xff]  }
 0x127   :  { %2105 = vmatprep.subr.bf16.mxu1 %v5239_v23  ;;  %2012 = vmatprep.mubr.bf16.mxu0 %v6306_v31  ;;  %v5323_v23 = vld [vmem:[#allocation7 + $0x8dc] ss:$24 sps:$4 sm:$0xff]  }
 0x128   :  { %2135 = vmatprep.mubr.bf16.mxu1 %v6306_v31 }
 0x129   :  { %1983 = vmatpush1.bf16.msra.mxu0 %v5234_v25  ;;  %v156_v25 = vld [vmem:[#allocation5 + $0x20] sm:$0xff] }
 0x12a   :  { %2106 = vmatpush1.bf16.msra.mxu1 %v5237_v26  ;;  %1984 = vmatprep.subr.bf16.mxu0 %v5242_v28  ;;  %v5318_v26 = vld [vmem:[#allocation7 + $0x8d0] ss:$24 sps:$4 sm:$0xff]   ;;  %v162_v27 = vmul.f32 %v156_v25, %v150_v24  ;;  %v5377_v24 = vld [vmem:[#allocation7 + $0x344] ss:$24 sps:$4 sm:$0xff]  }
 0x12b   :  { %2107 = vmatprep.subr.bf16.mxu1 %v5245_v30  ;;  %v5321_v28 = vld [vmem:[#allocation7 + $0x8d8] ss:$24 sps:$4 sm:$0xff]   ;;  %v5503_v25 = vld [vmem:[#allocation8 + $0x144] ss:$16 sps:$4 sm:$0xff]  }
 0x12c   :  { %v6310_v30 = vpack.c.bf16 %v162_v27, %v162_v27  ;;  %v5375_v27 = vld [vmem:[#allocation7 + $0x340] ss:$24 sps:$4 sm:$0xff]  }
 0x12d   :  { %1985 = vmatpush1.bf16.msra.mxu0 %v5240_v32  ;;  %v5324_v32 = vld [vmem:[#allocation7 + $0x10] ss:$24 sps:$4 sm:$0xff]  }
 0x12e   :  { %2108 = vmatpush1.bf16.msra.mxu1 %v5243_v33  ;;  %1986 = vmatprep.subr.bf16.mxu0 %v5248_v34  ;;  %v5329_v33 = vld [vmem:[#allocation7 + $0x44] ss:$24 sps:$4 sm:$0xff]   ;;  %v5327_v34 = vld [vmem:[#allocation7 + $0x40] ss:$24 sps:$4 sm:$0xff]  }
 0x12f   :  { %2109 = vmatprep.subr.bf16.mxu1 %v5251_v35  ;;  %v5332_v35 = vld [vmem:[#allocation7 + $0x74] ss:$24 sps:$4 sm:$0xff]  }
 0x131   :  { %1987 = vmatpush1.bf16.msra.mxu0 %v5246_v36  ;;  %v5330_v36 = vld [vmem:[#allocation7 + $0x70] ss:$24 sps:$4 sm:$0xff]  }
 0x132   :  { %2110 = vmatpush1.bf16.msra.mxu1 %v5249_v37  ;;  %1988 = vmatprep.subr.bf16.mxu0 %v5254_v38  ;;  %v5335_v37 = vld [vmem:[#allocation7 + $0xa4] ss:$24 sps:$4 sm:$0xff]   ;;  %v5333_v38 = vld [vmem:[#allocation7 + $0xa0] ss:$24 sps:$4 sm:$0xff]  }
 0x133   :  { %2111 = vmatprep.subr.bf16.mxu1 %v5257_v39  ;;  %v5338_v39 = vld [vmem:[#allocation7 + $0xd4] ss:$24 sps:$4 sm:$0xff]  }
 0x135   :  { %1989 = vmatpush1.bf16.msra.mxu0 %v5252_v40  ;;  %v5336_v40 = vld [vmem:[#allocation7 + $0xd0] ss:$24 sps:$4 sm:$0xff]  }
 0x136   :  { %2112 = vmatpush1.bf16.msra.mxu1 %v5255_v42  ;;  %1990 = vmatprep.subr.bf16.mxu0 %v5260_v43  ;;  %v5341_v42 = vld [vmem:[#allocation7 + $0x104] ss:$24 sps:$4 sm:$0xff]   ;;  %v5339_v43 = vld [vmem:[#allocation7 + $0x100] ss:$24 sps:$4 sm:$0xff]  }
 0x137   :  { %2113 = vmatprep.subr.bf16.mxu1 %v5263_v44  ;;  %v5344_v44 = vld [vmem:[#allocation7 + $0x134] ss:$24 sps:$4 sm:$0xff]  }
 0x139   :  { %1991 = vmatpush1.bf16.msra.mxu0 %v5258_v45  ;;  %v5342_v45 = vld [vmem:[#allocation7 + $0x130] ss:$24 sps:$4 sm:$0xff]  }
 0x13a   :  { %2114 = vmatpush1.bf16.msra.mxu1 %v5261_v46  ;;  %1992 = vmatprep.subr.bf16.mxu0 %v5266_v47  ;;  %v5443_v46 = vld [vmem:[#allocation8 + $0x4] ss:$16 sps:$4 sm:$0xff]   ;;  %v5441_v47 = vld [vmem:[#allocation8] ss:$16 sps:$4 sm:$0xff]  }
 0x13b   :  { %2115 = vmatprep.subr.bf16.mxu1 %v5269_v48  ;;  %v5345_v48 = vld [vmem:[#allocation7 + $0x160] ss:$24 sps:$4 sm:$0xff]  }
 0x13d   :  { %1993 = vmatpush1.bf16.msra.mxu0 %v5264_v49  ;;  %v5350_v49 = vld [vmem:[#allocation7 + $0x194] ss:$24 sps:$4 sm:$0xff]  }
 0x13e   :  { %2116 = vmatpush1.bf16.msra.mxu1 %v5267_v50  ;;  %1994 = vmatprep.subr.bf16.mxu0 %v5272_v51  ;;  %v5449_v50 = vld [vmem:[#allocation8 + $0x24] ss:$16 sps:$4 sm:$0xff]   ;;  %v5447_v51 = vld [vmem:[#allocation8 + $0x20] ss:$16 sps:$4 sm:$0xff]  }
 0x13f   :  { %2117 = vmatprep.subr.bf16.mxu1 %v5275_v52  ;;  %v5348_v52 = vld [vmem:[#allocation7 + $0x190] ss:$24 sps:$4 sm:$0xff]  }
 0x141   :  { %1995 = vmatpush1.bf16.msra.mxu0 %v5270_v54  ;;  %v5353_v54 = vld [vmem:[#allocation7 + $0x1c4] ss:$24 sps:$4 sm:$0xff]  }
 0x142   :  { %2118 = vmatpush1.bf16.msra.mxu1 %v5273_v55  ;;  %1996 = vmatprep.subr.bf16.mxu0 %v5278_v56  ;;  %v5455_v55 = vld [vmem:[#allocation8 + $0x44] ss:$16 sps:$4 sm:$0xff]   ;;  %v5453_v56 = vld [vmem:[#allocation8 + $0x40] ss:$16 sps:$4 sm:$0xff]  }
 0x143   :  { %2119 = vmatprep.subr.bf16.mxu1 %v5281_v57  ;;  %v5351_v57 = vld [vmem:[#allocation7 + $0x1c0] ss:$24 sps:$4 sm:$0xff]  }
 0x145   :  { %1997 = vmatpush1.bf16.msra.mxu0 %v5276_v58  ;;  %v5356_v58 = vld [vmem:[#allocation7 + $0x1f4] ss:$24 sps:$4 sm:$0xff]  }
 0x146   :  { %2120 = vmatpush1.bf16.msra.mxu1 %v5279_v59  ;;  %1998 = vmatprep.subr.bf16.mxu0 %v5284_v60  ;;  %v5461_v59 = vld [vmem:[#allocation8 + $0x64] ss:$16 sps:$4 sm:$0xff]   ;;  %v5459_v60 = vld [vmem:[#allocation8 + $0x60] ss:$16 sps:$4 sm:$0xff]  }
 0x147   :  { %2121 = vmatprep.subr.bf16.mxu1 %v5287_v61  ;;  %v5354_v61 = vld [vmem:[#allocation7 + $0x1f0] ss:$24 sps:$4 sm:$0xff]  }
 0x149   :  { %1999 = vmatpush1.bf16.msra.mxu0 %v5282_v62  ;;  %v5359_v62 = vld [vmem:[#allocation7 + $0x224] ss:$24 sps:$4 sm:$0xff]  }
 0x14a   :  { %2122 = vmatpush1.bf16.msra.mxu1 %v5285_v63  ;;  %2000 = vmatprep.subr.bf16.mxu0 %v5290_v0  ;;  %v5467_v63 = vld [vmem:[#allocation8 + $0x84] ss:$16 sps:$4 sm:$0xff]   ;;  %v5465_v0 = vld [vmem:[#allocation8 + $0x80] ss:$16 sps:$4 sm:$0xff]  }
 0x14b   :  { %2123 = vmatprep.subr.bf16.mxu1 %v5293_v1  ;;  %v5357_v1 = vld [vmem:[#allocation7 + $0x220] ss:$24 sps:$4 sm:$0xff]  }
 0x14d   :  { %2001 = vmatpush1.bf16.msra.mxu0 %v5288_v2  ;;  %v5362_v2 = vld [vmem:[#allocation7 + $0x254] ss:$24 sps:$4 sm:$0xff]  }
 0x14e   :  { %2124 = vmatpush1.bf16.msra.mxu1 %v5291_v3  ;;  %2002 = vmatprep.subr.bf16.mxu0 %v5296_v4  ;;  %v5473_v3 = vld [vmem:[#allocation8 + $0xa4] ss:$16 sps:$4 sm:$0xff]   ;;  %v5471_v4 = vld [vmem:[#allocation8 + $0xa0] ss:$16 sps:$4 sm:$0xff]  }
 0x14f   :  { %2125 = vmatprep.subr.bf16.mxu1 %v5299_v5  ;;  %v5360_v5 = vld [vmem:[#allocation7 + $0x250] ss:$24 sps:$4 sm:$0xff]  }
 0x151   :  { %2003 = vmatpush1.bf16.msra.mxu0 %v5294_v6  ;;  %v5365_v6 = vld [vmem:[#allocation7 + $0x284] ss:$24 sps:$4 sm:$0xff]  }
 0x152   :  { %2126 = vmatpush1.bf16.msra.mxu1 %v5297_v7  ;;  %2004 = vmatprep.subr.bf16.mxu0 %v5302_v8  ;;  %v5479_v7 = vld [vmem:[#allocation8 + $0xc4] ss:$16 sps:$4 sm:$0xff]   ;;  %v5477_v8 = vld [vmem:[#allocation8 + $0xc0] ss:$16 sps:$4 sm:$0xff]  }
 0x153   :  { %2127 = vmatprep.subr.bf16.mxu1 %v5305_v9  ;;  %v5363_v9 = vld [vmem:[#allocation7 + $0x280] ss:$24 sps:$4 sm:$0xff]  }
 0x155   :  { %2005 = vmatpush1.bf16.msra.mxu0 %v5300_v10  ;;  %v5368_v10 = vld [vmem:[#allocation7 + $0x2b4] ss:$24 sps:$4 sm:$0xff]  }
 0x156   :  { %2128 = vmatpush1.bf16.msra.mxu1 %v5303_v12  ;;  %2006 = vmatprep.subr.bf16.mxu0 %v5308_v13  ;;  %v5485_v12 = vld [vmem:[#allocation8 + $0xe4] ss:$16 sps:$4 sm:$0xff]   ;;  %v5483_v13 = vld [vmem:[#allocation8 + $0xe0] ss:$16 sps:$4 sm:$0xff]  }
 0x157   :  { %2129 = vmatprep.subr.bf16.mxu1 %v5311_v14  ;;  %v5366_v14 = vld [vmem:[#allocation7 + $0x2b0] ss:$24 sps:$4 sm:$0xff]  }
 0x159   :  { %2007 = vmatpush1.bf16.msra.mxu0 %v5306_v15  ;;  %v5371_v15 = vld [vmem:[#allocation7 + $0x2e4] ss:$24 sps:$4 sm:$0xff]  }
 0x15a   :  { %2130 = vmatpush1.bf16.msra.mxu1 %v5309_v16  ;;  %2008 = vmatprep.subr.bf16.mxu0 %v5314_v17  ;;  %v5491_v16 = vld [vmem:[#allocation8 + $0x104] ss:$16 sps:$4 sm:$0xff]   ;;  %v5489_v17 = vld [vmem:[#allocation8 + $0x100] ss:$16 sps:$4 sm:$0xff]  }
 0x15b   :  { %2131 = vmatprep.subr.bf16.mxu1 %v5317_v18  ;;  %v5369_v18 = vld [vmem:[#allocation7 + $0x2e0] ss:$24 sps:$4 sm:$0xff]  }
 0x15d   :  { %2009 = vmatpush1.bf16.msra.mxu0 %v5312_v19  ;;  %v5374_v19 = vld [vmem:[#allocation7 + $0x314] ss:$24 sps:$4 sm:$0xff]  }
 0x15e   :  { %2132 = vmatpush1.bf16.msra.mxu1 %v5315_v20  ;;  %2010 = vmatprep.subr.bf16.mxu0 %v5320_v22  ;;  %v5372_v20 = vld [vmem:[#allocation7 + $0x310] ss:$24 sps:$4 sm:$0xff]   ;;  %v5497_v22 = vld [vmem:[#allocation8 + $0x124] ss:$16 sps:$4 sm:$0xff]  }
 0x15f   :  { %2133 = vmatprep.subr.bf16.mxu1 %v5323_v23  ;;  %v5495_v23 = vld [vmem:[#allocation8 + $0x120] ss:$16 sps:$4 sm:$0xff]  }
 0x161   :  { %2011 = vmatpush1.bf16.msra.mxu0 %v5318_v26  ;;  %v5501_v26 = vld [vmem:[#allocation8 + $0x140] ss:$16 sps:$4 sm:$0xff]  }
 0x162   :  { %2134 = vmatpush1.bf16.msra.mxu1 %v5321_v28  ;;  %2144 = vmatprep.subr.bf16.mxu0 %v5326_v29  ;;  %v5380_v28 = vld [vmem:[#allocation7 + $0x374] ss:$24 sps:$4 sm:$0xff]   ;;  %v5507_v29 = vld [vmem:[#allocation8 + $0x160] ss:$16 sps:$4 sm:$0xff]  }
 0x163   :  { %3453 = vmatprep.subr.bf16.mxu1 %v5443_v46  ;;  %v5533_v46 = vld [vmem:[#allocation8 + $0x1e4] ss:$16 sps:$4 sm:$0xff]  }
 0x164   :  { %2013 = vmatmul.mubr.bf16.vlgmr.msra.gmra.mrb[0].mxu0 %v6310_v30 }
 0x165   :  { %2136 = vmatmul.mubr.bf16.vlgmr.msra.gmra.mrb[0].mxu1 %v6310_v30  ;;  %2145 = vmatpush1.bf16.msra.mxu0 %v5324_v32  ;;  %v5509_v32 = vld [vmem:[#allocation8 + $0x164] ss:$16 sps:$4 sm:$0xff]  }
 0x166   :  { %2176 = vmatprep.mubr.bf16.mxu0 %v6290_v53  ;;  %2146 = vmatprep.subr.bf16.mxu0 %v5329_v33  ;;  %v5347_v53 = vld [vmem:[#allocation7 + $0x164] ss:$24 sps:$4 sm:$0xff]   ;;  %v5378_v33 = vld [vmem:[#allocation7 + $0x370] ss:$24 sps:$4 sm:$0xff]  }
 0x167   :  { %3454 = vmatpush1.bf16.msra.mxu1 %v5441_v47  ;;  %v5531_v47 = vld [vmem:[#allocation8 + $0x1e0] ss:$16 sps:$4 sm:$0xff]  }
 0x168   :  { %3455 = vmatprep.subr.bf16.mxu1 %v5449_v50  ;;  %v5539_v50 = vld [vmem:[#allocation8 + $0x204] ss:$16 sps:$4 sm:$0xff]  }
 0x169   :  { %2147 = vmatpush1.bf16.msra.mxu0 %v5327_v34  ;;  %v5383_v34 = vld [vmem:[#allocation7 + $0x3a4] ss:$24 sps:$4 sm:$0xff]  }
 0x16a   :  { %2148 = vmatprep.subr.bf16.mxu0 %v5332_v35  ;;  %v5513_v35 = vld [vmem:[#allocation8 + $0x180] ss:$16 sps:$4 sm:$0xff]  }
 0x16b   :  { %3456 = vmatpush1.bf16.msra.mxu1 %v5447_v51  ;;  %v5398_v51 = vld [vmem:[#allocation7 + $0x494] ss:$24 sps:$4 sm:$0xff]  }
 0x16c   :  { %3457 = vmatprep.subr.bf16.mxu1 %v5455_v55  ;;  %v5399_v55 = vld [vmem:[#allocation7 + $0x4c0] ss:$24 sps:$4 sm:$0xff]  }
 0x16d   :  { %2149 = vmatpush1.bf16.msra.mxu0 %v5330_v36  ;;  %v5515_v36 = vld [vmem:[#allocation8 + $0x184] ss:$16 sps:$4 sm:$0xff]  }
 0x16e   :  { %2150 = vmatprep.subr.bf16.mxu0 %v5335_v37  ;;  %v5386_v37 = vld [vmem:[#allocation7 + $0x3d4] ss:$24 sps:$4 sm:$0xff]  }
 0x16f   :  { %3458 = vmatpush1.bf16.msra.mxu1 %v5453_v56  ;;  %v5404_v56 = vld [vmem:[#allocation7 + $0x4f4] ss:$24 sps:$4 sm:$0xff]  }
 0x170   :  { %3459 = vmatprep.subr.bf16.mxu1 %v5461_v59  ;;  %v5405_v59 = vld [vmem:[#allocation7 + $0x520] ss:$24 sps:$4 sm:$0xff]  }
 0x171   :  { %2151 = vmatpush1.bf16.msra.mxu0 %v5333_v38  ;;  %v5519_v38 = vld [vmem:[#allocation8 + $0x1a0] ss:$16 sps:$4 sm:$0xff]  }
 0x172   :  { %2152 = vmatprep.subr.bf16.mxu0 %v5338_v39  ;;  %v5384_v39 = vld [vmem:[#allocation7 + $0x3d0] ss:$24 sps:$4 sm:$0xff]  }
 0x173   :  { %3460 = vmatpush1.bf16.msra.mxu1 %v5459_v60  ;;  %v5410_v60 = vld [vmem:[#allocation7 + $0x554] ss:$24 sps:$4 sm:$0xff]  }
 0x174   :  { %3461 = vmatprep.subr.bf16.mxu1 %v5467_v63  ;;  %v5411_v63 = vld [vmem:[#allocation7 + $0x580] ss:$24 sps:$4 sm:$0xff]  }
 0x175   :  { %2153 = vmatpush1.bf16.msra.mxu0 %v5336_v40  ;;  %v5389_v40 = vld [vmem:[#allocation7 + $0x404] ss:$24 sps:$4 sm:$0xff]  }
 0x176   :  { %2154 = vmatprep.subr.bf16.mxu0 %v5341_v42  ;;  %v5525_v42 = vld [vmem:[#allocation8 + $0x1c0] ss:$16 sps:$4 sm:$0xff]  }
 0x177   :  { %3462 = vmatpush1.bf16.msra.mxu1 %v5465_v0  ;;  %v5416_v0 = vld [vmem:[#allocation7 + $0x5b4] ss:$24 sps:$4 sm:$0xff]  }
 0x178   :  { %3463 = vmatprep.subr.bf16.mxu1 %v5473_v3  ;;  %v5417_v3 = vld [vmem:[#allocation7 + $0x5e0] ss:$24 sps:$4 sm:$0xff]  }
 0x179   :  { %2155 = vmatpush1.bf16.msra.mxu0 %v5339_v43  ;;  %v5527_v43 = vld [vmem:[#allocation8 + $0x1c4] ss:$16 sps:$4 sm:$0xff]  }
 0x17a   :  { %2156 = vmatprep.subr.bf16.mxu0 %v5344_v44  ;;  %v5387_v44 = vld [vmem:[#allocation7 + $0x400] ss:$24 sps:$4 sm:$0xff]  }
 0x17b   :  { %3464 = vmatpush1.bf16.msra.mxu1 %v5471_v4  ;;  %v5422_v4 = vld [vmem:[#allocation7 + $0x614] ss:$24 sps:$4 sm:$0xff]  }
 0x17c   :  { %3465 = vmatprep.subr.bf16.mxu1 %v5479_v7  ;;  %v5423_v7 = vld [vmem:[#allocation7 + $0x640] ss:$24 sps:$4 sm:$0xff]  }
 0x17d   :  { %2157 = vmatpush1.bf16.msra.mxu0 %v5342_v45  ;;  %v5392_v45 = vld [vmem:[#allocation7 + $0x434] ss:$24 sps:$4 sm:$0xff]  }
 0x17e   :  { %2158 = vmatprep.subr.bf16.mxu0 %v5347_v53  ;;  %v5390_v53 = vld [vmem:[#allocation7 + $0x430] ss:$24 sps:$4 sm:$0xff]  }
 0x17f   :  { %3466 = vmatpush1.bf16.msra.mxu1 %v5477_v8  ;;  %v5428_v8 = vld [vmem:[#allocation7 + $0x674] ss:$24 sps:$4 sm:$0xff]  }
 0x180   :  { %3467 = vmatprep.subr.bf16.mxu1 %v5485_v12  ;;  %v5429_v12 = vld [vmem:[#allocation7 + $0x6a0] ss:$24 sps:$4 sm:$0xff]  }
 0x181   :  { %2159 = vmatpush1.bf16.msra.mxu0 %v5345_v48  ;;  %v5395_v48 = vld [vmem:[#allocation7 + $0x464] ss:$24 sps:$4 sm:$0xff]  }
 0x182   :  { %2160 = vmatprep.subr.bf16.mxu0 %v5350_v49  ;;  %v5393_v49 = vld [vmem:[#allocation7 + $0x460] ss:$24 sps:$4 sm:$0xff]  }
 0x183   :  { %3468 = vmatpush1.bf16.msra.mxu1 %v5483_v13  ;;  %v5434_v13 = vld [vmem:[#allocation7 + $0x6d4] ss:$24 sps:$4 sm:$0xff]  }
 0x184   :  { %3469 = vmatprep.subr.bf16.mxu1 %v5491_v16  ;;  %v5440_v16 = vld [vmem:[#allocation7 + $0x734] ss:$24 sps:$4 sm:$0xff]  }
 0x185   :  { %2161 = vmatpush1.bf16.msra.mxu0 %v5348_v52  ;;  %v5396_v52 = vld [vmem:[#allocation7 + $0x490] ss:$24 sps:$4 sm:$0xff]  }
 0x186   :  { %2162 = vmatprep.subr.bf16.mxu0 %v5353_v54  ;;  %v5401_v54 = vld [vmem:[#allocation7 + $0x4c4] ss:$24 sps:$4 sm:$0xff]  }
 0x187   :  { %3470 = vmatpush1.bf16.msra.mxu1 %v5489_v17  ;;  %v5446_v17 = vld [vmem:[#allocation7 + $0x764] ss:$24 sps:$4 sm:$0xff]  }
 0x188   :  { %3471 = vmatprep.subr.bf16.mxu1 %v5497_v22  ;;  %v5458_v22 = vld [vmem:[#allocation7 + $0x7c4] ss:$24 sps:$4 sm:$0xff]  }
 0x189   :  { %2163 = vmatpush1.bf16.msra.mxu0 %v5351_v57  ;;  %v5402_v57 = vld [vmem:[#allocation7 + $0x4f0] ss:$24 sps:$4 sm:$0xff]  }
 0x18a   :  { %2164 = vmatprep.subr.bf16.mxu0 %v5356_v58  ;;  %v5407_v58 = vld [vmem:[#allocation7 + $0x524] ss:$24 sps:$4 sm:$0xff]  }
 0x18b   :  { %3472 = vmatpush1.bf16.msra.mxu1 %v5495_v23  ;;  %v5456_v23 = vld [vmem:[#allocation7 + $0x7c0] ss:$24 sps:$4 sm:$0xff]  }
 0x18c   :  { %3473 = vmatprep.subr.bf16.mxu1 %v5503_v25  ;;  %v5462_v25 = vld [vmem:[#allocation7 + $0x7f0] ss:$24 sps:$4 sm:$0xff]  }
 0x18d   :  { %2165 = vmatpush1.bf16.msra.mxu0 %v5354_v61  ;;  %v5408_v61 = vld [vmem:[#allocation7 + $0x550] ss:$24 sps:$4 sm:$0xff]  }
 0x18e   :  { %2166 = vmatprep.subr.bf16.mxu0 %v5359_v62  ;;  %v5413_v62 = vld [vmem:[#allocation7 + $0x584] ss:$24 sps:$4 sm:$0xff]  }
 0x18f   :  { %3474 = vmatpush1.bf16.msra.mxu1 %v5501_v26  ;;  %v5470_v26 = vld [vmem:[#allocation7 + $0x824] ss:$24 sps:$4 sm:$0xff]  }
 0x190   :  { %3475 = vmatprep.subr.bf16.mxu1 %v5509_v32  ;;  %v5482_v32 = vld [vmem:[#allocation7 + $0x884] ss:$24 sps:$4 sm:$0xff]  }
 0x191   :  { %2167 = vmatpush1.bf16.msra.mxu0 %v5357_v1  ;;  %v5414_v1 = vld [vmem:[#allocation7 + $0x5b0] ss:$24 sps:$4 sm:$0xff]  }
 0x192   :  { %2168 = vmatprep.subr.bf16.mxu0 %v5362_v2  ;;  %v5419_v2 = vld [vmem:[#allocation7 + $0x5e4] ss:$24 sps:$4 sm:$0xff]  }
 0x193   :  { %3476 = vmatpush1.bf16.msra.mxu1 %v5507_v29  ;;  %v5474_v29 = vld [vmem:[#allocation7 + $0x850] ss:$24 sps:$4 sm:$0xff]  }
 0x194   :  { %3477 = vmatprep.subr.bf16.mxu1 %v5515_v36  ;;  %v5494_v36 = vld [vmem:[#allocation7 + $0x8e4] ss:$24 sps:$4 sm:$0xff]  }
 0x195   :  { %2169 = vmatpush1.bf16.msra.mxu0 %v5360_v5  ;;  %v5420_v5 = vld [vmem:[#allocation7 + $0x610] ss:$24 sps:$4 sm:$0xff]  }
 0x196   :  { %2170 = vmatprep.subr.bf16.mxu0 %v5365_v6  ;;  %v5425_v6 = vld [vmem:[#allocation7 + $0x644] ss:$24 sps:$4 sm:$0xff]  }
 0x197   :  { %3478 = vmatpush1.bf16.msra.mxu1 %v5513_v35  ;;  %v5486_v35 = vld [vmem:[#allocation7 + $0x8b0] ss:$24 sps:$4 sm:$0xff]  }
 0x199   :  { %2171 = vmatpush1.bf16.msra.mxu0 %v5363_v9  ;;  %v5426_v9 = vld [vmem:[#allocation7 + $0x670] ss:$24 sps:$4 sm:$0xff]  }
 0x19a   :  { %2172 = vmatprep.subr.bf16.mxu0 %v5368_v10  ;;  %v5431_v10 = vld [vmem:[#allocation7 + $0x6a4] ss:$24 sps:$4 sm:$0xff]  }
 0x19d   :  { %2173 = vmatpush1.bf16.msra.mxu0 %v5366_v14  ;;  %v5432_v14 = vld [vmem:[#allocation7 + $0x6d0] ss:$24 sps:$4 sm:$0xff]  }
 0x19e   :  { %2174 = vmatprep.subr.bf16.mxu0 %v5371_v15  ;;  %v5437_v15 = vld [vmem:[#allocation7 + $0x704] ss:$24 sps:$4 sm:$0xff]  }
 0x1a1   :  { %2175 = vmatpush1.bf16.msra.mxu0 %v5369_v18  ;;  %v5444_v18 = vld [vmem:[#allocation7 + $0x760] ss:$24 sps:$4 sm:$0xff]  }
 0x1a2   :  { %2185 = vmatprep.subr.bf16.mxu0 %v5374_v19  ;;  %v5452_v19 = vld [vmem:[#allocation7 + $0x794] ss:$24 sps:$4 sm:$0xff]  }
 0x1a4   :  { %2177 = vmatmul.mubr.bf16.vlgmr.msra.gmra.mrb[4].mxu0 %v6294_v11  ;;  %v5381_v11 = vld [vmem:[#allocation7 + $0x3a0] ss:$24 sps:$4 sm:$0xff]  }
 0x1a5   :  { %2186 = vmatpush1.bf16.msra.mxu0 %v5372_v20  ;;  %2217 = vmatprep.mubr.bf16.mxu0 %v6298_v41  ;;  %v5521_v41 = vld [vmem:[#allocation8 + $0x1a4] ss:$16 sps:$4 sm:$0xff]   ;;  %v5450_v20 = vld [vmem:[#allocation7 + $0x790] ss:$24 sps:$4 sm:$0xff]  }
 0x1a6   :  { %2187 = vmatprep.subr.bf16.mxu0 %v5377_v24  ;;  %3479 = vmatprep.subr.bf16.mxu1 %v5521_v41  ;;  %v5464_v24 = vld [vmem:[#allocation7 + $0x7f4] ss:$24 sps:$4 sm:$0xff]  }
 0x1a7   :  { %3480 = vmatpush1.bf16.msra.mxu1 %v5519_v38  ;;  %v5498_v38 = vld [vmem:[#allocation8 + $0x8] ss:$16 sps:$4 sm:$0xff]   ;;  %v5506_v41 = vld [vmem:[#allocation8 + $0x2c] ss:$16 sps:$4 sm:$0xff]  }
 0x1a8   :  { %3481 = vmatprep.subr.bf16.mxu1 %v5527_v43  ;;  %v5518_v43 = vld [vmem:[#allocation8 + $0x6c] ss:$16 sps:$4 sm:$0xff]  }
 0x1a9   :  { %2188 = vmatpush1.bf16.msra.mxu0 %v5375_v27  ;;  %v5468_v27 = vld [vmem:[#allocation7 + $0x820] ss:$24 sps:$4 sm:$0xff]  }
 0x1aa   :  { %2189 = vmatprep.subr.bf16.mxu0 %v5380_v28  ;;  %v5476_v28 = vld [vmem:[#allocation7 + $0x854] ss:$24 sps:$4 sm:$0xff]  }
 0x1ab   :  { %3482 = vmatpush1.bf16.msra.mxu1 %v5525_v42  ;;  %v5510_v42 = vld [vmem:[#allocation8 + $0x48] ss:$16 sps:$4 sm:$0xff]  }
 0x1ac   :  { %3483 = vmatprep.subr.bf16.mxu1 %v5533_v46  ;;  %v5530_v46 = vld [vmem:[#allocation8 + $0xac] ss:$16 sps:$4 sm:$0xff]  }
 0x1ad   :  { %2190 = vmatpush1.bf16.msra.mxu0 %v5378_v33  ;;  %v5480_v33 = vld [vmem:[#allocation7 + $0x880] ss:$24 sps:$4 sm:$0xff]  }
 0x1ae   :  { %2191 = vmatprep.subr.bf16.mxu0 %v5383_v34  ;;  %v5488_v34 = vld [vmem:[#allocation7 + $0x8b4] ss:$24 sps:$4 sm:$0xff]  }
 0x1af   :  { %3484 = vmatpush1.bf16.msra.mxu1 %v5531_v47  ;;  %v5528_v47 = vld [vmem:[#allocation8 + $0xa8] ss:$16 sps:$4 sm:$0xff]  }
 0x1b0   :  { %3494 = vmatprep.subr.bf16.mxu1 %v5539_v50 }
 0x1b1   :  { %2192 = vmatpush1.bf16.msra.mxu0 %v5381_v11  ;;  %v5492_v11 = vld [vmem:[#allocation7 + $0x8e0] ss:$24 sps:$4 sm:$0xff]  }
 0x1b2   :  { %2193 = vmatprep.subr.bf16.mxu0 %v5386_v37  ;;  %v5500_v37 = vld [vmem:[#allocation8 + $0xc] ss:$16 sps:$4 sm:$0xff]  }
 0x1b5   :  { %2194 = vmatpush1.bf16.msra.mxu0 %v5384_v39  ;;  %v5504_v39 = vld [vmem:[#allocation8 + $0x28] ss:$16 sps:$4 sm:$0xff]  }
 0x1b6   :  { %2195 = vmatprep.subr.bf16.mxu0 %v5389_v40  ;;  %v5512_v40 = vld [vmem:[#allocation8 + $0x4c] ss:$16 sps:$4 sm:$0xff]  }
 0x1b9   :  { %2196 = vmatpush1.bf16.msra.mxu0 %v5387_v44  ;;  %v5516_v44 = vld [vmem:[#allocation8 + $0x68] ss:$16 sps:$4 sm:$0xff]  }
 0x1ba   :  { %2197 = vmatprep.subr.bf16.mxu0 %v5392_v45  ;;  %v5524_v45 = vld [vmem:[#allocation8 + $0x8c] ss:$16 sps:$4 sm:$0xff]  }
 0x1bd   :  { %2198 = vmatpush1.bf16.msra.mxu0 %v5390_v53  ;;  %v5522_v53 = vld [vmem:[#allocation8 + $0x88] ss:$16 sps:$4 sm:$0xff]  }
 0x1be   :  { %2199 = vmatprep.subr.bf16.mxu0 %v5395_v48 }
 0x1c1   :  { %2200 = vmatpush1.bf16.msra.mxu0 %v5393_v49 }
 0x1c2   :  { %2201 = vmatprep.subr.bf16.mxu0 %v5398_v51 }
 0x1c5   :  { %2202 = vmatpush1.bf16.msra.mxu0 %v5396_v52 }
 0x1c6   :  { %2203 = vmatprep.subr.bf16.mxu0 %v5401_v54 }
 0x1c9   :  { %2204 = vmatpush1.bf16.msra.mxu0 %v5399_v55 }
 0x1ca   :  { %2205 = vmatprep.subr.bf16.mxu0 %v5404_v56 }
 0x1cd   :  { %2206 = vmatpush1.bf16.msra.mxu0 %v5402_v57 }
 0x1ce   :  { %2207 = vmatprep.subr.bf16.mxu0 %v5407_v58  ;;  %v5534_v58 = vld [vmem:[#allocation8 + $0xc8] ss:$16 sps:$4 sm:$0xff]  }
 0x1d1   :  { %2208 = vmatpush1.bf16.msra.mxu0 %v5405_v59 }
 0x1d2   :  { %2209 = vmatprep.subr.bf16.mxu0 %v5410_v60 }
 0x1d5   :  { %2210 = vmatpush1.bf16.msra.mxu0 %v5408_v61 }
 0x1d6   :  { %2211 = vmatprep.subr.bf16.mxu0 %v5413_v62 }
 0x1d9   :  { %2212 = vmatpush1.bf16.msra.mxu0 %v5411_v63  ;;  %v5537_v63 = vld [vmem:[#allocation8 + $0x200] ss:$16 sps:$4 sm:$0xff]  }
 0x1da   :  { %2213 = vmatprep.subr.bf16.mxu0 %v5416_v0 }
 0x1dd   :  { %2214 = vmatpush1.bf16.msra.mxu0 %v5414_v1  ;;  %v5542_v1 = vld [vmem:[#allocation8 + $0xec] ss:$16 sps:$4 sm:$0xff]  }
 0x1de   :  { %2215 = vmatprep.subr.bf16.mxu0 %v5419_v2  ;;  %v5545_v2 = vld [vmem:[#allocation8 + $0x224] ss:$16 sps:$4 sm:$0xff]  }
 0x1e1   :  { %2216 = vmatpush1.bf16.msra.mxu0 %v5417_v3  ;;  %v5540_v3 = vld [vmem:[#allocation8 + $0xe8] ss:$16 sps:$4 sm:$0xff]  }
 0x1e2   :  { %2226 = vmatprep.subr.bf16.mxu0 %v5422_v4  ;;  %v5548_v4 = vld [vmem:[#allocation8 + $0x10c] ss:$16 sps:$4 sm:$0xff]  }
 0x1e4   :  { %2218 = vmatmul.mubr.bf16.vlgmr.msra.gmra.mrb[4].mxu0 %v6302_v21  ;;  %v5435_v21 = vld [vmem:[#allocation7 + $0x700] ss:$24 sps:$4 sm:$0xff]  }
 0x1e5   :  { %2227 = vmatpush1.bf16.msra.mxu0 %v5420_v5  ;;  %2258 = vmatprep.mubr.bf16.mxu0 %v6306_v31  ;;  %v5438_v31 = vld [vmem:[#allocation7 + $0x730] ss:$24 sps:$4 sm:$0xff]  }
 0x1e6   :  { %2228 = vmatprep.subr.bf16.mxu0 %v5425_v6  ;;  %v5543_v5 = vld [vmem:[#allocation8 + $0x220] ss:$16 sps:$4 sm:$0xff]   ;;  %v5551_v6 = vld [vmem:[#allocation8 + $0x244] ss:$16 sps:$4 sm:$0xff]  }
 0x1e9   :  { %2229 = vmatpush1.bf16.msra.mxu0 %v5423_v7  ;;  %v5546_v7 = vld [vmem:[#allocation8 + $0x108] ss:$16 sps:$4 sm:$0xff]  }
 0x1ea   :  { %2230 = vmatprep.subr.bf16.mxu0 %v5428_v8  ;;  %v5554_v8 = vld [vmem:[#allocation8 + $0x12c] ss:$16 sps:$4 sm:$0xff]  }
 0x1ed   :  { %2231 = vmatpush1.bf16.msra.mxu0 %v5426_v9  ;;  %v5549_v9 = vld [vmem:[#allocation8 + $0x240] ss:$16 sps:$4 sm:$0xff]  }
 0x1ee   :  { %2232 = vmatprep.subr.bf16.mxu0 %v5431_v10  ;;  %v5557_v10 = vld [vmem:[#allocation8 + $0x264] ss:$16 sps:$4 sm:$0xff]  }
 0x1f1   :  { %2233 = vmatpush1.bf16.msra.mxu0 %v5429_v12  ;;  %v5552_v12 = vld [vmem:[#allocation8 + $0x128] ss:$16 sps:$4 sm:$0xff]  }
 0x1f2   :  { %2234 = vmatprep.subr.bf16.mxu0 %v5434_v13  ;;  %v5560_v13 = vld [vmem:[#allocation8 + $0x14c] ss:$16 sps:$4 sm:$0xff]  }
 0x1f5   :  { %2235 = vmatpush1.bf16.msra.mxu0 %v5432_v14  ;;  %v5555_v14 = vld [vmem:[#allocation8 + $0x260] ss:$16 sps:$4 sm:$0xff]  }
 0x1f6   :  { %2236 = vmatprep.subr.bf16.mxu0 %v5437_v15  ;;  %v5563_v15 = vld [vmem:[#allocation8 + $0x284] ss:$16 sps:$4 sm:$0xff]  }
 0x1f9   :  { %2237 = vmatpush1.bf16.msra.mxu0 %v5435_v21  ;;  %v5558_v21 = vld [vmem:[#allocation8 + $0x148] ss:$16 sps:$4 sm:$0xff]  }
 0x1fa   :  { %2238 = vmatprep.subr.bf16.mxu0 %v5440_v16  ;;  %v5566_v16 = vld [vmem:[#allocation8 + $0x16c] ss:$16 sps:$4 sm:$0xff]  }
 0x1fd   :  { %2239 = vmatpush1.bf16.msra.mxu0 %v5438_v31  ;;  %v5561_v31 = vld [vmem:[#allocation8 + $0x280] ss:$16 sps:$4 sm:$0xff]  }
 0x1fe   :  { %2240 = vmatprep.subr.bf16.mxu0 %v5446_v17  ;;  %v5569_v17 = vld [vmem:[#allocation8 + $0x2a4] ss:$16 sps:$4 sm:$0xff]  }
 0x201   :  { %2241 = vmatpush1.bf16.msra.mxu0 %v5444_v18  ;;  %v5564_v18 = vld [vmem:[#allocation8 + $0x168] ss:$16 sps:$4 sm:$0xff]  }
 0x202   :  { %2242 = vmatprep.subr.bf16.mxu0 %v5452_v19  ;;  %v5572_v19 = vld [vmem:[#allocation8 + $0x18c] ss:$16 sps:$4 sm:$0xff]  }
 0x205   :  { %2243 = vmatpush1.bf16.msra.mxu0 %v5450_v20  ;;  %v5567_v20 = vld [vmem:[#allocation8 + $0x2a0] ss:$16 sps:$4 sm:$0xff]  }
 0x206   :  { %2244 = vmatprep.subr.bf16.mxu0 %v5458_v22  ;;  %v5575_v22 = vld [vmem:[#allocation8 + $0x2c4] ss:$16 sps:$4 sm:$0xff]  }
 0x209   :  { %2245 = vmatpush1.bf16.msra.mxu0 %v5456_v23  ;;  %v5570_v23 = vld [vmem:[#allocation8 + $0x188] ss:$16 sps:$4 sm:$0xff]  }
 0x20a   :  { %2246 = vmatprep.subr.bf16.mxu0 %v5464_v24  ;;  %v5578_v24 = vld [vmem:[#allocation8 + $0x1ac] ss:$16 sps:$4 sm:$0xff]  }
 0x20d   :  { %2247 = vmatpush1.bf16.msra.mxu0 %v5462_v25  ;;  %v5573_v25 = vld [vmem:[#allocation8 + $0x2c0] ss:$16 sps:$4 sm:$0xff]  }
 0x20e   :  { %2248 = vmatprep.subr.bf16.mxu0 %v5470_v26  ;;  %v5581_v26 = vld [vmem:[#allocation8 + $0x2e4] ss:$16 sps:$4 sm:$0xff]  }
 0x211   :  { %2249 = vmatpush1.bf16.msra.mxu0 %v5468_v27  ;;  %v5576_v27 = vld [vmem:[#allocation8 + $0x1a8] ss:$16 sps:$4 sm:$0xff]  }
 0x212   :  { %2250 = vmatprep.subr.bf16.mxu0 %v5476_v28  ;;  %v5584_v28 = vld [vmem:[#allocation8 + $0x1cc] ss:$16 sps:$4 sm:$0xff]  }
 0x215   :  { %2251 = vmatpush1.bf16.msra.mxu0 %v5474_v29  ;;  %v5579_v29 = vld [vmem:[#allocation8 + $0x2e0] ss:$16 sps:$4 sm:$0xff]  }
 0x216   :  { %2252 = vmatprep.subr.bf16.mxu0 %v5482_v32  ;;  %v5587_v32 = vld [vmem:[#allocation8 + $0x304] ss:$16 sps:$4 sm:$0xff]  }
 0x219   :  { %2253 = vmatpush1.bf16.msra.mxu0 %v5480_v33  ;;  %v5582_v33 = vld [vmem:[#allocation8 + $0x1c8] ss:$16 sps:$4 sm:$0xff]  }
 0x21a   :  { %2254 = vmatprep.subr.bf16.mxu0 %v5488_v34  ;;  %v5590_v34 = vld [vmem:[#allocation8 + $0x1ec] ss:$16 sps:$4 sm:$0xff]  }
 0x21d   :  { %2255 = vmatpush1.bf16.msra.mxu0 %v5486_v35  ;;  %v5585_v35 = vld [vmem:[#allocation8 + $0x300] ss:$16 sps:$4 sm:$0xff]  }
 0x21e   :  { %2256 = vmatprep.subr.bf16.mxu0 %v5494_v36  ;;  %v5593_v36 = vld [vmem:[#allocation8 + $0x324] ss:$16 sps:$4 sm:$0xff]  }
 0x221   :  { %2257 = vmatpush1.bf16.msra.mxu0 %v5492_v11  ;;  %v5588_v11 = vld [vmem:[#allocation8 + $0x1e8] ss:$16 sps:$4 sm:$0xff]  }
 0x222   :  { %3576 = vmatprep.subr.bf16.mxu0 %v5500_v37  ;;  %v5596_v37 = vld [vmem:[#allocation8 + $0x20c] ss:$16 sps:$4 sm:$0xff]  }
 0x224   :  { %2259 = vmatmul.mubr.bf16.vlgmr.msra.gmra.mrb[4].mxu0 %v6310_v30  ;;  %v5536_v30 = vld [vmem:[#allocation8 + $0xcc] ss:$16 sps:$4 sm:$0xff]  }
 0x225   :  { %3577 = vmatpush1.bf16.msra.mxu0 %v5498_v38  ;;  %v5591_v38 = vld [vmem:[#allocation8 + $0x320] ss:$16 sps:$4 sm:$0xff]  }
 0x226   :  { %3578 = vmatprep.subr.bf16.mxu0 %v5506_v41  ;;  %v5599_v41 = vld [vmem:[#allocation8 + $0x344] ss:$16 sps:$4 sm:$0xff]  }
 0x229   :  { %3579 = vmatpush1.bf16.msra.mxu0 %v5504_v39  ;;  %v5594_v39 = vld [vmem:[#allocation8 + $0x208] ss:$16 sps:$4 sm:$0xff]  }
 0x22a   :  { %3580 = vmatprep.subr.bf16.mxu0 %v5512_v40  ;;  %v5602_v40 = vld [vmem:[#allocation8 + $0x22c] ss:$16 sps:$4 sm:$0xff]  }
 0x22d   :  { %3581 = vmatpush1.bf16.msra.mxu0 %v5510_v42  ;;  %v5597_v42 = vld [vmem:[#allocation8 + $0x340] ss:$16 sps:$4 sm:$0xff]  }
 0x22e   :  { %3582 = vmatprep.subr.bf16.mxu0 %v5518_v43  ;;  %v5605_v43 = vld [vmem:[#allocation8 + $0x364] ss:$16 sps:$4 sm:$0xff]  }
 0x231   :  { %3583 = vmatpush1.bf16.msra.mxu0 %v5516_v44  ;;  %v5600_v44 = vld [vmem:[#allocation8 + $0x228] ss:$16 sps:$4 sm:$0xff]  }
 0x232   :  { %3584 = vmatprep.subr.bf16.mxu0 %v5524_v45  ;;  %v5608_v45 = vld [vmem:[#allocation8 + $0x24c] ss:$16 sps:$4 sm:$0xff]  }
 0x235   :  { %3585 = vmatpush1.bf16.msra.mxu0 %v5522_v53  ;;  %v5603_v53 = vld [vmem:[#allocation8 + $0x360] ss:$16 sps:$4 sm:$0xff]  }
 0x236   :  { %3586 = vmatprep.subr.bf16.mxu0 %v5530_v46  ;;  %v5611_v46 = vld [vmem:[#allocation8 + $0x384] ss:$16 sps:$4 sm:$0xff]  }
 0x237   :  { %v2014_v48 = vpop.f32.mrb[0].mxu0 }
 0x238   :  { %v6320_v49 = vpop.f32.mrb[0].mxu1  ;;  %v2267_v50 = vmax.f32 %v2014_v48, 0.0  ;;  %v2016_v51 = vpop.f32.mrb[1].mxu0  ;;  %v5609_v48 = vld [vmem:[#allocation8 + $0x380] ss:$16 sps:$4 sm:$0xff]  }
 0x239   :  { %v2139_v52 = vpop.f32.mrb[1].mxu1  ;;  %v2268_v54 = vmax.f32 %v2016_v51, 0.0  ;;  %v2018_v56 = vpop.f32.mrb[2].mxu0  ;;  %3587 = vmatpush1.bf16.msra.mxu0 %v5528_v47  ;;  %v5606_v47 = vld [vmem:[#allocation8 + $0x248] ss:$16 sps:$4 sm:$0xff]  }
 0x23a   :  { %v2270_v55 = vmax.f32 %v2139_v52, 0.0  ;;  %v2141_v57 = vpop.f32.mrb[2].mxu1  ;;  %v2019_v59 = vpop.f32.mrb[3].mxu0  ;;  %3588 = vmatprep.subr.bf16.mxu0 %v5536_v30  ;;  %v6324_v0 = vpack.c.bf16 %v2267_v50, %v2267_v50  ;;  %v5614_v30 = vld [vmem:[#allocation8 + $0x26c] ss:$16 sps:$4 sm:$0xff]  }
 0x23b   :  { %v2142_v60 = vpop.f32.mrb[3].mxu1  ;;  %v2274_v61 = vpack.c.bf16 %v2268_v54, %v2268_v54  ;;  %v5617_v50 = vld [vmem:[#allocation8 + $0x3a4] ss:$16 sps:$4 sm:$0xff]   ;;  %v5612_v51 = vld [vmem:[#allocation8 + $0x268] ss:$16 sps:$4 sm:$0xff]  }
 0x23c   :  { %v6322_v62 = vpack.c.bf16 %v2270_v55, %v2270_v55  ;;  %v5620_v52 = vld [vmem:[#allocation8 + $0x28c] ss:$16 sps:$4 sm:$0xff]   ;;  %v5615_v54 = vld [vmem:[#allocation8 + $0x3a0] ss:$16 sps:$4 sm:$0xff]   ;;  %v5623_v55 = vld [vmem:[#allocation8 + $0x3c4] ss:$16 sps:$4 sm:$0xff]  }
 0x23d   :  { %3485 = vmatprep.mubr.bf16.mxu1 %v2274_v61  ;;  %3589 = vmatpush1.bf16.msra.mxu0 %v5534_v58  ;;  %v5618_v56 = vld [vmem:[#allocation8 + $0x288] ss:$16 sps:$4 sm:$0xff]   ;;  %v5626_v57 = vld [vmem:[#allocation8 + $0x2ac] ss:$16 sps:$4 sm:$0xff]   ;;  %v5621_v58 = vld [vmem:[#allocation8 + $0x3c0] ss:$16 sps:$4 sm:$0xff]  }
 0x23e   :  { %3608 = vmatprep.mubr.bf16.mxu0 %v2274_v61  ;;  %3486 = vmatmul.mubr.bf16.vlgmr.msra.gmra.mrb[4].mxu1 %v6324_v0  ;;  %v5629_v59 = vld [vmem:[#allocation8 + $0x3e4] ss:$16 sps:$4 sm:$0xff]   ;;  %v5624_v60 = vld [vmem:[#allocation8 + $0x2a8] ss:$16 sps:$4 sm:$0xff]   ;;  %v5632_v61 = vld [vmem:[#allocation8 + $0x2cc] ss:$16 sps:$4 sm:$0xff]  }
 0x23f   :  { %3495 = vmatpush1.bf16.msra.mxu1 %v5537_v63  ;;  %3526 = vmatprep.mubr.bf16.mxu1 %v6322_v62  ;;  %v2269_v63 = vmax.f32 %v6320_v49, 0.0  ;;  %v5666_v49 = vld [vmem:[#allocation8 + $0x420] ss:$16 sps:$4 sm:$0xff]  }
 0x240   :  { %3590 = vmatprep.subr.bf16.mxu0 %v5542_v1  ;;  %3496 = vmatprep.subr.bf16.mxu1 %v5545_v2  ;;  %v5630_v1 = vld [vmem:[#allocation8 + $0x2c8] ss:$16 sps:$4 sm:$0xff]   ;;  %v5635_v2 = vld [vmem:[#allocation8 + $0x2ec] ss:$16 sps:$4 sm:$0xff]  }
 0x241   :  { %3591 = vmatpush1.bf16.msra.mxu0 %v5540_v3  ;;  %v5660_v3 = vld [vmem:[#allocation8 + $0x400] ss:$16 sps:$4 sm:$0xff]  }
 0x242   :  { %3592 = vmatprep.subr.bf16.mxu0 %v5548_v4  ;;  %v6331_v4 = vpack.c.bf16 %v2269_v63, %v2269_v63  ;;  %v5701_v63 = vld [vmem:[#allocation8 + $0x4cc] ss:$16 sps:$4 sm:$0xff]  }
 0x243   :  { %3497 = vmatpush1.bf16.msra.mxu1 %v5543_v5  ;;  %v5668_v5 = vld [vmem:[#allocation8 + $0x424] ss:$16 sps:$4 sm:$0xff]  }
 0x244   :  { %3498 = vmatprep.subr.bf16.mxu1 %v5551_v6  ;;  %v5633_v6 = vld [vmem:[#allocation8 + $0x2e8] ss:$16 sps:$4 sm:$0xff]  }
 0x245   :  { %3593 = vmatpush1.bf16.msra.mxu0 %v5546_v7  ;;  %v5638_v7 = vld [vmem:[#allocation8 + $0x30c] ss:$16 sps:$4 sm:$0xff]  }
 0x246   :  { %3594 = vmatprep.subr.bf16.mxu0 %v5554_v8  ;;  %v5674_v8 = vld [vmem:[#allocation8 + $0x444] ss:$16 sps:$4 sm:$0xff]  }
 0x247   :  { %3499 = vmatpush1.bf16.msra.mxu1 %v5549_v9  ;;  %v5636_v9 = vld [vmem:[#allocation8 + $0x308] ss:$16 sps:$4 sm:$0xff]  }
 0x248   :  { %3500 = vmatprep.subr.bf16.mxu1 %v5557_v10  ;;  %v5641_v10 = vld [vmem:[#allocation8 + $0x32c] ss:$16 sps:$4 sm:$0xff]  }
 0x249   :  { %3595 = vmatpush1.bf16.msra.mxu0 %v5552_v12  ;;  %v5672_v12 = vld [vmem:[#allocation8 + $0x440] ss:$16 sps:$4 sm:$0xff]  }
 0x24a   :  { %3596 = vmatprep.subr.bf16.mxu0 %v5560_v13  ;;  %v5680_v13 = vld [vmem:[#allocation8 + $0x464] ss:$16 sps:$4 sm:$0xff]  }
 0x24b   :  { %3501 = vmatpush1.bf16.msra.mxu1 %v5555_v14  ;;  %v5639_v14 = vld [vmem:[#allocation8 + $0x328] ss:$16 sps:$4 sm:$0xff]  }
 0x24c   :  { %3502 = vmatprep.subr.bf16.mxu1 %v5563_v15  ;;  %v5644_v15 = vld [vmem:[#allocation8 + $0x34c] ss:$16 sps:$4 sm:$0xff]  }
 0x24d   :  { %3597 = vmatpush1.bf16.msra.mxu0 %v5558_v21  ;;  %v5678_v21 = vld [vmem:[#allocation8 + $0x460] ss:$16 sps:$4 sm:$0xff]  }
 0x24e   :  { %3598 = vmatprep.subr.bf16.mxu0 %v5566_v16  ;;  %v5686_v16 = vld [vmem:[#allocation8 + $0x484] ss:$16 sps:$4 sm:$0xff]  }
 0x24f   :  { %3503 = vmatpush1.bf16.msra.mxu1 %v5561_v31  ;;  %v5642_v31 = vld [vmem:[#allocation8 + $0x348] ss:$16 sps:$4 sm:$0xff]  }
 0x250   :  { %3504 = vmatprep.subr.bf16.mxu1 %v5569_v17  ;;  %v5647_v17 = vld [vmem:[#allocation8 + $0x36c] ss:$16 sps:$4 sm:$0xff]  }
 0x251   :  { %3599 = vmatpush1.bf16.msra.mxu0 %v5564_v18  ;;  %v5684_v18 = vld [vmem:[#allocation8 + $0x480] ss:$16 sps:$4 sm:$0xff]  }
 0x252   :  { %3600 = vmatprep.subr.bf16.mxu0 %v5572_v19  ;;  %v5692_v19 = vld [vmem:[#allocation8 + $0x4a4] ss:$16 sps:$4 sm:$0xff]  }
 0x253   :  { %3505 = vmatpush1.bf16.msra.mxu1 %v5567_v20  ;;  %v5645_v20 = vld [vmem:[#allocation8 + $0x368] ss:$16 sps:$4 sm:$0xff]  }
 0x254   :  { %3506 = vmatprep.subr.bf16.mxu1 %v5575_v22  ;;  %v5650_v22 = vld [vmem:[#allocation8 + $0x38c] ss:$16 sps:$4 sm:$0xff]  }
 0x255   :  { %3601 = vmatpush1.bf16.msra.mxu0 %v5570_v23  ;;  %v5690_v23 = vld [vmem:[#allocation8 + $0x4a0] ss:$16 sps:$4 sm:$0xff]  }
 0x256   :  { %3602 = vmatprep.subr.bf16.mxu0 %v5578_v24  ;;  %v5698_v24 = vld [vmem:[#allocation8 + $0x4c4] ss:$16 sps:$4 sm:$0xff]  }
 0x257   :  { %3507 = vmatpush1.bf16.msra.mxu1 %v5573_v25  ;;  %v5648_v25 = vld [vmem:[#allocation8 + $0x388] ss:$16 sps:$4 sm:$0xff]  }
 0x258   :  { %3508 = vmatprep.subr.bf16.mxu1 %v5581_v26  ;;  %v5653_v26 = vld [vmem:[#allocation8 + $0x3ac] ss:$16 sps:$4 sm:$0xff]  }
 0x259   :  { %3603 = vmatpush1.bf16.msra.mxu0 %v5576_v27  ;;  %v5696_v27 = vld [vmem:[#allocation8 + $0x4c0] ss:$16 sps:$4 sm:$0xff]  }
 0x25a   :  { %3604 = vmatprep.subr.bf16.mxu0 %v5584_v28  ;;  %v5704_v28 = vld [vmem:[#allocation8 + $0x4e4] ss:$16 sps:$4 sm:$0xff]  }
 0x25b   :  { %3509 = vmatpush1.bf16.msra.mxu1 %v5579_v29  ;;  %v5651_v29 = vld [vmem:[#allocation8 + $0x3a8] ss:$16 sps:$4 sm:$0xff]  }
 0x25c   :  { %3510 = vmatprep.subr.bf16.mxu1 %v5587_v32  ;;  %v5656_v32 = vld [vmem:[#allocation8 + $0x3cc] ss:$16 sps:$4 sm:$0xff]  }
 0x25d   :  { %3605 = vmatpush1.bf16.msra.mxu0 %v5582_v33  ;;  %v5702_v33 = vld [vmem:[#allocation8 + $0x4e0] ss:$16 sps:$4 sm:$0xff]  }
 0x25e   :  { %3606 = vmatprep.subr.bf16.mxu0 %v5590_v34  ;;  %v5710_v34 = vld [vmem:[#allocation8 + $0x504] ss:$16 sps:$4 sm:$0xff]  }
 0x25f   :  { %3511 = vmatpush1.bf16.msra.mxu1 %v5585_v35  ;;  %v5654_v35 = vld [vmem:[#allocation8 + $0x3c8] ss:$16 sps:$4 sm:$0xff]  }
 0x260   :  { %3512 = vmatprep.subr.bf16.mxu1 %v5593_v36  ;;  %v5659_v36 = vld [vmem:[#allocation8 + $0x3ec] ss:$16 sps:$4 sm:$0xff]  }
 0x261   :  { %3607 = vmatpush1.bf16.msra.mxu0 %v5588_v11  ;;  %v5708_v11 = vld [vmem:[#allocation8 + $0x500] ss:$16 sps:$4 sm:$0xff]  }
 0x262   :  { %3617 = vmatprep.subr.bf16.mxu0 %v5596_v37  ;;  %v5716_v37 = vld [vmem:[#allocation8 + $0x524] ss:$16 sps:$4 sm:$0xff]  }
 0x263   :  { %3513 = vmatpush1.bf16.msra.mxu1 %v5591_v38  ;;  %v5657_v38 = vld [vmem:[#allocation8 + $0x3e8] ss:$16 sps:$4 sm:$0xff]  }
 0x264   :  { %3609 = vmatmul.mubr.bf16.vlgmr.msra.gmra.mrb[8].mxu0 %v6324_v0  ;;  %3514 = vmatprep.subr.bf16.mxu1 %v5599_v41  ;;  %v5662_v0 = vld [vmem:[#allocation8 + $0x404] ss:$16 sps:$4 sm:$0xff]   ;;  %v5665_v41 = vld [vmem:[#allocation8 + $0x40c] ss:$16 sps:$4 sm:$0xff]  }
 0x265   :  { %3618 = vmatpush1.bf16.msra.mxu0 %v5594_v39  ;;  %3649 = vmatprep.mubr.bf16.mxu0 %v6322_v62  ;;  %v5627_v62 = vld [vmem:[#allocation8 + $0x3e0] ss:$16 sps:$4 sm:$0xff]  }
 0x266   :  { %3619 = vmatprep.subr.bf16.mxu0 %v5602_v40  ;;  %v5714_v39 = vld [vmem:[#allocation8 + $0x520] ss:$16 sps:$4 sm:$0xff]   ;;  %v5722_v40 = vld [vmem:[#allocation8 + $0x544] ss:$16 sps:$4 sm:$0xff]  }
 0x267   :  { %3515 = vmatpush1.bf16.msra.mxu1 %v5597_v42  ;;  %v5663_v42 = vld [vmem:[#allocation8 + $0x408] ss:$16 sps:$4 sm:$0xff]  }
 0x268   :  { %3516 = vmatprep.subr.bf16.mxu1 %v5605_v43  ;;  %v5671_v43 = vld [vmem:[#allocation8 + $0x42c] ss:$16 sps:$4 sm:$0xff]  }
 0x269   :  { %3620 = vmatpush1.bf16.msra.mxu0 %v5600_v44  ;;  %v5720_v44 = vld [vmem:[#allocation8 + $0x540] ss:$16 sps:$4 sm:$0xff]  }
 0x26a   :  { %3621 = vmatprep.subr.bf16.mxu0 %v5608_v45  ;;  %v5728_v45 = vld [vmem:[#allocation8 + $0x564] ss:$16 sps:$4 sm:$0xff]  }
 0x26b   :  { %3517 = vmatpush1.bf16.msra.mxu1 %v5603_v53  ;;  %v5669_v53 = vld [vmem:[#allocation8 + $0x428] ss:$16 sps:$4 sm:$0xff]  }
 0x26c   :  { %3518 = vmatprep.subr.bf16.mxu1 %v5611_v46  ;;  %v5677_v46 = vld [vmem:[#allocation8 + $0x44c] ss:$16 sps:$4 sm:$0xff]  }
 0x26d   :  { %3622 = vmatpush1.bf16.msra.mxu0 %v5606_v47  ;;  %v5726_v47 = vld [vmem:[#allocation8 + $0x560] ss:$16 sps:$4 sm:$0xff]  }
 0x26e   :  { %3623 = vmatprep.subr.bf16.mxu0 %v5614_v30  ;;  %v5734_v30 = vld [vmem:[#allocation8 + $0x584] ss:$16 sps:$4 sm:$0xff]  }
 0x26f   :  { %3519 = vmatpush1.bf16.msra.mxu1 %v5609_v48  ;;  %v5675_v48 = vld [vmem:[#allocation8 + $0x448] ss:$16 sps:$4 sm:$0xff]  }
 0x270   :  { %3520 = vmatprep.subr.bf16.mxu1 %v5617_v50  ;;  %v5683_v50 = vld [vmem:[#allocation8 + $0x46c] ss:$16 sps:$4 sm:$0xff]  }
 0x271   :  { %3624 = vmatpush1.bf16.msra.mxu0 %v5612_v51  ;;  %v5732_v51 = vld [vmem:[#allocation8 + $0x580] ss:$16 sps:$4 sm:$0xff]  }
 0x272   :  { %3625 = vmatprep.subr.bf16.mxu0 %v5620_v52  ;;  %v5740_v52 = vld [vmem:[#allocation8 + $0x5a4] ss:$16 sps:$4 sm:$0xff]  }
 0x273   :  { %3521 = vmatpush1.bf16.msra.mxu1 %v5615_v54  ;;  %v5681_v54 = vld [vmem:[#allocation8 + $0x468] ss:$16 sps:$4 sm:$0xff]  }
 0x274   :  { %3522 = vmatprep.subr.bf16.mxu1 %v5623_v55  ;;  %v5689_v55 = vld [vmem:[#allocation8 + $0x48c] ss:$16 sps:$4 sm:$0xff]  }
 0x275   :  { %3626 = vmatpush1.bf16.msra.mxu0 %v5618_v56  ;;  %v5738_v56 = vld [vmem:[#allocation8 + $0x5a0] ss:$16 sps:$4 sm:$0xff]  }
 0x276   :  { %3627 = vmatprep.subr.bf16.mxu0 %v5626_v57  ;;  %v5746_v57 = vld [vmem:[#allocation8 + $0x5c4] ss:$16 sps:$4 sm:$0xff]  }
 0x277   :  { %3523 = vmatpush1.bf16.msra.mxu1 %v5621_v58  ;;  %v5687_v58 = vld [vmem:[#allocation8 + $0x488] ss:$16 sps:$4 sm:$0xff]  }
 0x278   :  { %3524 = vmatprep.subr.bf16.mxu1 %v5629_v59  ;;  %v5695_v59 = vld [vmem:[#allocation8 + $0x4ac] ss:$16 sps:$4 sm:$0xff]  }
 0x279   :  { %3628 = vmatpush1.bf16.msra.mxu0 %v5624_v60  ;;  %v5744_v60 = vld [vmem:[#allocation8 + $0x5c0] ss:$16 sps:$4 sm:$0xff]  }
 0x27a   :  { %3629 = vmatprep.subr.bf16.mxu0 %v5632_v61  ;;  %v5752_v61 = vld [vmem:[#allocation8 + $0x5e4] ss:$16 sps:$4 sm:$0xff]  }
 0x27b   :  { %3525 = vmatpush1.bf16.msra.mxu1 %v5627_v62  ;;  %v5693_v62 = vld [vmem:[#allocation8 + $0x4a8] ss:$16 sps:$4 sm:$0xff]  }
 0x27c   :  { %3535 = vmatprep.subr.bf16.mxu1 %v5662_v0  ;;  %v5750_v0 = vld [vmem:[#allocation8 + $0x5e0] ss:$16 sps:$4 sm:$0xff]  }
 0x27d   :  { %3630 = vmatpush1.bf16.msra.mxu0 %v5630_v1  ;;  %v5758_v1 = vld [vmem:[#allocation11 + $0x4] ss:$8 sps:$4 sm:$0xff]  }
 0x27e   :  { %3527 = vmatmul.mubr.bf16.vlgmr.msra.gmra.mrb[4].mxu1 %v6331_v4  ;;  %3631 = vmatprep.subr.bf16.mxu0 %v5635_v2  ;;  %v5699_v2 = vld [vmem:[#allocation8 + $0x4c8] ss:$16 sps:$4 sm:$0xff]  }
 0x27f   :  { %3536 = vmatpush1.bf16.msra.mxu1 %v5660_v3  ;;  %v5707_v3 = vld [vmem:[#allocation8 + $0x4ec] ss:$16 sps:$4 sm:$0xff]  }
 0x280   :  { %3537 = vmatprep.subr.bf16.mxu1 %v5668_v5  ;;  %v5713_v5 = vld [vmem:[#allocation8 + $0x50c] ss:$16 sps:$4 sm:$0xff]  }
 0x281   :  { %3632 = vmatpush1.bf16.msra.mxu0 %v5633_v6  ;;  %v5711_v6 = vld [vmem:[#allocation8 + $0x508] ss:$16 sps:$4 sm:$0xff]  }
 0x282   :  { %3633 = vmatprep.subr.bf16.mxu0 %v5638_v7  ;;  %v5719_v7 = vld [vmem:[#allocation8 + $0x52c] ss:$16 sps:$4 sm:$0xff]  }
 0x283   :  { %3538 = vmatpush1.bf16.msra.mxu1 %v5666_v49  ;;  %v5717_v49 = vld [vmem:[#allocation8 + $0x528] ss:$16 sps:$4 sm:$0xff]  }
 0x284   :  { %3539 = vmatprep.subr.bf16.mxu1 %v5674_v8  ;;  %v5725_v8 = vld [vmem:[#allocation8 + $0x54c] ss:$16 sps:$4 sm:$0xff]  }
 0x285   :  { %3634 = vmatpush1.bf16.msra.mxu0 %v5636_v9  ;;  %v5723_v9 = vld [vmem:[#allocation8 + $0x548] ss:$16 sps:$4 sm:$0xff]  }
 0x286   :  { %3635 = vmatprep.subr.bf16.mxu0 %v5641_v10  ;;  %v5731_v10 = vld [vmem:[#allocation8 + $0x56c] ss:$16 sps:$4 sm:$0xff]  }
 0x287   :  { %3540 = vmatpush1.bf16.msra.mxu1 %v5672_v12  ;;  %v5729_v12 = vld [vmem:[#allocation8 + $0x568] ss:$16 sps:$4 sm:$0xff]  }
 0x288   :  { %3541 = vmatprep.subr.bf16.mxu1 %v5680_v13  ;;  %v5737_v13 = vld [vmem:[#allocation8 + $0x58c] ss:$16 sps:$4 sm:$0xff]  }
 0x289   :  { %3636 = vmatpush1.bf16.msra.mxu0 %v5639_v14  ;;  %v5735_v14 = vld [vmem:[#allocation8 + $0x588] ss:$16 sps:$4 sm:$0xff]  }
 0x28a   :  { %3637 = vmatprep.subr.bf16.mxu0 %v5644_v15  ;;  %v5743_v15 = vld [vmem:[#allocation8 + $0x5ac] ss:$16 sps:$4 sm:$0xff]  }
 0x28b   :  { %3542 = vmatpush1.bf16.msra.mxu1 %v5678_v21  ;;  %v5741_v21 = vld [vmem:[#allocation8 + $0x5a8] ss:$16 sps:$4 sm:$0xff]  }
 0x28c   :  { %3543 = vmatprep.subr.bf16.mxu1 %v5686_v16  ;;  %v5749_v16 = vld [vmem:[#allocation8 + $0x5cc] ss:$16 sps:$4 sm:$0xff]  }
 0x28d   :  { %3638 = vmatpush1.bf16.msra.mxu0 %v5642_v31  ;;  %v5747_v31 = vld [vmem:[#allocation8 + $0x5c8] ss:$16 sps:$4 sm:$0xff]  }
 0x28e   :  { %3639 = vmatprep.subr.bf16.mxu0 %v5647_v17  ;;  %v5755_v17 = vld [vmem:[#allocation8 + $0x5ec] ss:$16 sps:$4 sm:$0xff]  }
 0x28f   :  { %3544 = vmatpush1.bf16.msra.mxu1 %v5684_v18  ;;  %v5753_v18 = vld [vmem:[#allocation8 + $0x5e8] ss:$16 sps:$4 sm:$0xff]  }
 0x290   :  { %3545 = vmatprep.subr.bf16.mxu1 %v5692_v19 }
 0x291   :  { %3640 = vmatpush1.bf16.msra.mxu0 %v5645_v20 }
 0x292   :  { %3641 = vmatprep.subr.bf16.mxu0 %v5650_v22 }
 0x293   :  { %3546 = vmatpush1.bf16.msra.mxu1 %v5690_v23 }
 0x294   :  { %3547 = vmatprep.subr.bf16.mxu1 %v5698_v24 }
 0x295   :  { %3642 = vmatpush1.bf16.msra.mxu0 %v5648_v25 }
 0x296   :  { %3643 = vmatprep.subr.bf16.mxu0 %v5653_v26 }
 0x297   :  { %3548 = vmatpush1.bf16.msra.mxu1 %v5696_v27  ;;  %v5756_v27 = vld [vmem:[#allocation11] ss:$8 sps:$4 sm:$0xff]  }
 0x298   :  { %3549 = vmatprep.subr.bf16.mxu1 %v5704_v28 }
 0x299   :  { %3644 = vmatpush1.bf16.msra.mxu0 %v5651_v29  ;;  %v5761_v29 = vld [vmem:[#allocation11 + $0x14] ss:$8 sps:$4 sm:$0xff]  }
 0x29a   :  { %3645 = vmatprep.subr.bf16.mxu0 %v5656_v32  ;;  %v5759_v32 = vld [vmem:[#allocation11 + $0x10] ss:$8 sps:$4 sm:$0xff]  }
 0x29b   :  { %3550 = vmatpush1.bf16.msra.mxu1 %v5702_v33  ;;  %v5764_v33 = vld [vmem:[#allocation11 + $0x24] ss:$8 sps:$4 sm:$0xff]  }
 0x29c   :  { %3551 = vmatprep.subr.bf16.mxu1 %v5710_v34  ;;  %v5762_v34 = vld [vmem:[#allocation11 + $0x20] ss:$8 sps:$4 sm:$0xff]  }
 0x29d   :  { %3646 = vmatpush1.bf16.msra.mxu0 %v5654_v35  ;;  %v5767_v35 = vld [vmem:[#allocation11 + $0x34] ss:$8 sps:$4 sm:$0xff]  }
 0x29e   :  { %3647 = vmatprep.subr.bf16.mxu0 %v5659_v36  ;;  %v5765_v36 = vld [vmem:[#allocation11 + $0x30] ss:$8 sps:$4 sm:$0xff]  }
 0x29f   :  { %3552 = vmatpush1.bf16.msra.mxu1 %v5708_v11  ;;  %v5770_v11 = vld [vmem:[#allocation11 + $0x44] ss:$8 sps:$4 sm:$0xff]  }
 0x2a0   :  { %3553 = vmatprep.subr.bf16.mxu1 %v5716_v37  ;;  %v5768_v37 = vld [vmem:[#allocation11 + $0x40] ss:$8 sps:$4 sm:$0xff]  }
 0x2a1   :  { %3648 = vmatpush1.bf16.msra.mxu0 %v5657_v38  ;;  %v5773_v38 = vld [vmem:[#allocation11 + $0x54] ss:$8 sps:$4 sm:$0xff]  }
 0x2a2   :  { %3658 = vmatprep.subr.bf16.mxu0 %v5665_v41  ;;  %v5771_v41 = vld [vmem:[#allocation11 + $0x50] ss:$8 sps:$4 sm:$0xff]  }
 0x2a3   :  { %3554 = vmatpush1.bf16.msra.mxu1 %v5714_v39  ;;  %v5776_v39 = vld [vmem:[#allocation11 + $0x64] ss:$8 sps:$4 sm:$0xff]  }
 0x2a4   :  { %3650 = vmatmul.mubr.bf16.vlgmr.msra.gmra.mrb[8].mxu0 %v6331_v4  ;;  %3555 = vmatprep.subr.bf16.mxu1 %v5722_v40  ;;  %v5705_v4 = vld [vmem:[#allocation8 + $0x4e8] ss:$16 sps:$4 sm:$0xff]   ;;  %v5774_v40 = vld [vmem:[#allocation11 + $0x60] ss:$8 sps:$4 sm:$0xff]  }
 0x2a5   :  { %3659 = vmatpush1.bf16.msra.mxu0 %v5663_v42  ;;  %v5779_v42 = vld [vmem:[#allocation11 + $0x74] ss:$8 sps:$4 sm:$0xff]  }
 0x2a6   :  { %3660 = vmatprep.subr.bf16.mxu0 %v5671_v43  ;;  %v5777_v43 = vld [vmem:[#allocation11 + $0x70] ss:$8 sps:$4 sm:$0xff]  }
 0x2a7   :  { %3556 = vmatpush1.bf16.msra.mxu1 %v5720_v44  ;;  %v5782_v44 = vld [vmem:[#allocation11 + $0x84] ss:$8 sps:$4 sm:$0xff]  }
 0x2a8   :  { %3557 = vmatprep.subr.bf16.mxu1 %v5728_v45  ;;  %v5780_v45 = vld [vmem:[#allocation11 + $0x80] ss:$8 sps:$4 sm:$0xff]  }
 0x2a9   :  { %3661 = vmatpush1.bf16.msra.mxu0 %v5669_v53  ;;  %v5785_v53 = vld [vmem:[#allocation11 + $0x94] ss:$8 sps:$4 sm:$0xff]  }
 0x2aa   :  { %3662 = vmatprep.subr.bf16.mxu0 %v5677_v46  ;;  %v5783_v46 = vld [vmem:[#allocation11 + $0x90] ss:$8 sps:$4 sm:$0xff]  }
 0x2ab   :  { %3558 = vmatpush1.bf16.msra.mxu1 %v5726_v47  ;;  %v5788_v47 = vld [vmem:[#allocation11 + $0xa4] ss:$8 sps:$4 sm:$0xff]  }
 0x2ac   :  { %3559 = vmatprep.subr.bf16.mxu1 %v5734_v30  ;;  %v5786_v30 = vld [vmem:[#allocation11 + $0xa0] ss:$8 sps:$4 sm:$0xff]  }
 0x2ad   :  { %3663 = vmatpush1.bf16.msra.mxu0 %v5675_v48  ;;  %v5791_v48 = vld [vmem:[#allocation11 + $0xb4] ss:$8 sps:$4 sm:$0xff]  }
 0x2ae   :  { %3664 = vmatprep.subr.bf16.mxu0 %v5683_v50  ;;  %v5789_v50 = vld [vmem:[#allocation11 + $0xb0] ss:$8 sps:$4 sm:$0xff]  }
 0x2af   :  { %3560 = vmatpush1.bf16.msra.mxu1 %v5732_v51  ;;  %v5794_v51 = vld [vmem:[#allocation11 + $0xc4] ss:$8 sps:$4 sm:$0xff]  }
 0x2b0   :  { %3561 = vmatprep.subr.bf16.mxu1 %v5740_v52  ;;  %v5792_v52 = vld [vmem:[#allocation11 + $0xc0] ss:$8 sps:$4 sm:$0xff]  }
 0x2b1   :  { %3665 = vmatpush1.bf16.msra.mxu0 %v5681_v54  ;;  %v5797_v54 = vld [vmem:[#allocation11 + $0xd4] ss:$8 sps:$4 sm:$0xff]  }
 0x2b2   :  { %3666 = vmatprep.subr.bf16.mxu0 %v5689_v55  ;;  %v5795_v55 = vld [vmem:[#allocation11 + $0xd0] ss:$8 sps:$4 sm:$0xff]  }
 0x2b3   :  { %3562 = vmatpush1.bf16.msra.mxu1 %v5738_v56  ;;  %v5800_v56 = vld [vmem:[#allocation11 + $0xe4] ss:$8 sps:$4 sm:$0xff]  }
 0x2b4   :  { %3563 = vmatprep.subr.bf16.mxu1 %v5746_v57  ;;  %v5798_v57 = vld [vmem:[#allocation11 + $0xe0] ss:$8 sps:$4 sm:$0xff]  }
 0x2b5   :  { %3667 = vmatpush1.bf16.msra.mxu0 %v5687_v58  ;;  %v5803_v58 = vld [vmem:[#allocation11 + $0xf4] ss:$8 sps:$4 sm:$0xff]  }
 0x2b6   :  { %3668 = vmatprep.subr.bf16.mxu0 %v5695_v59  ;;  %v5801_v59 = vld [vmem:[#allocation11 + $0xf0] ss:$8 sps:$4 sm:$0xff]  }
 0x2b7   :  { %3564 = vmatpush1.bf16.msra.mxu1 %v5744_v60  ;;  %v5806_v60 = vld [vmem:[#allocation11 + $0x104] ss:$8 sps:$4 sm:$0xff]  }
 0x2b8   :  { %3565 = vmatprep.subr.bf16.mxu1 %v5752_v61  ;;  %v2473_v61 = vlaneseq }
 0x2b9   :  { %3669 = vmatpush1.bf16.msra.mxu0 %v5693_v62 }
 0x2ba   :  { %3670 = vmatprep.subr.bf16.mxu0 %v5701_v63  ;;  %v6335_v62 = vshrl.u32 %v2473_v61, 7  ;;  %v5854_v61 = vld [vmem:[#allocation14 + $0x48] sm:$0xff]  }
 0x2bb   :  { %3566 = vmatpush1.bf16.msra.mxu1 %v5750_v0  ;;  %v6338_v0 = vld [vmem:[#allocation10] sm:$0xf] }
 0x2bc   :  { %4103 = vmatprep.subr.bf16.mxu1 %v5758_v1  ;;  %v2475_v63 = vsub.s32 0, %v6335_v62  ;;  %v2479_v1 = vsub.s32 1, %v6335_v62 }
 0x2bd   :  { %3671 = vmatpush1.bf16.msra.mxu0 %v5699_v2  ;;  %v2487_v2 = vsub.s32 3, %v6335_v62 }
 0x2be   :  { %3672 = vmatprep.subr.bf16.mxu0 %v5707_v3  ;;  %v2476_v3 = vrot.slane %v6338_v0, %v2475_v63 }
 0x2c1   :  { %3673 = vmatpush1.bf16.msra.mxu0 %v5705_v4  ;;  %v2480_v4 = vrot.slane %v6338_v0, %v2479_v1 }
 0x2c2   :  { %3674 = vmatprep.subr.bf16.mxu0 %v5713_v5  ;;  %v2488_v5 = vrot.slane %v6338_v0, %v2487_v2  ;;  %v5856_v2 = vld [vmem:[#allocation14 + $0x50] sm:$0xff]  }
 0x2c5   :  { %3675 = vmatpush1.bf16.msra.mxu0 %v5711_v6 }
 0x2c6   :  { %3676 = vmatprep.subr.bf16.mxu0 %v5719_v7 }
 0x2c9   :  { %3677 = vmatpush1.bf16.msra.mxu0 %v5717_v49 }
 0x2ca   :  { %3678 = vmatprep.subr.bf16.mxu0 %v5725_v8 }
 0x2cd   :  { %3679 = vmatpush1.bf16.msra.mxu0 %v5723_v9 }
 0x2ce   :  { %3680 = vmatprep.subr.bf16.mxu0 %v5731_v10 }
 0x2d1   :  { %3681 = vmatpush1.bf16.msra.mxu0 %v5729_v12 }
 0x2d2   :  { %3682 = vmatprep.subr.bf16.mxu0 %v5737_v13 }
 0x2d5   :  { %3683 = vmatpush1.bf16.msra.mxu0 %v5735_v14 }
 0x2d6   :  { %3684 = vmatprep.subr.bf16.mxu0 %v5743_v15 }
 0x2d9   :  { %3685 = vmatpush1.bf16.msra.mxu0 %v5741_v21 }
 0x2da   :  { %3686 = vmatprep.subr.bf16.mxu0 %v5749_v16 }
 0x2dd   :  { %3687 = vmatpush1.bf16.msra.mxu0 %v5747_v31 }
 0x2de   :  { %3688 = vmatprep.subr.bf16.mxu0 %v5755_v17 }
 0x2e1   :  { %3689 = vmatpush1.bf16.msra.mxu0 %v5753_v18 }
 0x2f7   :  { %v2260_v19 = vpop.f32.mrb[4].mxu0 }
 0x2f8   :  { %v2271_v20 = vmax.f32 %v2260_v19, 0.0  ;;  %v2262_v22 = vpop.f32.mrb[5].mxu0  ;;  %v5804_v19 = vld [vmem:[#allocation11 + $0x100] ss:$8 sps:$4 sm:$0xff]  }
 0x2f9   :  { %v2272_v23 = vmax.f32 %v2262_v22, 0.0  ;;  %v2264_v24 = vpop.f32.mrb[6].mxu0  ;;  %v5809_v22 = vld [vmem:[#allocation11 + $0x114] ss:$8 sps:$4 sm:$0xff]  }
 0x2fa   :  { %v2265_v25 = vpop.f32.mrb[7].mxu0  ;;  %v2277_v28 = vpack.c.bf16 %v2271_v20, %v2271_v20  ;;  %v5807_v24 = vld [vmem:[#allocation11 + $0x110] ss:$8 sps:$4 sm:$0xff]  }
 0x2fb   :  { %v2278_v26 = vpack.c.bf16 %v2272_v23, %v2272_v23  ;;  %v5812_v25 = vld [vmem:[#allocation11 + $0x124] ss:$8 sps:$4 sm:$0xff]  }
 0x2fd   :  { %3567 = vmatprep.mubr.bf16.mxu1 %v2278_v26  ;;  %3690 = vmatprep.mubr.bf16.mxu0 %v2278_v26  ;;  %v5810_v26 = vld [vmem:[#allocation11 + $0x120] ss:$8 sps:$4 sm:$0xff]  }
 0x2fe   :  { %3568 = vmatmul.mubr.bf16.vlgmr.msra.gmra.mrb[4].mxu1 %v2277_v28  ;;  %3691 = vmatmul.mubr.bf16.vlgmr.msra.gmra.mrb[8].mxu0 %v2277_v28  ;;  %v5813_v28 = vld [vmem:[#allocation11 + $0x130] ss:$8 sps:$4 sm:$0xff]  }
 0x2ff   :  { %4104 = vmatpush1.bf16.msra.mxu1 %v5756_v27  ;;  %v5815_v27 = vld [vmem:[#allocation11 + $0x134] ss:$8 sps:$4 sm:$0xff]  }
 0x300   :  { %4105 = vmatprep.subr.bf16.mxu1 %v5761_v29  ;;  %v5818_v29 = vld [vmem:[#allocation11 + $0x144] ss:$8 sps:$4 sm:$0xff]  }
 0x303   :  { %4106 = vmatpush1.bf16.msra.mxu1 %v5759_v32  ;;  %v5816_v32 = vld [vmem:[#allocation11 + $0x140] ss:$8 sps:$4 sm:$0xff]  }
 0x304   :  { %4107 = vmatprep.subr.bf16.mxu1 %v5764_v33  ;;  %v5821_v33 = vld [vmem:[#allocation11 + $0x154] ss:$8 sps:$4 sm:$0xff]  }
 0x307   :  { %4108 = vmatpush1.bf16.msra.mxu1 %v5762_v34  ;;  %v5819_v34 = vld [vmem:[#allocation11 + $0x150] ss:$8 sps:$4 sm:$0xff]  }
 0x308   :  { %4109 = vmatprep.subr.bf16.mxu1 %v5767_v35  ;;  %v5824_v35 = vld [vmem:[#allocation11 + $0x164] ss:$8 sps:$4 sm:$0xff]  }
 0x30b   :  { %4110 = vmatpush1.bf16.msra.mxu1 %v5765_v36  ;;  %v5822_v36 = vld [vmem:[#allocation11 + $0x160] ss:$8 sps:$4 sm:$0xff]  }
 0x30c   :  { %4111 = vmatprep.subr.bf16.mxu1 %v5770_v11  ;;  %v5827_v11 = vld [vmem:[#allocation11 + $0x174] ss:$8 sps:$4 sm:$0xff]  }
 0x30f   :  { %4112 = vmatpush1.bf16.msra.mxu1 %v5768_v37  ;;  %v5825_v37 = vld [vmem:[#allocation11 + $0x170] ss:$8 sps:$4 sm:$0xff]  }
 0x310   :  { %4113 = vmatprep.subr.bf16.mxu1 %v5773_v38  ;;  %v5830_v38 = vld [vmem:[#allocation11 + $0x184] ss:$8 sps:$4 sm:$0xff]  }
 0x313   :  { %4114 = vmatpush1.bf16.msra.mxu1 %v5771_v41  ;;  %v5828_v41 = vld [vmem:[#allocation11 + $0x180] ss:$8 sps:$4 sm:$0xff]  }
 0x314   :  { %4115 = vmatprep.subr.bf16.mxu1 %v5776_v39  ;;  %v5833_v39 = vld [vmem:[#allocation11 + $0x194] ss:$8 sps:$4 sm:$0xff]  }
 0x317   :  { %4116 = vmatpush1.bf16.msra.mxu1 %v5774_v40  ;;  %v5831_v40 = vld [vmem:[#allocation11 + $0x190] ss:$8 sps:$4 sm:$0xff]  }
 0x318   :  { %4117 = vmatprep.subr.bf16.mxu1 %v5779_v42  ;;  %v5836_v42 = vld [vmem:[#allocation11 + $0x1a4] ss:$8 sps:$4 sm:$0xff]  }
 0x31b   :  { %4118 = vmatpush1.bf16.msra.mxu1 %v5777_v43  ;;  %v5834_v43 = vld [vmem:[#allocation11 + $0x1a0] ss:$8 sps:$4 sm:$0xff]  }
 0x31c   :  { %4119 = vmatprep.subr.bf16.mxu1 %v5782_v44  ;;  %v5839_v44 = vld [vmem:[#allocation11 + $0x1b4] ss:$8 sps:$4 sm:$0xff]  }
 0x31f   :  { %4120 = vmatpush1.bf16.msra.mxu1 %v5780_v45  ;;  %v5837_v45 = vld [vmem:[#allocation11 + $0x1b0] ss:$8 sps:$4 sm:$0xff]  }
 0x320   :  { %4121 = vmatprep.subr.bf16.mxu1 %v5785_v53  ;;  %v5842_v53 = vld [vmem:[#allocation11 + $0x1c4] ss:$8 sps:$4 sm:$0xff]  }
 0x323   :  { %4122 = vmatpush1.bf16.msra.mxu1 %v5783_v46  ;;  %v5840_v46 = vld [vmem:[#allocation11 + $0x1c0] ss:$8 sps:$4 sm:$0xff]  }
 0x324   :  { %4123 = vmatprep.subr.bf16.mxu1 %v5788_v47  ;;  %v2483_v47 = vsub.s32 2, %v6335_v62 }
 0x327   :  { %4124 = vmatpush1.bf16.msra.mxu1 %v5786_v30  ;;  %v5845_v30 = vld [vmem:[#allocation11 + $0x1d4] ss:$8 sps:$4 sm:$0xff]  }
 0x328   :  { %4125 = vmatprep.subr.bf16.mxu1 %v5791_v48  ;;  %v5843_v48 = vld [vmem:[#allocation11 + $0x1d0] ss:$8 sps:$4 sm:$0xff]  }
 0x32b   :  { %4126 = vmatpush1.bf16.msra.mxu1 %v5789_v50  ;;  %v2484_v50 = vrot.slane %v6338_v0, %v2483_v47  ;;  %v5855_v0 = vld [vmem:[#allocation14 + $0x8] sm:$0xff]  }
 0x32c   :  { %4127 = vmatprep.subr.bf16.mxu1 %v5794_v51  ;;  %v5848_v51 = vld [vmem:[#allocation11 + $0x1e4] ss:$8 sps:$4 sm:$0xff]  }
 0x32f   :  { %4128 = vmatpush1.bf16.msra.mxu1 %v5792_v52  ;;  %v5846_v52 = vld [vmem:[#allocation11 + $0x1e0] ss:$8 sps:$4 sm:$0xff]  }
 0x330   :  { %4129 = vmatprep.subr.bf16.mxu1 %v5797_v54 }
 0x333   :  { %4130 = vmatpush1.bf16.msra.mxu1 %v5795_v55  ;;  %v5851_v55 = vld [vmem:[#allocation11 + $0x1f4] ss:$8 sps:$4 sm:$0xff]  }
 0x334   :  { %4131 = vmatprep.subr.bf16.mxu1 %v5800_v56  ;;  %v5849_v56 = vld [vmem:[#allocation11 + $0x1f0] ss:$8 sps:$4 sm:$0xff]  }
 0x337   :  { %4132 = vmatpush1.bf16.msra.mxu1 %v5798_v57 }
 0x338   :  { %4133 = vmatprep.subr.bf16.mxu1 %v5803_v58  ;;  %v5852_v58 = vld [vmem:[#allocation14 + $0x40] sm:$0xff]  }
 0x33b   :  { %4134 = vmatpush1.bf16.msra.mxu1 %v5801_v59  ;;  %v5853_v59 = vld [vmem:[#allocation14] sm:$0xff]  }
 0x33c   :  { %4144 = vmatprep.subr.bf16.mxu1 %v5806_v60 }
 0x3d1   :  { %v3569_v6 = vpop.f32.mrb[4].mxu1  ;;  %v6349_v7 = vpop.f32.mrb[8].mxu0 }
 0x3d2   :  { %v4968_v49 = vadd.f32 %v3569_v6, %v2476_v3  ;;  %v3571_v8 = vpop.f32.mrb[5].mxu1  ;;  %v3694_v9 = vpop.f32.mrb[9].mxu0  ;;  %v4970_v54 = vadd.f32 %v6349_v7, %v2484_v50  ;;  %v5857_v3 = vld [vmem:[#allocation14 + $0x10] sm:$0xff]   ;;  %v5860_v6 = vld [vmem:[#allocation14 + $0x60] sm:$0xff]  }
 0x3d3   :  { %v4969_v10 = vadd.f32 %v3571_v8, %v2480_v4  ;;  %v4971_v12 = vadd.f32 %v3694_v9, %v2488_v5  ;;  %v3573_v13 = vpop.f32.mrb[6].mxu1  ;;  %v3696_v14 = vpop.f32.mrb[10].mxu0  ;;  %v5858_v4 = vld [vmem:[#allocation14 + $0x58] sm:$0xff]   ;;  %v5861_v7 = vld [vmem:[#allocation14 + $0x20] sm:$0xff]   ;;  %v5863_v8 = vld [vmem:[#allocation14 + $0x28] sm:$0xff]  }
 0x3d4   :  { %v3699_v15 = vmax.f32 %v4968_v49, 0.0  ;;  %v3574_v21 = vpop.f32.mrb[7].mxu1  ;;  %v3697_v16 = vpop.f32.mrb[11].mxu0  ;;  %v3701_v57 = vmax.f32 %v4970_v54, 0.0  ;;  %v5859_v5 = vld [vmem:[#allocation14 + $0x18] sm:$0xff]   ;;  %v5862_v49 = vld [vmem:[#allocation14 + $0x68] sm:$0xff]  }
 0x3d5   :  { %v3700_v31 = vmax.f32 %v4969_v10, 0.0  ;;  %v3702_v17 = vmax.f32 %v4971_v12, 0.0  ;;  %v5864_v9 = vld [vmem:[#allocation14 + $0x70] sm:$0xff]   ;;  %v5866_v12 = vld [vmem:[#allocation14 + $0x78] sm:$0xff]  }
 0x3d6   :  { %v3703_v20 = vpack.c.bf16 %v3699_v15, %v3699_v15  ;;  %v3705_v60 = vpack.c.bf16 %v3701_v57, %v3701_v57  ;;  %v5865_v10 = vld [vmem:[#allocation14 + $0x30] sm:$0xff]   ;;  %v5867_v13 = vld [vmem:[#allocation14 + $0x38] sm:$0xff]  }
 0x3d7   :  { %v3704_v18 = vpack.c.bf16 %v3700_v31, %v3700_v31  ;;  %v3706_v23 = vpack.c.bf16 %v3702_v17, %v3702_v17  ;;  %v3771_v14 = vld [vmem:[#allocation13] sm:$0x3] }
 0x3d8   :  { %v3776_v15 = vrot.slane %v3771_v14, %v2475_v63  ;;  %v3780_v21 = vrot.slane %v3771_v14, %v2479_v1 }
 0x3d9   :  { %4135 = vmatprep.mubr.bf16.mxu1 %v3704_v18 }
 0x3da   :  { %4136 = vmatmul.mubr.bf16.vlgmr.msra.gmra.mrb[8].mxu1 %v3703_v20 }
 0x3db   :  { %4145 = vmatpush1.bf16.msra.mxu1 %v5804_v19  ;;  %4176 = vmatprep.mubr.bf16.mxu1 %v3706_v23 }
 0x3dc   :  { %4146 = vmatprep.subr.bf16.mxu1 %v5809_v22 }
 0x3df   :  { %4147 = vmatpush1.bf16.msra.mxu1 %v5807_v24 }
 0x3e0   :  { %4148 = vmatprep.subr.bf16.mxu1 %v5812_v25 }
 0x3e3   :  { %4149 = vmatpush1.bf16.msra.mxu1 %v5810_v26 }
 0x3e4   :  { %4150 = vmatprep.subr.bf16.mxu1 %v5815_v27  ;;  %v4929_v27 = vld [vmem:[#allocation16] ss:$0 sm:$0xff] }
 0x3e7   :  { %4151 = vmatpush1.bf16.msra.mxu1 %v5813_v28 }
 0x3e8   :  { %4152 = vmatprep.subr.bf16.mxu1 %v5818_v29 }
 0x3eb   :  { %4153 = vmatpush1.bf16.msra.mxu1 %v5816_v32 }
 0x3ec   :  { %4154 = vmatprep.subr.bf16.mxu1 %v5821_v33 }
 0x3ef   :  { %4155 = vmatpush1.bf16.msra.mxu1 %v5819_v34 }
 0x3f0   :  { %4156 = vmatprep.subr.bf16.mxu1 %v5824_v35 }
 0x3f3   :  { %4157 = vmatpush1.bf16.msra.mxu1 %v5822_v36 }
 0x3f4   :  { %4158 = vmatprep.subr.bf16.mxu1 %v5827_v11 }
 0x3f7   :  { %4159 = vmatpush1.bf16.msra.mxu1 %v5825_v37 }
 0x3f8   :  { %4160 = vmatprep.subr.bf16.mxu1 %v5830_v38 }
 0x3fb   :  { %4161 = vmatpush1.bf16.msra.mxu1 %v5828_v41 }
 0x3fc   :  { %4162 = vmatprep.subr.bf16.mxu1 %v5833_v39 }
 0x3ff   :  { %4163 = vmatpush1.bf16.msra.mxu1 %v5831_v40 }
 0x400   :  { %4164 = vmatprep.subr.bf16.mxu1 %v5836_v42 }
 0x403   :  { %4165 = vmatpush1.bf16.msra.mxu1 %v5834_v43 }
 0x404   :  { %4166 = vmatprep.subr.bf16.mxu1 %v5839_v44 }
 0x407   :  { %4167 = vmatpush1.bf16.msra.mxu1 %v5837_v45 }
 0x408   :  { %4168 = vmatprep.subr.bf16.mxu1 %v5842_v53 }
 0x40b   :  { %4169 = vmatpush1.bf16.msra.mxu1 %v5840_v46 }
 0x40c   :  { %4170 = vmatprep.subr.bf16.mxu1 %v5845_v30 }
 0x40f   :  { %4171 = vmatpush1.bf16.msra.mxu1 %v5843_v48 }
 0x410   :  { %4172 = vmatprep.subr.bf16.mxu1 %v5848_v51 }
 0x413   :  { %4173 = vmatpush1.bf16.msra.mxu1 %v5846_v52 }
 0x414   :  { %4174 = vmatprep.subr.bf16.mxu1 %v5851_v55 }
 0x417   :  { %4175 = vmatpush1.bf16.msra.mxu1 %v5849_v56 }
 0x418   :  { %4946 = vmatprep.subr.bf16.mxu1 %v5852_v58 }
 0x41a   :  { %4177 = vmatmul.mubr.bf16.vlgmr.msra.gmra.mrb[8].mxu1 %v3705_v60 }
 0x41b   :  { %4947 = vmatpush3.bf16.msra.mxu1 %v5853_v59 }
 0x41c   :  { %4948 = vmatprep.subr.bf16.mxu1 %v5854_v61 }
 0x41f   :  { %4949 = vmatpush3.bf16.msra.mxu1 %v5855_v0 }
 0x420   :  { %4950 = vmatprep.subr.bf16.mxu1 %v5856_v2 }
 0x423   :  { %4951 = vmatpush3.bf16.msra.mxu1 %v5857_v3 }
 0x424   :  { %4952 = vmatprep.subr.bf16.mxu1 %v5858_v4 }
 0x427   :  { %4953 = vmatpush3.bf16.msra.mxu1 %v5859_v5 }
 0x428   :  { %4954 = vmatprep.subr.bf16.mxu1 %v5860_v6 }
 0x42b   :  { %4955 = vmatpush3.bf16.msra.mxu1 %v5861_v7 }
 0x42c   :  { %4956 = vmatprep.subr.bf16.mxu1 %v5862_v49 }
 0x42f   :  { %4957 = vmatpush3.bf16.msra.mxu1 %v5863_v8 }
 0x430   :  { %4958 = vmatprep.subr.bf16.mxu1 %v5864_v9 }
 0x433   :  { %4959 = vmatpush3.bf16.msra.mxu1 %v5865_v10 }
 0x434   :  { %4960 = vmatprep.subr.bf16.mxu1 %v5866_v12 }
 0x437   :  { %4961 = vmatpush3.bf16.msra.mxu1 %v5867_v13 }
 0x4ed   :  { %v4178_v16 = vpop.f32.mrb[8].mxu1 }
 0x4ee   :  { %v4972_v31 = vadd.f32 %v4178_v16, %v3776_v15  ;;  %v4180_v17 = vpop.f32.mrb[9].mxu1 }
 0x4ef   :  { %v4973_v18 = vadd.f32 %v4180_v17, %v3780_v21  ;;  %v4182_v19 = vpop.f32.mrb[10].mxu1 }
 0x4f0   :  { %v4185_v20 = vmax.f32 %v4972_v31, 0.0  ;;  %v4183_v22 = vpop.f32.mrb[11].mxu1 }
 0x4f1   :  { %v4186_v23 = vmax.f32 %v4973_v18, 0.0 }
 0x4f2   :  { %v4187_v25 = vpack.c.bf16 %v4185_v20, %v4185_v20 }
 0x4f3   :  { %v4188_v24 = vpack.c.bf16 %v4186_v23, %v4186_v23 }
 0x4f5   :  { %4356 = vmatprep.mubr.bf16.mxu1 %v4188_v24 }
 0x4f6   :  { %4357 = vmatmul.mubr.bf16.vlgmr.msra.gmra.mrb[12].mxu1 %v4187_v25 }
 0x5c9   :  { %v4962_v26 = vpop.f32.mrb[12].mxu1 }
 0x5ca   :  { %v4963_v28 = vpop.f32.mrb[13].mxu1 }
 0x5cb   :  { %v4964_v29 = vadd.f32 %v4963_v28, %v4962_v26  ;;  %v4965_v63 = vpop.f32.mrb[14].mxu1 }
 0x5cc   :  { %v4966_v32 = vpop.f32.mrb[15].mxu1 }
 0x5cd   :  { %v4359_v62 = vadd.f32 %v4964_v29, %v4929_v27 }
 0x5cf   :  { %v4364_v1 = vpack.c.bf16 %v4359_v62, %v4359_v62 }
 0x5d1   :  { %4365 = vst [vmem:[#allocation17] sm:$0xf] %v4364_v1 }
 0x5d2   :  { %6077 = shalt.err (!%p6074_p6)
}
 0x5d3   :  { %s6078_s21 = scalar_lea.hbm %s6379_s9, 64 }
 0x5d4   :  { %p6079_p7 = scmp.ne.s32.totalorder %s6379_s9, %s6078_s21  ;;  %p6082_p8 = scmp.lt.u32.totalorder %s6078_s21, %s6379_s9 }
 0x5d6   :  { %p6084_p9 = pnand %p6082_p8, %p6079_p7 }
 0x5d8   :  { %6087 = shalt.err (!%p6084_p9)
}
 0x5d9   :  { %4375 = dma.vmem_to_hbm [thread:$0]  %s4373_s25, 64, %s6379_s9, [#allocation4]  }
 0x5da   :  { %6098 = dma.done.wait [#allocation4], 64  }
 0x5db   :  { %6099 = vsyncadd [#allocation4], 4294967232 }
 0x5dc   :  { %4379 = vsyncpa [#allocation3], 1 }
 0x5dd   :  { %4380 = vsyncpa [#allocation6], 1 }
 0x5de   :  { %4381 = vsyncpa [#allocation9], 1 }
 0x5df   :  { %4382 = vsyncpa [#allocation12], 1 }
 0x5e0   :  { %4383 = vsyncpa [#allocation15], 1 }
 0x5e1   :  { %4384 = vsyncpa [#allocation4], 1 }

</bundles_post_ra>
